<compile_context>
chip_gen: v7x
topology: tpu7x:2x2x1
jax: 0.10.0
libtpu: 0.0.40
codegen_flags: <defaults>
</compile_context>

<pallas_src>
import functools
import math

import jax
import jax.numpy as jnp
from jax import lax
from jax.experimental import pallas as pl
from jax.experimental.pallas import tpu as pltpu

D_MODEL = 192
N_HEADS = 2
HEAD_DIM = D_MODEL // N_HEADS          # 96 (true head width)
HEAD_PAD = 128                         # zero-padded, lane-aligned head width
DIM_FF = 192
N_LAYERS = 2
LN_EPS = 1e-5
_NEG_BIG = -1e30                       # acts as -inf for padded class columns
_HI = lax.Precision.HIGHEST
_VMEM_LIMIT = 48 * 1024 * 1024         # leave headroom on v7x's 64 MiB physical VMEM


def _round_up(a, m):
    return (a + m - 1) // m * m


# --------------------- fused 2-layer transformer encoder kernel ---------------------


def _layer_norm(x, g, b):
    mu = jnp.mean(x, axis=-1, keepdims=True)
    xc = x - mu
    var = jnp.mean(xc * xc, axis=-1, keepdims=True)
    return xc * lax.rsqrt(var + LN_EPS) * g + b


def _encoder_kernel(x_ref, wqkv_ref, bqkv_ref, wo_ref, bo_ref, g1_ref, be1_ref,
                    w1_ref, b1_ref, w2_ref, b2_ref, g2_ref, be2_ref, out_ref,
                    *, dtype, approx):
    scale = 1.0 / math.sqrt(HEAD_DIM)
    x = x_ref[...]                                          # (S, D) f32
    for layer in range(N_LAYERS):                           # both layers stay in VMEM
        xl = x.astype(dtype)
        # one fused (S, D) @ (D, 6*HEAD_PAD) QKV projection, f32 accumulation
        qkv = jnp.dot(xl, wqkv_ref[layer],
                      preferred_element_type=jnp.float32) + bqkv_ref[layer]
        heads = []
        for h in range(N_HEADS):                            # static 2-iteration loop
            base = 3 * HEAD_PAD * h                         # 128-aligned static slices
            qh = qkv[:, base:base + HEAD_PAD]
            kh = qkv[:, base + HEAD_PAD:base + 2 * HEAD_PAD]
            vh = qkv[:, base + 2 * HEAD_PAD:base + 3 * HEAD_PAD]
            s = lax.dot_general(qh.astype(dtype), kh.astype(dtype),
                                (((1,), (1,)), ((), ())),
                                preferred_element_type=jnp.float32) * scale   # (S, S)
            m = jnp.max(s, axis=-1, keepdims=True)
            e = jnp.exp(s - m)
            denom = jnp.sum(e, axis=-1, keepdims=True)
            if approx:
                p = e * pl.reciprocal(denom, approx=True)   # EUP slot, otherwise idle
            else:
                p = e / denom
            heads.append(jnp.dot(p.astype(dtype), vh.astype(dtype),
                                 preferred_element_type=jnp.float32))  # (S, HEAD_PAD)
        # fused output projection: (S, 2*HEAD_PAD) @ (2*HEAD_PAD, D)
        o_cat = jnp.concatenate(heads, axis=-1)
        attn = jnp.dot(o_cat.astype(dtype), wo_ref[layer],
                       preferred_element_type=jnp.float32) + bo_ref[layer]
        x1 = _layer_norm(x + attn, g1_ref[layer], be1_ref[layer])
        h1 = jnp.maximum(
            jnp.dot(x1.astype(dtype), w1_ref[layer],
                    preferred_element_type=jnp.float32) + b1_ref[layer], 0.0)
        ff = jnp.dot(h1.astype(dtype), w2_ref[layer],
                     preferred_element_type=jnp.float32) + b2_ref[layer]
        x = _layer_norm(x1 + ff, g2_ref[layer], be2_ref[layer])
    out_ref[...] = x


# ------------------- fc + cross-entropy + precision@1 (tiled, W-stationary) ---------


def _loss_head_kernel(x_ref, w_ref, b_ref, lab_ref,
                      row_loss_ref, row_hit_ref,
                      m_sc, l_sc, cl_sc, pred_sc,
                      *, b_true, bt, ct):
    ci = pl.program_id(0)                      # class tile (outer; W stays resident)
    bi = pl.program_id(1)                      # batch tile (inner)
    nc = pl.num_programs(0)

    rows = pl.ds(pl.multiple_of(bi * bt, 8), bt)   # this tile's slice of per-row state
    big = jnp.int32(2 ** 30)

    @pl.when(ci == 0)
    def _init():
        m_sc[rows, :] = jnp.full((bt, 1), -jnp.inf, jnp.float32)
        l_sc[rows, :] = jnp.zeros((bt, 1), jnp.float32)
        cl_sc[rows, :] = jnp.zeros((bt, 1), jnp.float32)
        pred_sc[rows, :] = jnp.full((bt, 1), big, jnp.int32)

    labels = lab_ref[...]                                              # (bt, 1) i32
    # MXU: (bt, D) x (D, ct) with f32 accumulation; bias add in f32.
    logits = jnp.dot(x_ref[...], w_ref[...],
                     preferred_element_type=jnp.float32) + b_ref[...]  # (bt, ct) f32

    # grid-invariant local iota (hoisted by the compiler); shift the label instead
    iota = lax.broadcasted_iota(jnp.int32, (bt, ct), 1)
    lab_local = labels - ci * ct

    # --- streaming log-sum-exp + label-logit + first-argmax over class tiles ---
    t_max = jnp.max(logits, axis=1, keepdims=True)                     # (bt, 1)
    m_old = m_sc[rows, :]
    m_new = jnp.maximum(m_old, t_max)
    alpha = jnp.exp(m_old - m_new)
    l_sc[rows, :] = alpha * l_sc[rows, :] + jnp.sum(jnp.exp(logits - m_new),
                                                    axis=1, keepdims=True)
    cl_sc[rows, :] = cl_sc[rows, :] + jnp.sum(
        jnp.where(iota == lab_local, logits, 0.0), axis=1, keepdims=True)

    # first index attaining the tile max (torch.topk tie-break = lowest index)
    t_arg = ci * ct + jnp.min(jnp.where(logits == t_max, iota, big),
                              axis=1, keepdims=True)
    pred_old = pred_sc[rows, :]
    pred_sc[rows, :] = jnp.where(
        t_max > m_old, t_arg,
        jnp.where(t_max == m_old, jnp.minimum(pred_old, t_arg), pred_old))
    m_sc[rows, :] = m_new

    @pl.when(ci == nc - 1)
    def _finalize():
        ridx = bi * bt + lax.broadcasted_iota(jnp.int32, (bt, 1), 0)
        valid = ridx < b_true                                          # mask batch pad
        lse = m_sc[rows, :] + jnp.log(l_sc[rows, :])
        row_loss_ref[rows, :] = jnp.where(valid, lse - cl_sc[rows, :], 0.0)
        row_hit_ref[rows, :] = jnp.where(valid & (pred_sc[rows, :] == labels), 1.0, 0.0)


# ------------------------------------ module ---------------------------------------


class LossFunctionWithTransformerPallas:
    """JAX/Pallas port of the PyTorch LossFunction_with_transformer (eval forward)."""

    def __init__(self, nOut, nClasses, key=jax.random.PRNGKey(0),
                 compute_dtype=jnp.bfloat16, bt_max=256, ct_max=4096):
        assert nOut == D_MODEL, "fc consumes the d_model=192 transformer output"
        self.test_normalize = True
        self.nOut = nOut
        self.nClasses = nClasses
        self.compute_dtype = compute_dtype
        self.bt_max = int(bt_max)

        k1, k2, kfc = jax.random.split(key, 3)
        self.layers = [self._init_layer(k1), self._init_layer(k2)]
        self._enc = self._pack_encoder(self.layers, compute_dtype)

        # ---- fc: pre-transposed + class-padded, cached once ----
        kw, kb = jax.random.split(kfc)
        bound = 1.0 / math.sqrt(nOut)
        self.fc_w_t = jax.random.uniform(kw, (nOut, nClasses), jnp.float32, -bound, bound)
        self.fc_b = jax.random.uniform(kb, (nClasses,), jnp.float32, -bound, bound)

        c128 = _round_up(nClasses, 128)
        self._nc = max(1, -(-c128 // int(ct_max)))
        self._ct = _round_up(-(-c128 // self._nc), 128)
        self._c_pad = self._ct * self._nc
        pad = self._c_pad - nClasses
        self._fc_w_pad = jnp.pad(self.fc_w_t, ((0, 0), (0, pad))).astype(compute_dtype)
        self._fc_b_pad = jnp.concatenate(
            [self.fc_b, jnp.full((pad,), _NEG_BIG, jnp.float32)]).reshape(1, self._c_pad)

        print('Initialised Softmax Loss')

    @staticmethod
    def _init_layer(key):
        d, f, h, hd = D_MODEL, DIM_FF, N_HEADS, HEAD_DIM
        ks = jax.random.split(key, 12)
        u = lambda k, shape, fan_in: jax.random.uniform(
            k, shape, jnp.float32, -1.0 / math.sqrt(fan_in), 1.0 / math.sqrt(fan_in))
        return dict(
            wq=u(ks[0], (h, d, hd), d), bq=u(ks[1], (h, 1, hd), d),
            wk=u(ks[2], (h, d, hd), d), bk=u(ks[3], (h, 1, hd), d),
            wv=u(ks[4], (h, d, hd), d), bv=u(ks[5], (h, 1, hd), d),
            wo=u(ks[6], (h, hd, d), d), bo=u(ks[7], (1, d), d),
            g1=jnp.ones((1, d), jnp.float32), be1=jnp.zeros((1, d), jnp.float32),
            w1=u(ks[8], (d, f), d), b1=u(ks[9], (1, f), d),
            w2=u(ks[10], (f, d), f), b2=u(ks[11], (1, d), f),
            g2=jnp.ones((1, d), jnp.float32), be2=jnp.zeros((1, d), jnp.float32),
        )

    @staticmethod
    def _pack_encoder(layers, dtype):
        """Stack both layers, zero-pad head_dim 96->128, fuse QKV / output heads."""
        pad_hd = HEAD_PAD - HEAD_DIM
        wqkv, bqkv, wo = [], [], []
        rest = {k: [] for k in ("bo", "g1", "be1", "w1", "b1", "w2", "b2", "g2", "be2")}
        for p in layers:
            cols, bcols = [], []
            for h in range(N_HEADS):
                for w, b in ((p["wq"][h], p["bq"][h]), (p["wk"][h], p["bk"][h]),
                             (p["wv"][h], p["bv"][h])):
                    cols.append(jnp.pad(w, ((0, 0), (0, pad_hd))))      # (D, 128)
                    bcols.append(jnp.pad(b, ((0, 0), (0, pad_hd))))     # (1, 128)
            wqkv.append(jnp.concatenate(cols, axis=1))                  # (D, 6*128)
            bqkv.append(jnp.concatenate(bcols, axis=1))                 # (1, 6*128)
            wo.append(jnp.concatenate(
                [jnp.pad(p["wo"][h], ((0, pad_hd), (0, 0)))
                 for h in range(N_HEADS)], axis=0))                     # (2*128, D)
            for k in rest:
                rest[k].append(p[k])
        st = lambda xs, dt=jnp.float32: jnp.stack(xs).astype(dt)
        out = dict(wqkv=st(wqkv, dtype), bqkv=st(bqkv), wo=st(wo, dtype))
        for k in ("bo", "g1", "be1", "b1", "b2", "g2", "be2"):
            out[k] = st(rest[k])
        out["w1"] = st(rest["w1"], dtype)
        out["w2"] = st(rest["w2"], dtype)
        return out

    # -------------------------------- forward --------------------------------------
    def __call__(self, x, label=None):
        x = jnp.asarray(x, jnp.float32)
        e = self._enc
        enc_kernel = functools.partial(
            _encoder_kernel, dtype=self.compute_dtype,
            approx=self.compute_dtype != jnp.float32)
        vmem = pl.BlockSpec(memory_space=pltpu.MemorySpace.VMEM)
        trans = pl.pallas_call(
            enc_kernel,
            out_shape=jax.ShapeDtypeStruct(x.shape, jnp.float32),
            in_specs=[vmem] * 13,
            out_specs=vmem,
            compiler_params=pltpu.CompilerParams(vmem_limit_bytes=_VMEM_LIMIT),
        )(x, e["wqkv"], e["bqkv"], e["wo"], e["bo"], e["g1"], e["be1"],
          e["w1"], e["b1"], e["w2"], e["b2"], e["g2"], e["be2"])
        if label is None:
            return trans

        B = trans.shape[0]
        sub = 8 if self.compute_dtype == jnp.float32 else 16   # packed sublane tile
        bt = max(sub, _round_up(min(self.bt_max, _round_up(B, sub)), sub))
        b_pad = _round_up(B, bt)
        nb = b_pad // bt
        ct, nc = self._ct, self._nc

        xb = trans.astype(self.compute_dtype)
        lab = jnp.asarray(label, jnp.int32).reshape(B, 1)
        if b_pad != B:
            xb = jnp.pad(xb, ((0, b_pad - B), (0, 0)))
            lab = jnp.pad(lab, ((0, b_pad - B), (0, 0)))

        kernel = functools.partial(_loss_head_kernel, b_true=B, bt=bt, ct=ct)
        row_loss, row_hit = pl.pallas_call(
            kernel,
            out_shape=(jax.ShapeDtypeStruct((b_pad, 1), jnp.float32),
                       jax.ShapeDtypeStruct((b_pad, 1), jnp.float32)),
            grid_spec=pltpu.PrefetchScalarGridSpec(
                num_scalar_prefetch=0,
                grid=(nc, nb),                      # class OUTER: fc weight stationary
                in_specs=[
                    pl.BlockSpec((bt, D_MODEL), lambda ci, bi: (bi, 0)),
                    pl.BlockSpec((D_MODEL, ct), lambda ci, bi: (0, ci)),  # read once
                    pl.BlockSpec((1, ct), lambda ci, bi: (0, ci)),
                    pl.BlockSpec((bt, 1), lambda ci, bi: (bi, 0)),
                ],
                out_specs=(
                    pl.BlockSpec((b_pad, 1), lambda ci, bi: (0, 0)),  # resident, 1 wb
                    pl.BlockSpec((b_pad, 1), lambda ci, bi: (0, 0)),
                ),
                scratch_shapes=[
                    pltpu.VMEM((b_pad, 1), jnp.float32),    # running max
                    pltpu.VMEM((b_pad, 1), jnp.float32),    # running sum(exp)
                    pltpu.VMEM((b_pad, 1), jnp.float32),    # label logit
                    pltpu.VMEM((b_pad, 1), jnp.int32),      # running first-argmax
                ],
            ),
            compiler_params=pltpu.CompilerParams(
                dimension_semantics=("arbitrary", "arbitrary"),
                vmem_limit_bytes=_VMEM_LIMIT,
            ),
        )(xb, self._fc_w_pad, self._fc_b_pad, lab)

        loss_sum = jnp.sum(row_loss)
        n_correct = jnp.sum(row_hit)
        nloss = loss_sum / B                                   # global B, not tile size
        prec1 = jnp.reshape(n_correct * (100.0 / B), (1,))
        return nloss, prec1


# ------------------------------ pure-JAX references ---------------------------------


def _ref_ln(x, g, b):
    mu = jnp.mean(x, axis=-1, keepdims=True)
    var = jnp.mean((x - mu) ** 2, axis=-1, keepdims=True)
    return (x - mu) * lax.rsqrt(var + LN_EPS) * g + b


def _ref_layer(x, p):
    attn = p["bo"]
    for h in range(N_HEADS):
        qh = jnp.dot(x, p["wq"][h], precision=_HI) + p["bq"][h]
        kh = jnp.dot(x, p["wk"][h], precision=_HI) + p["bk"][h]
        vh = jnp.dot(x, p["wv"][h], precision=_HI) + p["bv"][h]
        s = jnp.dot(qh, kh.T, precision=_HI) / math.sqrt(HEAD_DIM)
        e = jnp.exp(s - jnp.max(s, axis=-1, keepdims=True))
        pr = e / jnp.sum(e, axis=-1, keepdims=True)
        attn = attn + jnp.dot(jnp.dot(pr, vh, precision=_HI), p["wo"][h], precision=_HI)
    x1 = _ref_ln(x + attn, p["g1"], p["be1"])
    hh = jnp.maximum(jnp.dot(x1, p["w1"], precision=_HI) + p["b1"], 0.0)
    ff = jnp.dot(hh, p["w2"], precision=_HI) + p["b2"]
    return _ref_ln(x1 + ff, p["g2"], p["be2"])


def _ref_forward(mod, x, label=None):
    h = x
    for p in mod.layers:
        h = _ref_layer(h, p)
    if label is None:
        return h
    B = x.shape[0]
    logits = jnp.dot(h, mod.fc_w_t, precision=_HI) + mod.fc_b
    lse = jax.scipy.special.logsumexp(logits, axis=1)
    loss = jnp.mean(lse - logits[jnp.arange(B), label])
    prec = jnp.sum(jnp.argmax(logits, axis=1) == label) * (100.0 / B)
    return loss, prec


# ------------------------------- demo / smoke test -----------------------------------

if __name__ == "__main__":
    S, nOut, nClasses = 8, 192, 40

    key = jax.random.PRNGKey(0)
    kx, kl, kp = jax.random.split(key, 3)
    x = jax.random.normal(kx, (S, nOut), jnp.float32)
    label = jax.random.randint(kl, (S,), 0, nClasses, jnp.int32)

    # ---- f32 compute path: tight check against HIGHEST-precision pure-JAX reference
    mod32 = LossFunctionWithTransformerPallas(nOut, nClasses, key=kp,
                                              compute_dtype=jnp.float32)
    trans32 = jax.block_until_ready(mod32(x))                 # label=None path
    loss32, prec32 = jax.block_until_ready(mod32(x, label))   # (loss, prec@1) path
    trans_ref = _ref_forward(mod32, x)
    loss_ref, prec_ref = _ref_forward(mod32, x, label)
    assert jnp.allclose(trans32, trans_ref, rtol=3e-3, atol=3e-3)
    assert jnp.allclose(loss32, loss_ref, rtol=3e-3, atol=3e-3), (loss32, loss_ref)
    assert jnp.allclose(prec32[0], prec_ref, atol=1e-3), (prec32, prec_ref)

    # ---- default bf16-into-MXU path (perf-review config): loose numeric check
    mod_bf = LossFunctionWithTransformerPallas(nOut, nClasses, key=kp)
    trans_bf = jax.block_until_ready(mod_bf(x))
    loss_bf, prec_bf = jax.block_until_ready(mod_bf(x, label))
    assert bool(jnp.all(jnp.isfinite(trans_bf)))
    assert jnp.allclose(trans_bf, trans_ref, rtol=1e-1, atol=2e-1)
    assert jnp.allclose(loss_bf, loss_ref, rtol=8e-2, atol=8e-2), (loss_bf, loss_ref)
    assert 0.0 <= float(prec_bf[0]) <= 100.0

    # ---- multi-tile streaming path: several batch AND class tiles, ragged edges
    # B=20 -> bt=8, b_pad=24, nb=3; 300 classes -> ct=128, nc=3, padded classes masked.
    B2, C2 = 20, 300
    x2 = jax.random.normal(jax.random.PRNGKey(3), (B2, nOut), jnp.float32)
    l2 = jax.random.randint(jax.random.PRNGKey(4), (B2,), 0, C2, jnp.int32)
    mod2 = LossFunctionWithTransformerPallas(nOut, C2, key=jax.random.PRNGKey(5),
                                             compute_dtype=jnp.float32,
                                             bt_max=8, ct_max=128)
    loss2, prec2 = jax.block_until_ready(mod2(x2, l2))
    loss2_ref, prec2_ref = _ref_forward(mod2, x2, l2)
    assert jnp.allclose(loss2, loss2_ref, rtol=3e-3, atol=3e-3), (loss2, loss2_ref)
    assert jnp.allclose(prec2[0], prec2_ref, atol=1e-3), (prec2, prec2_ref)

    print("KERNEL_OK")
</pallas_src>

<mosaic_0001>
module attributes {stable_mosaic.version = 11 : i64} {
  func.func @_encoder_kernel(%arg0: memref<8x192xf32, #tpu.memory_space<vmem>>, %arg1: memref<2x192x768xf32, #tpu.memory_space<vmem>>, %arg2: memref<2x1x768xf32, #tpu.memory_space<vmem>>, %arg3: memref<2x256x192xf32, #tpu.memory_space<vmem>>, %arg4: memref<2x1x192xf32, #tpu.memory_space<vmem>>, %arg5: memref<2x1x192xf32, #tpu.memory_space<vmem>>, %arg6: memref<2x1x192xf32, #tpu.memory_space<vmem>>, %arg7: memref<2x192x192xf32, #tpu.memory_space<vmem>>, %arg8: memref<2x1x192xf32, #tpu.memory_space<vmem>>, %arg9: memref<2x192x192xf32, #tpu.memory_space<vmem>>, %arg10: memref<2x1x192xf32, #tpu.memory_space<vmem>>, %arg11: memref<2x1x192xf32, #tpu.memory_space<vmem>>, %arg12: memref<2x1x192xf32, #tpu.memory_space<vmem>>, %arg13: memref<8x192xf32, #tpu.memory_space<vmem>>) attributes {dimension_semantics = [], scalar_prefetch = 0 : i64, scratch_operands = 0 : i64, tpu.core_type = #tpu.core_type<tc>} {
    %c0 = arith.constant 0 : index
    %c0_0 = arith.constant 0 : index
    %0 = vector.load %arg0[%c0, %c0_0] : memref<8x192xf32, #tpu.memory_space<vmem>>, vector<8x192xf32>
    %c0_1 = arith.constant 0 : index
    %c0_2 = arith.constant 0 : index
    %c0_3 = arith.constant 0 : index
    %1 = vector.load %arg1[%c0_1, %c0_2, %c0_3] : memref<2x192x768xf32, #tpu.memory_space<vmem>>, vector<1x192x768xf32>
    %2 = vector.shape_cast %1 : vector<1x192x768xf32> to vector<192x768xf32>
    %cst = arith.constant dense<0.000000e+00> : vector<8x768xf32>
    %3 = tpu.matmul %0, %2, %cst {dimension_numbers = #tpu.dot_dimension_numbers<[1], [0], [0], [1], [0, 0, 1, 1], [], []>} : vector<8x192xf32>, vector<192x768xf32>, vector<8x768xf32> -> vector<8x768xf32>
    %c0_4 = arith.constant 0 : index
    %c0_5 = arith.constant 0 : index
    %c0_6 = arith.constant 0 : index
    %4 = vector.load %arg2[%c0_4, %c0_5, %c0_6] : memref<2x1x768xf32, #tpu.memory_space<vmem>>, vector<1x1x768xf32>
    %5 = vector.shape_cast %4 : vector<1x1x768xf32> to vector<1x768xf32>
    %6 = vector.broadcast %5 : vector<1x768xf32> to vector<8x768xf32>
    %7 = arith.addf %3, %6 : vector<8x768xf32>
    %8 = vector.extract_strided_slice %7 {offsets = [0, 0], sizes = [8, 128], strides = [1, 1]} : vector<8x768xf32> to vector<8x128xf32>
    %9 = vector.extract_strided_slice %7 {offsets = [0, 128], sizes = [8, 128], strides = [1, 1]} : vector<8x768xf32> to vector<8x128xf32>
    %10 = vector.extract_strided_slice %7 {offsets = [0, 256], sizes = [8, 128], strides = [1, 1]} : vector<8x768xf32> to vector<8x128xf32>
    %cst_7 = arith.constant dense<0.000000e+00> : vector<8x8xf32>
    %11 = tpu.matmul %8, %9, %cst_7 {dimension_numbers = #tpu.dot_dimension_numbers<[1], [1], [0], [0], [0, 0, 1, 0], [], []>} : vector<8x128xf32>, vector<8x128xf32>, vector<8x8xf32> -> vector<8x8xf32>
    %cst_8 = arith.constant 0.102062076 : f32
    %12 = vector.broadcast %cst_8 : f32 to vector<8x8xf32>
    %13 = arith.mulf %11, %12 : vector<8x8xf32>
    %cst_9 = arith.constant dense<0xFF800000> : vector<8xf32>
    %14 = vector.multi_reduction <maximumf>, %13, %cst_9 [1] : vector<8x8xf32> to vector<8xf32>
    %15 = vector.shape_cast %14 : vector<8xf32> to vector<8x1xf32>
    %16 = vector.broadcast %15 : vector<8x1xf32> to vector<8x8xf32>
    %17 = arith.subf %13, %16 : vector<8x8xf32>
    %18 = math.exp %17 : vector<8x8xf32>
    %cst_10 = arith.constant dense<0.000000e+00> : vector<8xf32>
    %19 = vector.multi_reduction <add>, %18, %cst_10 [1] : vector<8x8xf32> to vector<8xf32>
    %20 = vector.shape_cast %19 : vector<8xf32> to vector<8x1xf32>
    %21 = vector.broadcast %20 : vector<8x1xf32> to vector<8x8xf32>
    %22 = arith.divf %18, %21 : vector<8x8xf32>
    %cst_11 = arith.constant dense<0.000000e+00> : vector<8x128xf32>
    %23 = tpu.matmul %22, %10, %cst_11 {dimension_numbers = #tpu.dot_dimension_numbers<[1], [0], [0], [1], [0, 0, 1, 1], [], []>} : vector<8x8xf32>, vector<8x128xf32>, vector<8x128xf32> -> vector<8x128xf32>
    %24 = vector.extract_strided_slice %7 {offsets = [0, 384], sizes = [8, 128], strides = [1, 1]} : vector<8x768xf32> to vector<8x128xf32>
    %25 = vector.extract_strided_slice %7 {offsets = [0, 512], sizes = [8, 128], strides = [1, 1]} : vector<8x768xf32> to vector<8x128xf32>
    %26 = vector.extract_strided_slice %7 {offsets = [0, 640], sizes = [8, 128], strides = [1, 1]} : vector<8x768xf32> to vector<8x128xf32>
    %cst_12 = arith.constant dense<0.000000e+00> : vector<8x8xf32>
    %27 = tpu.matmul %24, %25, %cst_12 {dimension_numbers = #tpu.dot_dimension_numbers<[1], [1], [0], [0], [0, 0, 1, 0], [], []>} : vector<8x128xf32>, vector<8x128xf32>, vector<8x8xf32> -> vector<8x8xf32>
    %cst_13 = arith.constant 0.102062076 : f32
    %28 = vector.broadcast %cst_13 : f32 to vector<8x8xf32>
    %29 = arith.mulf %27, %28 : vector<8x8xf32>
    %cst_14 = arith.constant dense<0xFF800000> : vector<8xf32>
    %30 = vector.multi_reduction <maximumf>, %29, %cst_14 [1] : vector<8x8xf32> to vector<8xf32>
    %31 = vector.shape_cast %30 : vector<8xf32> to vector<8x1xf32>
    %32 = vector.broadcast %31 : vector<8x1xf32> to vector<8x8xf32>
    %33 = arith.subf %29, %32 : vector<8x8xf32>
    %34 = math.exp %33 : vector<8x8xf32>
    %cst_15 = arith.constant dense<0.000000e+00> : vector<8xf32>
    %35 = vector.multi_reduction <add>, %34, %cst_15 [1] : vector<8x8xf32> to vector<8xf32>
    %36 = vector.shape_cast %35 : vector<8xf32> to vector<8x1xf32>
    %37 = vector.broadcast %36 : vector<8x1xf32> to vector<8x8xf32>
    %38 = arith.divf %34, %37 : vector<8x8xf32>
    %cst_16 = arith.constant dense<0.000000e+00> : vector<8x128xf32>
    %39 = tpu.matmul %38, %26, %cst_16 {dimension_numbers = #tpu.dot_dimension_numbers<[1], [0], [0], [1], [0, 0, 1, 1], [], []>} : vector<8x8xf32>, vector<8x128xf32>, vector<8x128xf32> -> vector<8x128xf32>
    %40 = tpu.concatenate %23, %39 in 1 : vector<8x128xf32>, vector<8x128xf32> -> vector<8x256xf32>
    %c0_17 = arith.constant 0 : index
    %c0_18 = arith.constant 0 : index
    %c0_19 = arith.constant 0 : index
    %41 = vector.load %arg3[%c0_17, %c0_18, %c0_19] : memref<2x256x192xf32, #tpu.memory_space<vmem>>, vector<1x256x192xf32>
    %42 = vector.shape_cast %41 : vector<1x256x192xf32> to vector<256x192xf32>
    %cst_20 = arith.constant dense<0.000000e+00> : vector<8x192xf32>
    %43 = tpu.matmul %40, %42, %cst_20 {dimension_numbers = #tpu.dot_dimension_numbers<[1], [0], [0], [1], [0, 0, 1, 1], [], []>} : vector<8x256xf32>, vector<256x192xf32>, vector<8x192xf32> -> vector<8x192xf32>
    %c0_21 = arith.constant 0 : index
    %c0_22 = arith.constant 0 : index
    %c0_23 = arith.constant 0 : index
    %44 = vector.load %arg4[%c0_21, %c0_22, %c0_23] : memref<2x1x192xf32, #tpu.memory_space<vmem>>, vector<1x1x192xf32>
    %45 = vector.shape_cast %44 : vector<1x1x192xf32> to vector<1x192xf32>
    %46 = vector.broadcast %45 : vector<1x192xf32> to vector<8x192xf32>
    %47 = arith.addf %43, %46 : vector<8x192xf32>
    %48 = arith.addf %0, %47 : vector<8x192xf32>
    %c0_24 = arith.constant 0 : index
    %c0_25 = arith.constant 0 : index
    %c0_26 = arith.constant 0 : index
    %49 = vector.load %arg5[%c0_24, %c0_25, %c0_26] : memref<2x1x192xf32, #tpu.memory_space<vmem>>, vector<1x1x192xf32>
    %50 = vector.shape_cast %49 : vector<1x1x192xf32> to vector<1x192xf32>
    %c0_27 = arith.constant 0 : index
    %c0_28 = arith.constant 0 : index
    %c0_29 = arith.constant 0 : index
    %51 = vector.load %arg6[%c0_27, %c0_28, %c0_29] : memref<2x1x192xf32, #tpu.memory_space<vmem>>, vector<1x1x192xf32>
    %52 = vector.shape_cast %51 : vector<1x1x192xf32> to vector<1x192xf32>
    %cst_30 = arith.constant dense<0.000000e+00> : vector<8xf32>
    %53 = vector.multi_reduction <add>, %48, %cst_30 [1] : vector<8x192xf32> to vector<8xf32>
    %54 = vector.shape_cast %53 : vector<8xf32> to vector<8x1xf32>
    %cst_31 = arith.constant 1.920000e+02 : f32
    %55 = vector.broadcast %cst_31 : f32 to vector<8x1xf32>
    %56 = arith.divf %54, %55 : vector<8x1xf32>
    %57 = vector.broadcast %56 : vector<8x1xf32> to vector<8x192xf32>
    %58 = arith.subf %48, %57 : vector<8x192xf32>
    %59 = arith.mulf %58, %58 : vector<8x192xf32>
    %cst_32 = arith.constant dense<0.000000e+00> : vector<8xf32>
    %60 = vector.multi_reduction <add>, %59, %cst_32 [1] : vector<8x192xf32> to vector<8xf32>
    %61 = vector.shape_cast %60 : vector<8xf32> to vector<8x1xf32>
    %cst_33 = arith.constant 1.920000e+02 : f32
    %62 = vector.broadcast %cst_33 : f32 to vector<8x1xf32>
    %63 = arith.divf %61, %62 : vector<8x1xf32>
    %cst_34 = arith.constant 9.99999974E-6 : f32
    %64 = vector.broadcast %cst_34 : f32 to vector<8x1xf32>
    %65 = arith.addf %63, %64 : vector<8x1xf32>
    %66 = math.rsqrt %65 : vector<8x1xf32>
    %67 = vector.broadcast %66 : vector<8x1xf32> to vector<8x192xf32>
    %68 = arith.mulf %58, %67 : vector<8x192xf32>
    %69 = vector.broadcast %50 : vector<1x192xf32> to vector<8x192xf32>
    %70 = arith.mulf %68, %69 : vector<8x192xf32>
    %71 = vector.broadcast %52 : vector<1x192xf32> to vector<8x192xf32>
    %72 = arith.addf %70, %71 : vector<8x192xf32>
    %c0_35 = arith.constant 0 : index
    %c0_36 = arith.constant 0 : index
    %c0_37 = arith.constant 0 : index
    %73 = vector.load %arg7[%c0_35, %c0_36, %c0_37] : memref<2x192x192xf32, #tpu.memory_space<vmem>>, vector<1x192x192xf32>
    %74 = vector.shape_cast %73 : vector<1x192x192xf32> to vector<192x192xf32>
    %cst_38 = arith.constant dense<0.000000e+00> : vector<8x192xf32>
    %75 = tpu.matmul %72, %74, %cst_38 {dimension_numbers = #tpu.dot_dimension_numbers<[1], [0], [0], [1], [0, 0, 1, 1], [], []>} : vector<8x192xf32>, vector<192x192xf32>, vector<8x192xf32> -> vector<8x192xf32>
    %c0_39 = arith.constant 0 : index
    %c0_40 = arith.constant 0 : index
    %c0_41 = arith.constant 0 : index
    %76 = vector.load %arg8[%c0_39, %c0_40, %c0_41] : memref<2x1x192xf32, #tpu.memory_space<vmem>>, vector<1x1x192xf32>
    %77 = vector.shape_cast %76 : vector<1x1x192xf32> to vector<1x192xf32>
    %78 = vector.broadcast %77 : vector<1x192xf32> to vector<8x192xf32>
    %79 = arith.addf %75, %78 : vector<8x192xf32>
    %cst_42 = arith.constant 0.000000e+00 : f32
    %80 = vector.broadcast %cst_42 : f32 to vector<8x192xf32>
    %81 = arith.maximumf %79, %80 : vector<8x192xf32>
    %c0_43 = arith.constant 0 : index
    %c0_44 = arith.constant 0 : index
    %c0_45 = arith.constant 0 : index
    %82 = vector.load %arg9[%c0_43, %c0_44, %c0_45] : memref<2x192x192xf32, #tpu.memory_space<vmem>>, vector<1x192x192xf32>
    %83 = vector.shape_cast %82 : vector<1x192x192xf32> to vector<192x192xf32>
    %cst_46 = arith.constant dense<0.000000e+00> : vector<8x192xf32>
    %84 = tpu.matmul %81, %83, %cst_46 {dimension_numbers = #tpu.dot_dimension_numbers<[1], [0], [0], [1], [0, 0, 1, 1], [], []>} : vector<8x192xf32>, vector<192x192xf32>, vector<8x192xf32> -> vector<8x192xf32>
    %c0_47 = arith.constant 0 : index
    %c0_48 = arith.constant 0 : index
    %c0_49 = arith.constant 0 : index
    %85 = vector.load %arg10[%c0_47, %c0_48, %c0_49] : memref<2x1x192xf32, #tpu.memory_space<vmem>>, vector<1x1x192xf32>
    %86 = vector.shape_cast %85 : vector<1x1x192xf32> to vector<1x192xf32>
    %87 = vector.broadcast %86 : vector<1x192xf32> to vector<8x192xf32>
    %88 = arith.addf %84, %87 : vector<8x192xf32>
    %89 = arith.addf %72, %88 : vector<8x192xf32>
    %c0_50 = arith.constant 0 : index
    %c0_51 = arith.constant 0 : index
    %c0_52 = arith.constant 0 : index
    %90 = vector.load %arg11[%c0_50, %c0_51, %c0_52] : memref<2x1x192xf32, #tpu.memory_space<vmem>>, vector<1x1x192xf32>
    %91 = vector.shape_cast %90 : vector<1x1x192xf32> to vector<1x192xf32>
    %c0_53 = arith.constant 0 : index
    %c0_54 = arith.constant 0 : index
    %c0_55 = arith.constant 0 : index
    %92 = vector.load %arg12[%c0_53, %c0_54, %c0_55] : memref<2x1x192xf32, #tpu.memory_space<vmem>>, vector<1x1x192xf32>
    %93 = vector.shape_cast %92 : vector<1x1x192xf32> to vector<1x192xf32>
    %cst_56 = arith.constant dense<0.000000e+00> : vector<8xf32>
    %94 = vector.multi_reduction <add>, %89, %cst_56 [1] : vector<8x192xf32> to vector<8xf32>
    %95 = vector.shape_cast %94 : vector<8xf32> to vector<8x1xf32>
    %cst_57 = arith.constant 1.920000e+02 : f32
    %96 = vector.broadcast %cst_57 : f32 to vector<8x1xf32>
    %97 = arith.divf %95, %96 : vector<8x1xf32>
    %98 = vector.broadcast %97 : vector<8x1xf32> to vector<8x192xf32>
    %99 = arith.subf %89, %98 : vector<8x192xf32>
    %100 = arith.mulf %99, %99 : vector<8x192xf32>
    %cst_58 = arith.constant dense<0.000000e+00> : vector<8xf32>
    %101 = vector.multi_reduction <add>, %100, %cst_58 [1] : vector<8x192xf32> to vector<8xf32>
    %102 = vector.shape_cast %101 : vector<8xf32> to vector<8x1xf32>
    %cst_59 = arith.constant 1.920000e+02 : f32
    %103 = vector.broadcast %cst_59 : f32 to vector<8x1xf32>
    %104 = arith.divf %102, %103 : vector<8x1xf32>
    %cst_60 = arith.constant 9.99999974E-6 : f32
    %105 = vector.broadcast %cst_60 : f32 to vector<8x1xf32>
    %106 = arith.addf %104, %105 : vector<8x1xf32>
    %107 = math.rsqrt %106 : vector<8x1xf32>
    %108 = vector.broadcast %107 : vector<8x1xf32> to vector<8x192xf32>
    %109 = arith.mulf %99, %108 : vector<8x192xf32>
    %110 = vector.broadcast %91 : vector<1x192xf32> to vector<8x192xf32>
    %111 = arith.mulf %109, %110 : vector<8x192xf32>
    %112 = vector.broadcast %93 : vector<1x192xf32> to vector<8x192xf32>
    %113 = arith.addf %111, %112 : vector<8x192xf32>
    %c1 = arith.constant 1 : index
    %c0_61 = arith.constant 0 : index
    %c0_62 = arith.constant 0 : index
    %114 = vector.load %arg1[%c1, %c0_61, %c0_62] : memref<2x192x768xf32, #tpu.memory_space<vmem>>, vector<1x192x768xf32>
    %115 = vector.shape_cast %114 : vector<1x192x768xf32> to vector<192x768xf32>
    %cst_63 = arith.constant dense<0.000000e+00> : vector<8x768xf32>
    %116 = tpu.matmul %113, %115, %cst_63 {dimension_numbers = #tpu.dot_dimension_numbers<[1], [0], [0], [1], [0, 0, 1, 1], [], []>} : vector<8x192xf32>, vector<192x768xf32>, vector<8x768xf32> -> vector<8x768xf32>
    %c1_64 = arith.constant 1 : index
    %c0_65 = arith.constant 0 : index
    %c0_66 = arith.constant 0 : index
    %117 = vector.load %arg2[%c1_64, %c0_65, %c0_66] : memref<2x1x768xf32, #tpu.memory_space<vmem>>, vector<1x1x768xf32>
    %118 = vector.shape_cast %117 : vector<1x1x768xf32> to vector<1x768xf32>
    %119 = vector.broadcast %118 : vector<1x768xf32> to vector<8x768xf32>
    %120 = arith.addf %116, %119 : vector<8x768xf32>
    %121 = vector.extract_strided_slice %120 {offsets = [0, 0], sizes = [8, 128], strides = [1, 1]} : vector<8x768xf32> to vector<8x128xf32>
    %122 = vector.extract_strided_slice %120 {offsets = [0, 128], sizes = [8, 128], strides = [1, 1]} : vector<8x768xf32> to vector<8x128xf32>
    %123 = vector.extract_strided_slice %120 {offsets = [0, 256], sizes = [8, 128], strides = [1, 1]} : vector<8x768xf32> to vector<8x128xf32>
    %cst_67 = arith.constant dense<0.000000e+00> : vector<8x8xf32>
    %124 = tpu.matmul %121, %122, %cst_67 {dimension_numbers = #tpu.dot_dimension_numbers<[1], [1], [0], [0], [0, 0, 1, 0], [], []>} : vector<8x128xf32>, vector<8x128xf32>, vector<8x8xf32> -> vector<8x8xf32>
    %cst_68 = arith.constant 0.102062076 : f32
    %125 = vector.broadcast %cst_68 : f32 to vector<8x8xf32>
    %126 = arith.mulf %124, %125 : vector<8x8xf32>
    %cst_69 = arith.constant dense<0xFF800000> : vector<8xf32>
    %127 = vector.multi_reduction <maximumf>, %126, %cst_69 [1] : vector<8x8xf32> to vector<8xf32>
    %128 = vector.shape_cast %127 : vector<8xf32> to vector<8x1xf32>
    %129 = vector.broadcast %128 : vector<8x1xf32> to vector<8x8xf32>
    %130 = arith.subf %126, %129 : vector<8x8xf32>
    %131 = math.exp %130 : vector<8x8xf32>
    %cst_70 = arith.constant dense<0.000000e+00> : vector<8xf32>
    %132 = vector.multi_reduction <add>, %131, %cst_70 [1] : vector<8x8xf32> to vector<8xf32>
    %133 = vector.shape_cast %132 : vector<8xf32> to vector<8x1xf32>
    %134 = vector.broadcast %133 : vector<8x1xf32> to vector<8x8xf32>
    %135 = arith.divf %131, %134 : vector<8x8xf32>
    %cst_71 = arith.constant dense<0.000000e+00> : vector<8x128xf32>
    %136 = tpu.matmul %135, %123, %cst_71 {dimension_numbers = #tpu.dot_dimension_numbers<[1], [0], [0], [1], [0, 0, 1, 1], [], []>} : vector<8x8xf32>, vector<8x128xf32>, vector<8x128xf32> -> vector<8x128xf32>
    %137 = vector.extract_strided_slice %120 {offsets = [0, 384], sizes = [8, 128], strides = [1, 1]} : vector<8x768xf32> to vector<8x128xf32>
    %138 = vector.extract_strided_slice %120 {offsets = [0, 512], sizes = [8, 128], strides = [1, 1]} : vector<8x768xf32> to vector<8x128xf32>
    %139 = vector.extract_strided_slice %120 {offsets = [0, 640], sizes = [8, 128], strides = [1, 1]} : vector<8x768xf32> to vector<8x128xf32>
    %cst_72 = arith.constant dense<0.000000e+00> : vector<8x8xf32>
    %140 = tpu.matmul %137, %138, %cst_72 {dimension_numbers = #tpu.dot_dimension_numbers<[1], [1], [0], [0], [0, 0, 1, 0], [], []>} : vector<8x128xf32>, vector<8x128xf32>, vector<8x8xf32> -> vector<8x8xf32>
    %cst_73 = arith.constant 0.102062076 : f32
    %141 = vector.broadcast %cst_73 : f32 to vector<8x8xf32>
    %142 = arith.mulf %140, %141 : vector<8x8xf32>
    %cst_74 = arith.constant dense<0xFF800000> : vector<8xf32>
    %143 = vector.multi_reduction <maximumf>, %142, %cst_74 [1] : vector<8x8xf32> to vector<8xf32>
    %144 = vector.shape_cast %143 : vector<8xf32> to vector<8x1xf32>
    %145 = vector.broadcast %144 : vector<8x1xf32> to vector<8x8xf32>
    %146 = arith.subf %142, %145 : vector<8x8xf32>
    %147 = math.exp %146 : vector<8x8xf32>
    %cst_75 = arith.constant dense<0.000000e+00> : vector<8xf32>
    %148 = vector.multi_reduction <add>, %147, %cst_75 [1] : vector<8x8xf32> to vector<8xf32>
    %149 = vector.shape_cast %148 : vector<8xf32> to vector<8x1xf32>
    %150 = vector.broadcast %149 : vector<8x1xf32> to vector<8x8xf32>
    %151 = arith.divf %147, %150 : vector<8x8xf32>
    %cst_76 = arith.constant dense<0.000000e+00> : vector<8x128xf32>
    %152 = tpu.matmul %151, %139, %cst_76 {dimension_numbers = #tpu.dot_dimension_numbers<[1], [0], [0], [1], [0, 0, 1, 1], [], []>} : vector<8x8xf32>, vector<8x128xf32>, vector<8x128xf32> -> vector<8x128xf32>
    %153 = tpu.concatenate %136, %152 in 1 : vector<8x128xf32>, vector<8x128xf32> -> vector<8x256xf32>
    %c1_77 = arith.constant 1 : index
    %c0_78 = arith.constant 0 : index
    %c0_79 = arith.constant 0 : index
    %154 = vector.load %arg3[%c1_77, %c0_78, %c0_79] : memref<2x256x192xf32, #tpu.memory_space<vmem>>, vector<1x256x192xf32>
    %155 = vector.shape_cast %154 : vector<1x256x192xf32> to vector<256x192xf32>
    %cst_80 = arith.constant dense<0.000000e+00> : vector<8x192xf32>
    %156 = tpu.matmul %153, %155, %cst_80 {dimension_numbers = #tpu.dot_dimension_numbers<[1], [0], [0], [1], [0, 0, 1, 1], [], []>} : vector<8x256xf32>, vector<256x192xf32>, vector<8x192xf32> -> vector<8x192xf32>
    %c1_81 = arith.constant 1 : index
    %c0_82 = arith.constant 0 : index
    %c0_83 = arith.constant 0 : index
    %157 = vector.load %arg4[%c1_81, %c0_82, %c0_83] : memref<2x1x192xf32, #tpu.memory_space<vmem>>, vector<1x1x192xf32>
    %158 = vector.shape_cast %157 : vector<1x1x192xf32> to vector<1x192xf32>
    %159 = vector.broadcast %158 : vector<1x192xf32> to vector<8x192xf32>
    %160 = arith.addf %156, %159 : vector<8x192xf32>
    %161 = arith.addf %113, %160 : vector<8x192xf32>
    %c1_84 = arith.constant 1 : index
    %c0_85 = arith.constant 0 : index
    %c0_86 = arith.constant 0 : index
    %162 = vector.load %arg5[%c1_84, %c0_85, %c0_86] : memref<2x1x192xf32, #tpu.memory_space<vmem>>, vector<1x1x192xf32>
    %163 = vector.shape_cast %162 : vector<1x1x192xf32> to vector<1x192xf32>
    %c1_87 = arith.constant 1 : index
    %c0_88 = arith.constant 0 : index
    %c0_89 = arith.constant 0 : index
    %164 = vector.load %arg6[%c1_87, %c0_88, %c0_89] : memref<2x1x192xf32, #tpu.memory_space<vmem>>, vector<1x1x192xf32>
    %165 = vector.shape_cast %164 : vector<1x1x192xf32> to vector<1x192xf32>
    %cst_90 = arith.constant dense<0.000000e+00> : vector<8xf32>
    %166 = vector.multi_reduction <add>, %161, %cst_90 [1] : vector<8x192xf32> to vector<8xf32>
    %167 = vector.shape_cast %166 : vector<8xf32> to vector<8x1xf32>
    %cst_91 = arith.constant 1.920000e+02 : f32
    %168 = vector.broadcast %cst_91 : f32 to vector<8x1xf32>
    %169 = arith.divf %167, %168 : vector<8x1xf32>
    %170 = vector.broadcast %169 : vector<8x1xf32> to vector<8x192xf32>
    %171 = arith.subf %161, %170 : vector<8x192xf32>
    %172 = arith.mulf %171, %171 : vector<8x192xf32>
    %cst_92 = arith.constant dense<0.000000e+00> : vector<8xf32>
    %173 = vector.multi_reduction <add>, %172, %cst_92 [1] : vector<8x192xf32> to vector<8xf32>
    %174 = vector.shape_cast %173 : vector<8xf32> to vector<8x1xf32>
    %cst_93 = arith.constant 1.920000e+02 : f32
    %175 = vector.broadcast %cst_93 : f32 to vector<8x1xf32>
    %176 = arith.divf %174, %175 : vector<8x1xf32>
    %cst_94 = arith.constant 9.99999974E-6 : f32
    %177 = vector.broadcast %cst_94 : f32 to vector<8x1xf32>
    %178 = arith.addf %176, %177 : vector<8x1xf32>
    %179 = math.rsqrt %178 : vector<8x1xf32>
    %180 = vector.broadcast %179 : vector<8x1xf32> to vector<8x192xf32>
    %181 = arith.mulf %171, %180 : vector<8x192xf32>
    %182 = vector.broadcast %163 : vector<1x192xf32> to vector<8x192xf32>
    %183 = arith.mulf %181, %182 : vector<8x192xf32>
    %184 = vector.broadcast %165 : vector<1x192xf32> to vector<8x192xf32>
    %185 = arith.addf %183, %184 : vector<8x192xf32>
    %c1_95 = arith.constant 1 : index
    %c0_96 = arith.constant 0 : index
    %c0_97 = arith.constant 0 : index
    %186 = vector.load %arg7[%c1_95, %c0_96, %c0_97] : memref<2x192x192xf32, #tpu.memory_space<vmem>>, vector<1x192x192xf32>
    %187 = vector.shape_cast %186 : vector<1x192x192xf32> to vector<192x192xf32>
    %cst_98 = arith.constant dense<0.000000e+00> : vector<8x192xf32>
    %188 = tpu.matmul %185, %187, %cst_98 {dimension_numbers = #tpu.dot_dimension_numbers<[1], [0], [0], [1], [0, 0, 1, 1], [], []>} : vector<8x192xf32>, vector<192x192xf32>, vector<8x192xf32> -> vector<8x192xf32>
    %c1_99 = arith.constant 1 : index
    %c0_100 = arith.constant 0 : index
    %c0_101 = arith.constant 0 : index
    %189 = vector.load %arg8[%c1_99, %c0_100, %c0_101] : memref<2x1x192xf32, #tpu.memory_space<vmem>>, vector<1x1x192xf32>
    %190 = vector.shape_cast %189 : vector<1x1x192xf32> to vector<1x192xf32>
    %191 = vector.broadcast %190 : vector<1x192xf32> to vector<8x192xf32>
    %192 = arith.addf %188, %191 : vector<8x192xf32>
    %cst_102 = arith.constant 0.000000e+00 : f32
    %193 = vector.broadcast %cst_102 : f32 to vector<8x192xf32>
    %194 = arith.maximumf %192, %193 : vector<8x192xf32>
    %c1_103 = arith.constant 1 : index
    %c0_104 = arith.constant 0 : index
    %c0_105 = arith.constant 0 : index
    %195 = vector.load %arg9[%c1_103, %c0_104, %c0_105] : memref<2x192x192xf32, #tpu.memory_space<vmem>>, vector<1x192x192xf32>
    %196 = vector.shape_cast %195 : vector<1x192x192xf32> to vector<192x192xf32>
    %cst_106 = arith.constant dense<0.000000e+00> : vector<8x192xf32>
    %197 = tpu.matmul %194, %196, %cst_106 {dimension_numbers = #tpu.dot_dimension_numbers<[1], [0], [0], [1], [0, 0, 1, 1], [], []>} : vector<8x192xf32>, vector<192x192xf32>, vector<8x192xf32> -> vector<8x192xf32>
    %c1_107 = arith.constant 1 : index
    %c0_108 = arith.constant 0 : index
    %c0_109 = arith.constant 0 : index
    %198 = vector.load %arg10[%c1_107, %c0_108, %c0_109] : memref<2x1x192xf32, #tpu.memory_space<vmem>>, vector<1x1x192xf32>
    %199 = vector.shape_cast %198 : vector<1x1x192xf32> to vector<1x192xf32>
    %200 = vector.broadcast %199 : vector<1x192xf32> to vector<8x192xf32>
    %201 = arith.addf %197, %200 : vector<8x192xf32>
    %202 = arith.addf %185, %201 : vector<8x192xf32>
    %c1_110 = arith.constant 1 : index
    %c0_111 = arith.constant 0 : index
    %c0_112 = arith.constant 0 : index
    %203 = vector.load %arg11[%c1_110, %c0_111, %c0_112] : memref<2x1x192xf32, #tpu.memory_space<vmem>>, vector<1x1x192xf32>
    %204 = vector.shape_cast %203 : vector<1x1x192xf32> to vector<1x192xf32>
    %c1_113 = arith.constant 1 : index
    %c0_114 = arith.constant 0 : index
    %c0_115 = arith.constant 0 : index
    %205 = vector.load %arg12[%c1_113, %c0_114, %c0_115] : memref<2x1x192xf32, #tpu.memory_space<vmem>>, vector<1x1x192xf32>
    %206 = vector.shape_cast %205 : vector<1x1x192xf32> to vector<1x192xf32>
    %cst_116 = arith.constant dense<0.000000e+00> : vector<8xf32>
    %207 = vector.multi_reduction <add>, %202, %cst_116 [1] : vector<8x192xf32> to vector<8xf32>
    %208 = vector.shape_cast %207 : vector<8xf32> to vector<8x1xf32>
    %cst_117 = arith.constant 1.920000e+02 : f32
    %209 = vector.broadcast %cst_117 : f32 to vector<8x1xf32>
    %210 = arith.divf %208, %209 : vector<8x1xf32>
    %211 = vector.broadcast %210 : vector<8x1xf32> to vector<8x192xf32>
    %212 = arith.subf %202, %211 : vector<8x192xf32>
    %213 = arith.mulf %212, %212 : vector<8x192xf32>
    %cst_118 = arith.constant dense<0.000000e+00> : vector<8xf32>
    %214 = vector.multi_reduction <add>, %213, %cst_118 [1] : vector<8x192xf32> to vector<8xf32>
    %215 = vector.shape_cast %214 : vector<8xf32> to vector<8x1xf32>
    %cst_119 = arith.constant 1.920000e+02 : f32
    %216 = vector.broadcast %cst_119 : f32 to vector<8x1xf32>
    %217 = arith.divf %215, %216 : vector<8x1xf32>
    %cst_120 = arith.constant 9.99999974E-6 : f32
    %218 = vector.broadcast %cst_120 : f32 to vector<8x1xf32>
    %219 = arith.addf %217, %218 : vector<8x1xf32>
    %220 = math.rsqrt %219 : vector<8x1xf32>
    %221 = vector.broadcast %220 : vector<8x1xf32> to vector<8x192xf32>
    %222 = arith.mulf %212, %221 : vector<8x192xf32>
    %223 = vector.broadcast %204 : vector<1x192xf32> to vector<8x192xf32>
    %224 = arith.mulf %222, %223 : vector<8x192xf32>
    %225 = vector.broadcast %206 : vector<1x192xf32> to vector<8x192xf32>
    %226 = arith.addf %224, %225 : vector<8x192xf32>
    %c0_121 = arith.constant 0 : index
    %c0_122 = arith.constant 0 : index
    %227 = vector.load %arg13[%c0_121, %c0_122] : memref<8x192xf32, #tpu.memory_space<vmem>>, vector<8x192xf32>
    tpu.vector_store %arg13[%c0_121, %c0_122], %226 {strides = array<i32>} : memref<8x192xf32, #tpu.memory_space<vmem>>, vector<8x192xf32>,
    return
  }
}

</mosaic_0001>

<bundles_post_ra>
// kernel: tpu_custom_call.1
= control target key start
LH: loop header
LB: loop body
LE: loop exit
PB: predicated region body
PF: predicated region fallthrough
CT: control target
= control target key end

     0   :  { %18 = vsyncpa [#allocation3], 0  ;;  %s5226_s0 = inlined_call_operand.hbm [shape: f32[8,192], index: 0, kind: input, shape index: {}]   ;;  %s5227_s1 = inlined_call_operand.hbm [shape: f32[2,192,768], index: 1, kind: input, shape index: {}]   ;;  %s5228_s2 = inlined_call_operand.hbm [shape: f32[2,1,768], index: 2, kind: input, shape index: {}]   ;;  %s5229_s3 = inlined_call_operand.vmem [shape: f32[2,256,192], index: 3, kind: input, shape index: {}]   ;;  %s5230_s4 = inlined_call_operand.hbm [shape: f32[2,1,192], index: 4, kind: input, shape index: {}]   ;;  %s5231_s5 = inlined_call_operand.hbm [shape: f32[2,1,192], index: 5, kind: input, shape index: {}]   ;;  %s5232_s6 = inlined_call_operand.hbm [shape: f32[2,1,192], index: 6, kind: input, shape index: {}]   ;;  %s5233_s7 = inlined_call_operand.vmem [shape: f32[2,192,192], index: 7, kind: input, shape index: {}]   ;;  %s5234_s8 = inlined_call_operand.hbm [shape: f32[2,1,192], index: 8, kind: input, shape index: {}]   ;;  %s5235_s9 = inlined_call_operand.vmem [shape: f32[2,192,192], index: 9, kind: input, shape index: {}]   ;;  %s5236_s10 = inlined_call_operand.hbm [shape: f32[2,1,192], index: 10, kind: input, shape index: {}]   ;;  %s5237_s11 = inlined_call_operand.hbm [shape: f32[2,1,192], index: 11, kind: input, shape index: {}]   ;;  %s5238_s12 = inlined_call_operand.hbm [shape: f32[2,1,192], index: 12, kind: input, shape index: {}]   ;;  %s5239_s13 = inlined_call_operand.hbm [shape: f32[8,192], index: 13, kind: output, shape index: {}]  }
   0x1   :  { %19 = vsyncpa [#allocation6], 0 }
   0x2   :  { %20 = vsyncpa [#allocation9], 0 }
   0x3   :  { %21 = vsyncpa [#allocation12], 0 }
   0x4   :  { %22 = vsyncpa [#allocation15], 0 }
   0x5   :  { %23 = vsyncpa [#allocation18], 0 }
   0x6   :  { %24 = vsyncpa [#allocation4], 0  ;;  %s3785_s25 = smov [#allocation5]   ;;  %s3529_s29 = scalar_lea.hbm %s5227_s1, 36864 }
   0x7   :  { %s40_s26 = sshll.u32 %s3785_s25, 4  ;;  %p3530_p0 = scmp.ne.s32.totalorder %s5227_s1, %s3529_s29  ;;  %s41_s26 = int_to_ptr.vmem [resolvable:$true] %s40_s26 }
   0x8   :  { %p3533_p1 = scmp.lt.u32.totalorder %s3529_s29, %s5227_s1 }
   0xa   :  { %p3535_p2 = pnand %p3533_p1, %p3530_p0 }
   0xc   :  { %3538 = shalt.err (!%p3535_p2)
}
   0xd   :  { %s3539_s17 = scalar_lea.vmem %s41_s26, 36864  ;;  %p3544_p4 = scmp.lt.s32.totalorder %s41_s26, %s41_s26 }
   0xe   :  { %p3540_p3 = scmp.ne.s32.totalorder %s41_s26, %s3539_s17  ;;  %p3545_p5 = scmp.lt.s32.totalorder %s3539_s17, %s3539_s17 }
  0x10   :  { %p3546_p6 = por %p3545_p5, %p3544_p4 }
  0x12   :  { %p3547_p7 = pnand %p3546_p6, %p3540_p3 }
  0x14   :  { %3550 = shalt.err (!%p3547_p7)
}
  0x15   :  { %s3786_s18 = smov 768   ;;  %s3787_s19 = smov 48  }
  0x16   :  { %46 = dma.hbm_to_vmem [thread:$0]  %s5227_s1, 36864, %s41_s26, [#allocation6], %s3786_s18, %s3786_s18, %s3787_s19  }
  0x17   :  { %s3788_s22 = smov [#allocation8]   ;;  %s3551_s27 = scalar_lea.hbm %s5230_s4, 64 }
  0x18   :  { %s66_s23 = sshll.u32 %s3788_s22, 4  ;;  %p3552_p8 = scmp.ne.s32.totalorder %s5230_s4, %s3551_s27  ;;  %s67_s23 = int_to_ptr.vmem [resolvable:$true] %s66_s23 }
  0x19   :  { %p3555_p9 = scmp.lt.u32.totalorder %s3551_s27, %s5230_s4 }
  0x1b   :  { %p3557_p10 = pnand %p3555_p9, %p3552_p8 }
  0x1d   :  { %3560 = shalt.err (!%p3557_p10)
}
  0x1e   :  { %s3561_s15 = scalar_lea.vmem %s67_s23, 64  ;;  %p3566_p12 = scmp.lt.s32.totalorder %s67_s23, %s67_s23 }
  0x1f   :  { %p3562_p11 = scmp.ne.s32.totalorder %s67_s23, %s3561_s15  ;;  %p3567_p13 = scmp.lt.s32.totalorder %s3561_s15, %s3561_s15 }
  0x21   :  { %p3568_p0 = por %p3567_p13, %p3566_p12 }
  0x23   :  { %p3569_p1 = pnand %p3568_p0, %p3562_p11 }
  0x25   :  { %3572 = shalt.err (!%p3569_p1)
}
  0x26   :  { %s3789_s1 = smov 32   ;;  %s3790_s26 = smov 2  }
  0x27   :  { %72 = dma.hbm_to_vmem [thread:$0]  %s5230_s4, 64, %s67_s23, [#allocation9], %s3789_s1, %s3789_s1, %s3790_s26  }
  0x28   :  { %s3791_s18 = smov [#allocation11]   ;;  %s3792_s20 = smov [#allocation14]  }
  0x29   :  { %s90_s19 = sshll.u32 %s3791_s18, 4  ;;  %s118_s21 = sshll.u32 %s3792_s20, 4  ;;  %s91_s19 = int_to_ptr.vmem [resolvable:$true] %s90_s19  ;;  %s3901_s21 = int_to_ptr.vmem [resolvable:$true] %s118_s21 }
  0x2a   :  { %s3573_s25 = scalar_lea.hbm %s5232_s6, 64 }
  0x2b   :  { %p3574_p2 = scmp.ne.s32.totalorder %s5232_s6, %s3573_s25  ;;  %p3577_p3 = scmp.lt.u32.totalorder %s3573_s25, %s5232_s6 }
  0x2d   :  { %p3579_p4 = pnand %p3577_p3, %p3574_p2 }
  0x2f   :  { %3582 = shalt.err (!%p3579_p4)
}
  0x30   :  { %s3583_s4 = scalar_lea.vmem %s91_s19, 64  ;;  %p3588_p6 = scmp.lt.s32.totalorder %s91_s19, %s91_s19 }
  0x31   :  { %p3584_p5 = scmp.ne.s32.totalorder %s91_s19, %s3583_s4  ;;  %p3589_p7 = scmp.lt.s32.totalorder %s3583_s4, %s3583_s4 }
  0x33   :  { %p3590_p8 = por %p3589_p7, %p3588_p6 }
  0x35   :  { %p3591_p9 = pnand %p3590_p8, %p3584_p5 }
  0x37   :  { %3594 = shalt.err (!%p3591_p9)
}
  0x38   :  { %96 = dma.hbm_to_vmem [thread:$0]  %s5232_s6, 64, %s91_s19, [#allocation12], %s3789_s1, %s3789_s1, %s3790_s26  }
  0x39   :  { %s3595_s17 = scalar_lea.hbm %s5236_s10, 64 }
  0x3a   :  { %p3596_p10 = scmp.ne.s32.totalorder %s5236_s10, %s3595_s17  ;;  %p3599_p11 = scmp.lt.u32.totalorder %s3595_s17, %s5236_s10 }
  0x3c   :  { %p3601_p12 = pnand %p3599_p11, %p3596_p10 }
  0x3e   :  { %3604 = shalt.err (!%p3601_p12)
}
  0x3f   :  { %s3605_s25 = scalar_lea.vmem %s3901_s21, 64  ;;  %p3610_p0 = scmp.lt.s32.totalorder %s3901_s21, %s3901_s21 }
  0x40   :  { %p3606_p13 = scmp.ne.s32.totalorder %s3901_s21, %s3605_s25  ;;  %p3611_p1 = scmp.lt.s32.totalorder %s3605_s25, %s3605_s25 }
  0x42   :  { %p3612_p2 = por %p3611_p1, %p3610_p0 }
  0x44   :  { %p3613_p3 = pnand %p3612_p2, %p3606_p13 }
  0x46   :  { %3616 = shalt.err (!%p3613_p3)
}
  0x47   :  { %124 = dma.hbm_to_vmem [thread:$0]  %s5236_s10, 64, %s3901_s21, [#allocation15], %s3789_s1, %s3789_s1, %s3790_s26  }
  0x48   :  { %s3793_s27 = smov [#allocation2]   ;;  %s3794_s29 = smov [#allocation7]  }
  0x49   :  { %s31_s28 = sshll.u32 %s3793_s27, 4  ;;  %s52_s30 = sshll.u32 %s3794_s29, 4  ;;  %s32_s28 = int_to_ptr.vmem [resolvable:$true] %s31_s28  ;;  %s3938_s30 = int_to_ptr.vmem [resolvable:$true] %s52_s30 }
  0x4a   :  { %s3617_s14 = scalar_lea.hbm %s5226_s0, 256 }
  0x4b   :  { %p3618_p4 = scmp.ne.s32.totalorder %s5226_s0, %s3617_s14  ;;  %p3621_p5 = scmp.lt.u32.totalorder %s3617_s14, %s5226_s0 }
  0x4d   :  { %p3623_p6 = pnand %p3621_p5, %p3618_p4 }
  0x4f   :  { %3626 = shalt.err (!%p3623_p6)
}
  0x50   :  { %s3627_s10 = scalar_lea.vmem %s32_s28, 256  ;;  %p3632_p8 = scmp.lt.s32.totalorder %s32_s28, %s32_s28 }
  0x51   :  { %p3628_p7 = scmp.ne.s32.totalorder %s32_s28, %s3627_s10  ;;  %p3633_p9 = scmp.lt.s32.totalorder %s3627_s10, %s3627_s10 }
  0x53   :  { %p3634_p10 = por %p3633_p9, %p3632_p8 }
  0x55   :  { %p3635_p11 = pnand %p3634_p10, %p3628_p7 }
  0x57   :  { %3638 = shalt.err (!%p3635_p11)
}
  0x58   :  { %34 = dma.hbm_to_vmem [thread:$0]  %s5226_s0, 256, %s32_s28, [#allocation3]  }
  0x59   :  { %s3639_s25 = scalar_lea.hbm %s5228_s2, 192 }
  0x5a   :  { %p3640_p12 = scmp.ne.s32.totalorder %s5228_s2, %s3639_s25  ;;  %p3643_p13 = scmp.lt.u32.totalorder %s3639_s25, %s5228_s2 }
  0x5c   :  { %p3645_p0 = pnand %p3643_p13, %p3640_p12 }
  0x5e   :  { %3648 = shalt.err (!%p3645_p0)
}
  0x5f   :  { %s3649_s4 = scalar_lea.vmem %s3938_s30, 192  ;;  %p3654_p2 = scmp.lt.s32.totalorder %s3938_s30, %s3938_s30 }
  0x60   :  { %p3650_p1 = scmp.ne.s32.totalorder %s3938_s30, %s3649_s4  ;;  %p3655_p3 = scmp.lt.s32.totalorder %s3649_s4, %s3649_s4 }
  0x62   :  { %p3656_p4 = por %p3655_p3, %p3654_p2 }
  0x64   :  { %p3657_p5 = pnand %p3656_p4, %p3650_p1 }
  0x66   :  { %3660 = shalt.err (!%p3657_p5)
}
  0x67   :  { %s3795_s0 = smov 96   ;;  %s3796_s28 = smov 6  }
  0x68   :  { %58 = dma.hbm_to_vmem [thread:$0]  %s5228_s2, 192, %s3938_s30, [#allocation6], %s3795_s0, %s3795_s0, %s3796_s28  }
  0x69   :  { %s3797_s15 = smov [#allocation10]   ;;  %s3798_s17 = smov [#allocation13]  }
  0x6a   :  { %s78_s16 = sshll.u32 %s3797_s15, 4  ;;  %s104_s18 = sshll.u32 %s3798_s17, 4  ;;  %s79_s16 = int_to_ptr.vmem [resolvable:$true] %s78_s16  ;;  %s3969_s18 = int_to_ptr.vmem [resolvable:$true] %s104_s18 }
  0x6b   :  { %s3661_s20 = scalar_lea.hbm %s5231_s5, 64 }
  0x6c   :  { %p3662_p6 = scmp.ne.s32.totalorder %s5231_s5, %s3661_s20  ;;  %p3665_p7 = scmp.lt.u32.totalorder %s3661_s20, %s5231_s5 }
  0x6e   :  { %p3667_p8 = pnand %p3665_p7, %p3662_p6 }
  0x70   :  { %3670 = shalt.err (!%p3667_p8)
}
  0x71   :  { %s3671_s2 = scalar_lea.vmem %s79_s16, 64  ;;  %p3676_p10 = scmp.lt.s32.totalorder %s79_s16, %s79_s16 }
  0x72   :  { %p3672_p9 = scmp.ne.s32.totalorder %s79_s16, %s3671_s2  ;;  %p3677_p11 = scmp.lt.s32.totalorder %s3671_s2, %s3671_s2 }
  0x74   :  { %p3678_p12 = por %p3677_p11, %p3676_p10 }
  0x76   :  { %p3679_p13 = pnand %p3678_p12, %p3672_p9 }
  0x78   :  { %3682 = shalt.err (!%p3679_p13)
}
  0x79   :  { %84 = dma.hbm_to_vmem [thread:$0]  %s5231_s5, 64, %s79_s16, [#allocation9], %s3789_s1, %s3789_s1, %s3790_s26  }
  0x7a   :  { %s3683_s4 = scalar_lea.hbm %s5234_s8, 64 }
  0x7b   :  { %p3684_p0 = scmp.ne.s32.totalorder %s5234_s8, %s3683_s4  ;;  %p3687_p1 = scmp.lt.u32.totalorder %s3683_s4, %s5234_s8 }
  0x7d   :  { %p3689_p2 = pnand %p3687_p1, %p3684_p0 }
  0x7f   :  { %3692 = shalt.err (!%p3689_p2)
}
  0x80   :  { %s3693_s15 = scalar_lea.vmem %s3969_s18, 64  ;;  %p3698_p4 = scmp.lt.s32.totalorder %s3969_s18, %s3969_s18 }
  0x81   :  { %p3694_p3 = scmp.ne.s32.totalorder %s3969_s18, %s3693_s15  ;;  %p3699_p5 = scmp.lt.s32.totalorder %s3693_s15, %s3693_s15 }
  0x83   :  { %p3700_p6 = por %p3699_p5, %p3698_p4 }
  0x85   :  { %p3701_p7 = pnand %p3700_p6, %p3694_p3 }
  0x87   :  { %3704 = shalt.err (!%p3701_p7)
}
  0x88   :  { %110 = dma.hbm_to_vmem [thread:$0]  %s5234_s8, 64, %s3969_s18, [#allocation12], %s3789_s1, %s3789_s1, %s3790_s26  }
  0x89   :  { %s3799_s17 = smov [#allocation16]   ;;  %s3800_s21 = smov [#allocation17]  }
  0x8a   :  { %s130_s10 = sshll.u32 %s3799_s17, 4  ;;  %s142_s20 = sshll.u32 %s3800_s21, 4  ;;  %s131_s10 = int_to_ptr.vmem [resolvable:$true] %s130_s10  ;;  %s4006_s20 = int_to_ptr.vmem [resolvable:$true] %s142_s20 }
  0x8b   :  { %s3705_s25 = scalar_lea.hbm %s5237_s11, 64 }
  0x8c   :  { %p3706_p8 = scmp.ne.s32.totalorder %s5237_s11, %s3705_s25  ;;  %p3709_p9 = scmp.lt.u32.totalorder %s3705_s25, %s5237_s11 }
  0x8e   :  { %p3711_p10 = pnand %p3709_p9, %p3706_p8 }
  0x90   :  { %3714 = shalt.err (!%p3711_p10)
}
  0x91   :  { %s3715_s8 = scalar_lea.vmem %s131_s10, 64  ;;  %p3720_p12 = scmp.lt.s32.totalorder %s131_s10, %s131_s10 }
  0x92   :  { %p3716_p11 = scmp.ne.s32.totalorder %s131_s10, %s3715_s8  ;;  %p3721_p13 = scmp.lt.s32.totalorder %s3715_s8, %s3715_s8 }
  0x94   :  { %p3722_p0 = por %p3721_p13, %p3720_p12 }
  0x96   :  { %p3723_p1 = pnand %p3722_p0, %p3716_p11 }
  0x98   :  { %3726 = shalt.err (!%p3723_p1)
}
  0x99   :  { %136 = dma.hbm_to_vmem [thread:$0]  %s5237_s11, 64, %s131_s10, [#allocation15], %s3789_s1, %s3789_s1, %s3790_s26  }
  0x9a   :  { %s3727_s0 = scalar_lea.hbm %s5238_s12, 64 }
  0x9b   :  { %p3728_p2 = scmp.ne.s32.totalorder %s5238_s12, %s3727_s0  ;;  %p3731_p3 = scmp.lt.u32.totalorder %s3727_s0, %s5238_s12 }
  0x9d   :  { %p3733_p4 = pnand %p3731_p3, %p3728_p2 }
  0x9f   :  { %3736 = shalt.err (!%p3733_p4)
}
  0xa0   :  { %s3737_s5 = scalar_lea.vmem %s4006_s20, 64  ;;  %p3742_p6 = scmp.lt.s32.totalorder %s4006_s20, %s4006_s20 }
  0xa1   :  { %p3738_p5 = scmp.ne.s32.totalorder %s4006_s20, %s3737_s5  ;;  %p3743_p7 = scmp.lt.s32.totalorder %s3737_s5, %s3737_s5 }
  0xa3   :  { %p3744_p8 = por %p3743_p7, %p3742_p6 }
  0xa5   :  { %p3745_p9 = pnand %p3744_p8, %p3738_p5 }
  0xa7   :  { %3748 = shalt.err (!%p3745_p9)
}
  0xa8   :  { %148 = dma.hbm_to_vmem [thread:$0]  %s5238_s12, 64, %s4006_s20, [#allocation18], %s3789_s1, %s3789_s1, %s3790_s26  }
  0xa9   :  { %3771 = dma.done.wait [#allocation3], 256  }
  0xaa   :  { %3772 = vsyncadd [#allocation3], 4294967040 }
  0xab   :  { %3773 = dma.done.wait [#allocation6], 37056  }
  0xac   :  { %3774 = vsyncadd [#allocation6], 4294930240 }
  0xad   :  { %3775 = dma.done.wait [#allocation9], 128  }
  0xae   :  { %3776 = vsyncadd [#allocation9], 4294967168 }
  0xaf   :  { %3777 = dma.done.wait [#allocation12], 128  }
  0xb0   :  { %3778 = vsyncadd [#allocation12], 4294967168 }
  0xb1   :  { %3779 = dma.done.wait [#allocation15], 128  }
  0xb2   :  { %3780 = vsyncadd [#allocation15], 4294967168 }
  0xb3   :  { %3781 = dma.done.wait [#allocation18], 64  }
  0xb4   :  { %3782 = vsyncadd [#allocation18], 4294967232  ;;  %v182_v0 = vld [vmem:[#allocation5 + $0x8] sm:$0xff]  ;;  %v188_v1 = vld [vmem:[#allocation5 + $0x38] sm:$0xff]  ;;  %vm357_vm0 = vcmask 523264   ;;  %vm3802_vm1 = vmmov 0  }
  0xb5   :  { %v181_v2 = vld [vmem:[#allocation5] sm:$0xff]  ;;  %v2878_v3 = vpack.c.bf16 %v188_v1, %v182_v0  ;;  %v187_v4 = vld [vmem:[#allocation5 + $0x30] sm:$0xff]  ;;  %v194_v5 = vld [vmem:[#allocation5 + $0x68] sm:$0xff]  ;;  %vm645_vm2 = vcmask 64512  }
  0xb6   :  { %v200_v6 = vld [vmem:[#allocation5 + $0x98] sm:$0xff]  ;;  %v2880_v7 = vpack.c.bf16 %v187_v4, %v181_v2  ;;  %v193_v9 = vld [vmem:[#allocation5 + $0x60] sm:$0xff]  ;;  %v199_v10 = vld [vmem:[#allocation5 + $0x90] sm:$0xff] }
  0xb7   :  { %v2882_v8 = vpack.c.bf16 %v200_v6, %v194_v5  ;;  %v206_v11 = vld [vmem:[#allocation5 + $0xc8] sm:$0xff]  ;;  %2879 = vmatprep.subr.bf16.mxu0 %v2878_v3  ;;  %v212_v12 = vld [vmem:[#allocation5 + $0xf8] sm:$0xff]  ;;  %v2884_v13 = vpack.c.bf16 %v199_v10, %v193_v9  ;;  %v205_v15 = vld [vmem:[#allocation5 + $0xc0] sm:$0xff] }
  0xb8   :  { %2881 = vmatpush1.bf16.msra.mxu0 %v2880_v7  ;;  %v2886_v14 = vpack.c.bf16 %v212_v12, %v206_v11  ;;  %v211_v16 = vld [vmem:[#allocation5 + $0xf0] sm:$0xff]  ;;  %v218_v17 = vld [vmem:[#allocation5 + $0x128] sm:$0xff]  ;;  %v224_v18 = vld [vmem:[#allocation5 + $0x158] sm:$0xff] }
  0xb9   :  { %2883 = vmatprep.subr.bf16.mxu0 %v2882_v8  ;;  %v2888_v19 = vpack.c.bf16 %v211_v16, %v205_v15  ;;  %v2890_v20 = vpack.c.bf16 %v224_v18, %v218_v17  ;;  %v217_v21 = vld [vmem:[#allocation5 + $0x120] sm:$0xff]  ;;  %v223_v22 = vld [vmem:[#allocation5 + $0x150] sm:$0xff]  ;;  %v230_v23 = vld [vmem:[#allocation5 + $0x188] sm:$0xff] }
  0xba   :  { %v236_v24 = vld [vmem:[#allocation5 + $0x1b8] sm:$0xff]  ;;  %v2892_v25 = vpack.c.bf16 %v223_v22, %v217_v21  ;;  %v229_v27 = vld [vmem:[#allocation5 + $0x180] sm:$0xff]  ;;  %v235_v28 = vld [vmem:[#allocation5 + $0x1b0] sm:$0xff] }
  0xbb   :  { %v2894_v26 = vpack.c.bf16 %v236_v24, %v230_v23  ;;  %v242_v29 = vld [vmem:[#allocation5 + $0x1e8] sm:$0xff]  ;;  %v248_v30 = vld [vmem:[#allocation5 + $0x218] sm:$0xff]  ;;  %v2896_v31 = vpack.c.bf16 %v235_v28, %v229_v27  ;;  %v241_v34 = vld [vmem:[#allocation5 + $0x1e0] sm:$0xff] }
  0xbc   :  { %2885 = vmatpush1.bf16.msra.mxu0 %v2884_v13  ;;  %v4043_v32 = vld [vmem:[#allocation2 + $0x8] sm:$0xff]  ;;  %v2898_v33 = vpack.c.bf16 %v248_v30, %v242_v29  ;;  %v247_v35 = vld [vmem:[#allocation5 + $0x210] sm:$0xff]  ;;  %v254_v36 = vld [vmem:[#allocation5 + $0x248] sm:$0xff] }
  0xbd   :  { %2887 = vmatprep.subr.bf16.mxu0 %v2886_v14  ;;  %2648 = vmatprep.mubr.msk.f32.mxu0 %vm357_vm0, %v4043_v32  ;;  %v260_v37 = vld [vmem:[#allocation5 + $0x278] sm:$0xff]  ;;  %v2900_v38 = vpack.c.bf16 %v247_v35, %v241_v34  ;;  %v253_v40 = vld [vmem:[#allocation5 + $0x240] sm:$0xff]  ;;  %v259_v41 = vld [vmem:[#allocation5 + $0x270] sm:$0xff] }
  0xbe   :  { %2649 = vmatprep.mubr.msk.f32.mxu1 %vm357_vm0, %v4043_v32  ;;  %v2902_v39 = vpack.c.bf16 %v260_v37, %v254_v36  ;;  %v266_v42 = vld [vmem:[#allocation5 + $0x2a8] sm:$0xff]  ;;  %v272_v43 = vld [vmem:[#allocation5 + $0x2d8] sm:$0xff]  ;;  %v2904_v44 = vpack.c.bf16 %v259_v41, %v253_v40  ;;  %v265_v46 = vld [vmem:[#allocation5 + $0x2a0] sm:$0xff] }
  0xbf   :  { %v2906_v45 = vpack.c.bf16 %v272_v43, %v266_v42  ;;  %v271_v47 = vld [vmem:[#allocation5 + $0x2d0] sm:$0xff]  ;;  %v278_v48 = vld [vmem:[#allocation5 + $0x308] sm:$0xff]  ;;  %v284_v49 = vld [vmem:[#allocation5 + $0x338] sm:$0xff] }
  0xc0   :  { %2889 = vmatpush1.bf16.msra.mxu0 %v2888_v19  ;;  %v2908_v50 = vpack.c.bf16 %v271_v47, %v265_v46  ;;  %v2910_v51 = vpack.c.bf16 %v284_v49, %v278_v48  ;;  %v277_v52 = vld [vmem:[#allocation5 + $0x300] sm:$0xff]  ;;  %v283_v53 = vld [vmem:[#allocation5 + $0x330] sm:$0xff]  ;;  %v290_v54 = vld [vmem:[#allocation5 + $0x368] sm:$0xff] }
  0xc1   :  { %2891 = vmatprep.subr.bf16.mxu0 %v2890_v20  ;;  %v296_v55 = vld [vmem:[#allocation5 + $0x398] sm:$0xff]  ;;  %v2912_v56 = vpack.c.bf16 %v283_v53, %v277_v52  ;;  %v289_v58 = vld [vmem:[#allocation5 + $0x360] sm:$0xff]  ;;  %v295_v59 = vld [vmem:[#allocation5 + $0x390] sm:$0xff] }
  0xc2   :  { %v2914_v57 = vpack.c.bf16 %v296_v55, %v290_v54  ;;  %v302_v60 = vld [vmem:[#allocation5 + $0x3c8] sm:$0xff]  ;;  %v308_v61 = vld [vmem:[#allocation5 + $0x3f8] sm:$0xff]  ;;  %v2916_v62 = vpack.c.bf16 %v295_v59, %v289_v58  ;;  %v301_v0 = vld [vmem:[#allocation5 + $0x3c0] sm:$0xff] }
  0xc3   :  { %v2918_v63 = vpack.c.bf16 %v308_v61, %v302_v60  ;;  %v307_v1 = vld [vmem:[#allocation5 + $0x3f0] sm:$0xff]  ;;  %v314_v2 = vld [vmem:[#allocation5 + $0x428] sm:$0xff]  ;;  %v320_v3 = vld [vmem:[#allocation5 + $0x458] sm:$0xff] }
  0xc4   :  { %2893 = vmatpush1.bf16.msra.mxu0 %v2892_v25  ;;  %v2920_v4 = vpack.c.bf16 %v307_v1, %v301_v0  ;;  %v2922_v5 = vpack.c.bf16 %v320_v3, %v314_v2  ;;  %v313_v6 = vld [vmem:[#allocation5 + $0x420] sm:$0xff]  ;;  %v319_v7 = vld [vmem:[#allocation5 + $0x450] sm:$0xff]  ;;  %v186_v8 = vld [vmem:[#allocation5 + $0x28] sm:$0xff] }
  0xc5   :  { %2895 = vmatprep.subr.bf16.mxu0 %v2894_v26  ;;  %v192_v9 = vld [vmem:[#allocation5 + $0x58] sm:$0xff]  ;;  %v2924_v10 = vpack.c.bf16 %v319_v7, %v313_v6  ;;  %v185_v12 = vld [vmem:[#allocation5 + $0x20] sm:$0xff]  ;;  %v191_v13 = vld [vmem:[#allocation5 + $0x50] sm:$0xff] }
  0xc6   :  { %v2974_v11 = vpack.c.bf16 %v192_v9, %v186_v8  ;;  %v198_v14 = vld [vmem:[#allocation5 + $0x88] sm:$0xff]  ;;  %v204_v15 = vld [vmem:[#allocation5 + $0xb8] sm:$0xff]  ;;  %v4049_v16 = vld [vmem:[#allocation2] sm:$0xff]  ;;  %v2976_v17 = vpack.c.bf16 %v191_v13, %v185_v12 }
  0xc7   :  { %v2978_v18 = vpack.c.bf16 %v204_v15, %v198_v14  ;;  %v197_v19 = vld [vmem:[#allocation5 + $0x80] sm:$0xff]  ;;  %v203_v20 = vld [vmem:[#allocation5 + $0xb0] sm:$0xff]  ;;  %v210_v21 = vld [vmem:[#allocation5 + $0xe8] sm:$0xff] }
  0xc8   :  { %2897 = vmatpush1.bf16.msra.mxu0 %v2896_v31  ;;  %v216_v22 = vld [vmem:[#allocation5 + $0x118] sm:$0xff]  ;;  %v2980_v23 = vpack.c.bf16 %v203_v20, %v197_v19  ;;  %v209_v25 = vld [vmem:[#allocation5 + $0xe0] sm:$0xff]  ;;  %v215_v26 = vld [vmem:[#allocation5 + $0x110] sm:$0xff]  ;;  %v3801_v20 = vmov 0.0  }
  0xc9   :  { %2899 = vmatprep.subr.bf16.mxu0 %v2898_v33  ;;  %v2982_v24 = vpack.c.bf16 %v216_v22, %v210_v21  ;;  %v222_v27 = vld [vmem:[#allocation5 + $0x148] sm:$0xff]  ;;  %v228_v28 = vld [vmem:[#allocation5 + $0x178] sm:$0xff]  ;;  %v2984_v29 = vpack.c.bf16 %v215_v26, %v209_v25  ;;  %v221_v31 = vld [vmem:[#allocation5 + $0x140] sm:$0xff]  ;;  %v327_v21 = vlaneseq }
  0xca   :  { %v2986_v30 = vpack.c.bf16 %v228_v28, %v222_v27  ;;  %v227_v33 = vld [vmem:[#allocation5 + $0x170] sm:$0xff]  ;;  %v234_v34 = vld [vmem:[#allocation5 + $0x1a8] sm:$0xff]  ;;  %v240_v35 = vld [vmem:[#allocation5 + $0x1d8] sm:$0xff] }
  0xcb   :  { %v2988_v36 = vpack.c.bf16 %v227_v33, %v221_v31  ;;  %v2990_v37 = vpack.c.bf16 %v240_v35, %v234_v34  ;;  %v246_v40 = vld [vmem:[#allocation5 + $0x208] sm:$0xff]  ;;  %v252_v41 = vld [vmem:[#allocation5 + $0x238] sm:$0xff]  ;;  %v4058_v22 = vshrl.u32 %v327_v21, 7 }
  0xcc   :  { %2901 = vmatpush1.bf16.msra.mxu0 %v2900_v38  ;;  %v233_v38 = vld [vmem:[#allocation5 + $0x1a0] sm:$0xff]  ;;  %v2994_v43 = vpack.c.bf16 %v252_v41, %v246_v40  ;;  %v258_v46 = vld [vmem:[#allocation5 + $0x268] sm:$0xff]  ;;  %v264_v47 = vld [vmem:[#allocation5 + $0x298] sm:$0xff] }
  0xcd   :  { %2903 = vmatprep.subr.bf16.mxu0 %v2902_v39  ;;  %v239_v39 = vld [vmem:[#allocation5 + $0x1d0] sm:$0xff]  ;;  %v2998_v49 = vpack.c.bf16 %v264_v47, %v258_v46  ;;  %v270_v52 = vld [vmem:[#allocation5 + $0x2c8] sm:$0xff]  ;;  %v276_v53 = vld [vmem:[#allocation5 + $0x2f8] sm:$0xff]  ;;  %v4066_v25 = vsub.s32 0, %v4058_v22 }
  0xce   :  { %v2992_v42 = vpack.c.bf16 %v239_v39, %v233_v38  ;;  %v3002_v55 = vpack.c.bf16 %v276_v53, %v270_v52  ;;  %v282_v58 = vld [vmem:[#allocation5 + $0x328] sm:$0xff]  ;;  %v288_v59 = vld [vmem:[#allocation5 + $0x358] sm:$0xff]  ;;  %v189_v39 = vld [vmem:[#allocation5 + $0x40] sm:$0xff] }
  0xcf   :  { %v3006_v61 = vpack.c.bf16 %v288_v59, %v282_v58  ;;  %v294_v0 = vld [vmem:[#allocation5 + $0x388] sm:$0xff]  ;;  %v300_v1 = vld [vmem:[#allocation5 + $0x3b8] sm:$0xff] }
  0xd0   :  { %2905 = vmatpush1.bf16.msra.mxu0 %v2904_v44  ;;  %v245_v44 = vld [vmem:[#allocation5 + $0x200] sm:$0xff]  ;;  %v3010_v3 = vpack.c.bf16 %v300_v1, %v294_v0  ;;  %v306_v6 = vld [vmem:[#allocation5 + $0x3e8] sm:$0xff]  ;;  %v312_v7 = vld [vmem:[#allocation5 + $0x418] sm:$0xff] }
  0xd1   :  { %2907 = vmatprep.subr.bf16.mxu0 %v2906_v45  ;;  %v251_v45 = vld [vmem:[#allocation5 + $0x230] sm:$0xff]  ;;  %v3014_v9 = vpack.c.bf16 %v312_v7, %v306_v6  ;;  %v318_v12 = vld [vmem:[#allocation5 + $0x448] sm:$0xff]  ;;  %v324_v13 = vld [vmem:[#allocation5 + $0x478] sm:$0xff] }
  0xd2   :  { %v2996_v48 = vpack.c.bf16 %v251_v45, %v245_v44  ;;  %v3018_v15 = vpack.c.bf16 %v324_v13, %v318_v12  ;;  %v184_v35 = vld [vmem:[#allocation5 + $0x18] sm:$0xff]  ;;  %v202_v41 = vld [vmem:[#allocation5 + $0xa8] sm:$0xff]  ;;  %v195_v44 = vld [vmem:[#allocation5 + $0x70] sm:$0xff] }
  0xd3   :  { %v196_v40 = vld [vmem:[#allocation5 + $0x78] sm:$0xff]  ;;  %v201_v45 = vld [vmem:[#allocation5 + $0xa0] sm:$0xff]  ;;  %v214_v47 = vld [vmem:[#allocation5 + $0x108] sm:$0xff] }
  0xd4   :  { %2909 = vmatpush1.bf16.msra.mxu0 %v2908_v50  ;;  %v257_v50 = vld [vmem:[#allocation5 + $0x260] sm:$0xff]  ;;  %v208_v46 = vld [vmem:[#allocation5 + $0xd8] sm:$0xff]  ;;  %v226_v53 = vld [vmem:[#allocation5 + $0x168] sm:$0xff] }
  0xd5   :  { %2911 = vmatprep.subr.bf16.mxu0 %v2910_v51  ;;  %v263_v51 = vld [vmem:[#allocation5 + $0x290] sm:$0xff]  ;;  %v220_v52 = vld [vmem:[#allocation5 + $0x138] sm:$0xff]  ;;  %v238_v59 = vld [vmem:[#allocation5 + $0x1c8] sm:$0xff] }
  0xd6   :  { %v3000_v54 = vpack.c.bf16 %v263_v51, %v257_v50  ;;  %v207_v50 = vld [vmem:[#allocation5 + $0xd0] sm:$0xff]  ;;  %v213_v51 = vld [vmem:[#allocation5 + $0x100] sm:$0xff]  ;;  %v232_v58 = vld [vmem:[#allocation5 + $0x198] sm:$0xff] }
  0xd7   :  { %v244_v0 = vld [vmem:[#allocation5 + $0x1f8] sm:$0xff]  ;;  %v250_v1 = vld [vmem:[#allocation5 + $0x228] sm:$0xff] }
  0xd8   :  { %2913 = vmatpush1.bf16.msra.mxu0 %v2912_v56  ;;  %v269_v56 = vld [vmem:[#allocation5 + $0x2c0] sm:$0xff]  ;;  %v256_v6 = vld [vmem:[#allocation5 + $0x258] sm:$0xff]  ;;  %v262_v7 = vld [vmem:[#allocation5 + $0x288] sm:$0xff] }
  0xd9   :  { %2915 = vmatprep.subr.bf16.mxu0 %v2914_v57  ;;  %v275_v57 = vld [vmem:[#allocation5 + $0x2f0] sm:$0xff]  ;;  %v268_v12 = vld [vmem:[#allocation5 + $0x2b8] sm:$0xff]  ;;  %v274_v13 = vld [vmem:[#allocation5 + $0x2e8] sm:$0xff] }
  0xda   :  { %v3004_v60 = vpack.c.bf16 %v275_v57, %v269_v56  ;;  %v219_v56 = vld [vmem:[#allocation5 + $0x130] sm:$0xff]  ;;  %v225_v57 = vld [vmem:[#allocation5 + $0x160] sm:$0xff]  ;;  %v286_v21 = vld [vmem:[#allocation5 + $0x348] sm:$0xff] }
  0xdc   :  { %2917 = vmatpush1.bf16.msra.mxu0 %v2916_v62  ;;  %v281_v62 = vld [vmem:[#allocation5 + $0x320] sm:$0xff] }
  0xdd   :  { %2919 = vmatprep.subr.bf16.mxu0 %v2918_v63  ;;  %v287_v63 = vld [vmem:[#allocation5 + $0x350] sm:$0xff] }
  0xde   :  { %v3008_v2 = vpack.c.bf16 %v287_v63, %v281_v62  ;;  %v231_v62 = vld [vmem:[#allocation5 + $0x190] sm:$0xff]  ;;  %v237_v63 = vld [vmem:[#allocation5 + $0x1c0] sm:$0xff] }
  0xe0   :  { %2921 = vmatpush1.bf16.msra.mxu0 %v2920_v4  ;;  %v293_v4 = vld [vmem:[#allocation5 + $0x380] sm:$0xff] }
  0xe1   :  { %2923 = vmatprep.subr.bf16.mxu0 %v2922_v5  ;;  %v299_v5 = vld [vmem:[#allocation5 + $0x3b0] sm:$0xff] }
  0xe2   :  { %v3012_v8 = vpack.c.bf16 %v299_v5, %v293_v4  ;;  %v243_v4 = vld [vmem:[#allocation5 + $0x1f0] sm:$0xff]  ;;  %v249_v5 = vld [vmem:[#allocation5 + $0x220] sm:$0xff] }
  0xe4   :  { %2925 = vmatpush1.bf16.msra.mxu0 %v2924_v10  ;;  %v305_v10 = vld [vmem:[#allocation5 + $0x3e0] sm:$0xff] }
  0xe5   :  { %2975 = vmatprep.subr.bf16.mxu0 %v2974_v11  ;;  %v311_v11 = vld [vmem:[#allocation5 + $0x410] sm:$0xff] }
  0xe6   :  { %v3016_v14 = vpack.c.bf16 %v311_v11, %v305_v10  ;;  %v255_v10 = vld [vmem:[#allocation5 + $0x250] sm:$0xff]  ;;  %v261_v11 = vld [vmem:[#allocation5 + $0x280] sm:$0xff] }
  0xe7   :  { %426 = vmatmul.mubr.f32.vlgmr.msra.gmra.mrb[0].mxu0 %v4049_v16 }
  0xe8   :  { %2977 = vmatpush1.bf16.msra.mxu0 %v2976_v17  ;;  %2650 = vmatprep.mubr.msk.f32.mxu0 %vm357_vm0, %v4043_v32  ;;  %v317_v17 = vld [vmem:[#allocation5 + $0x440] sm:$0xff] }
  0xe9   :  { %2979 = vmatprep.subr.bf16.mxu0 %v2978_v18  ;;  %v323_v18 = vld [vmem:[#allocation5 + $0x470] sm:$0xff] }
  0xea   :  { %v3020_v19 = vpack.c.bf16 %v323_v18, %v317_v17  ;;  %v267_v17 = vld [vmem:[#allocation5 + $0x2b0] sm:$0xff]  ;;  %v273_v18 = vld [vmem:[#allocation5 + $0x2e0] sm:$0xff] }
  0xec   :  { %2981 = vmatpush1.bf16.msra.mxu0 %v2980_v23  ;;  %v4061_v23 = vsub.s32 1, %v4058_v22 }
  0xed   :  { %2983 = vmatprep.subr.bf16.mxu0 %v2982_v24  ;;  %v4063_v24 = vld [vmem:[#allocation7] sm:$0x3f] }
  0xee   :  { %v334_v26 = vrot.slane %v4063_v24, %v4061_v23  ;;  %v330_v28 = vrot.slane %v4063_v24, %v4066_v25 }
  0xf0   :  { %2985 = vmatpush1.bf16.msra.mxu0 %v2984_v29 }
  0xf1   :  { %2987 = vmatprep.subr.bf16.mxu0 %v2986_v30 }
  0xf4   :  { %2989 = vmatpush1.bf16.msra.mxu0 %v2988_v36  ;;  %v190_v36 = vld [vmem:[#allocation5 + $0x48] sm:$0xff] }
  0xf5   :  { %2991 = vmatprep.subr.bf16.mxu0 %v2990_v37  ;;  %v183_v37 = vld [vmem:[#allocation5 + $0x10] sm:$0xff]  ;;  %v2926_v38 = vpack.c.bf16 %v190_v36, %v184_v35 }
  0xf7   :  { %2927 = vmatprep.subr.bf16.mxu1 %v2926_v38  ;;  %v297_v38 = vld [vmem:[#allocation5 + $0x3a0] sm:$0xff] }
  0xf8   :  { %2993 = vmatpush1.bf16.msra.mxu0 %v2992_v42  ;;  %v2928_v42 = vpack.c.bf16 %v189_v39, %v183_v37  ;;  %v291_v37 = vld [vmem:[#allocation5 + $0x370] sm:$0xff]  ;;  %v304_v39 = vld [vmem:[#allocation5 + $0x3d8] sm:$0xff] }
  0xf9   :  { %2995 = vmatprep.subr.bf16.mxu0 %v2994_v43  ;;  %v2930_v43 = vpack.c.bf16 %v202_v41, %v196_v40  ;;  %v310_v40 = vld [vmem:[#allocation5 + $0x408] sm:$0xff]  ;;  %v2964_v41 = vpack.c.bf16 %v297_v38, %v291_v37 }
  0xfa   :  { %2929 = vmatpush1.bf16.msra.mxu1 %v2928_v42  ;;  %v2966_v42 = vpack.c.bf16 %v310_v40, %v304_v39  ;;  %v892_v37 = vld [vmem:[%s5229_s3 + $0x38] sm:$0xff]  ;;  %v889_v40 = vld [vmem:[%s5229_s3 + $0x20] sm:$0xff] }
  0xfb   :  { %2931 = vmatprep.subr.bf16.mxu1 %v2930_v43  ;;  %v303_v43 = vld [vmem:[#allocation5 + $0x3d0] sm:$0xff] }
  0xfc   :  { %2997 = vmatpush1.bf16.msra.mxu0 %v2996_v48  ;;  %v2932_v48 = vpack.c.bf16 %v201_v45, %v195_v44  ;;  %v309_v44 = vld [vmem:[#allocation5 + $0x400] sm:$0xff]  ;;  %v316_v45 = vld [vmem:[#allocation5 + $0x438] sm:$0xff] }
  0xfd   :  { %2999 = vmatprep.subr.bf16.mxu0 %v2998_v49  ;;  %v2934_v49 = vpack.c.bf16 %v214_v47, %v208_v46  ;;  %v322_v46 = vld [vmem:[#allocation5 + $0x468] sm:$0xff]  ;;  %v2968_v47 = vpack.c.bf16 %v309_v44, %v303_v43 }
  0xfe   :  { %2933 = vmatpush1.bf16.msra.mxu1 %v2932_v48  ;;  %v2970_v48 = vpack.c.bf16 %v322_v46, %v316_v45  ;;  %v896_v43 = vld [vmem:[%s5229_s3 + $0x58] sm:$0xff]  ;;  %v893_v46 = vld [vmem:[%s5229_s3 + $0x40] sm:$0xff] }
  0xff   :  { %2935 = vmatprep.subr.bf16.mxu1 %v2934_v49  ;;  %v315_v49 = vld [vmem:[#allocation5 + $0x430] sm:$0xff] }
 0x100   :  { %3001 = vmatpush1.bf16.msra.mxu0 %v3000_v54  ;;  %v2936_v54 = vpack.c.bf16 %v213_v51, %v207_v50  ;;  %v321_v50 = vld [vmem:[#allocation5 + $0x460] sm:$0xff] }
 0x101   :  { %3003 = vmatprep.subr.bf16.mxu0 %v3002_v55  ;;  %v2938_v55 = vpack.c.bf16 %v226_v53, %v220_v52  ;;  %v2972_v51 = vpack.c.bf16 %v321_v50, %v315_v49  ;;  %v900_v49 = vld [vmem:[%s5229_s3 + $0x78] sm:$0xff] }
 0x102   :  { %2937 = vmatpush1.bf16.msra.mxu1 %v2936_v54 }
 0x103   :  { %2939 = vmatprep.subr.bf16.mxu1 %v2938_v55 }
 0x104   :  { %3005 = vmatpush1.bf16.msra.mxu0 %v3004_v60  ;;  %v2940_v60 = vpack.c.bf16 %v225_v57, %v219_v56 }
 0x105   :  { %3007 = vmatprep.subr.bf16.mxu0 %v3006_v61  ;;  %v2942_v61 = vpack.c.bf16 %v238_v59, %v232_v58 }
 0x106   :  { %2941 = vmatpush1.bf16.msra.mxu1 %v2940_v60 }
 0x107   :  { %2943 = vmatprep.subr.bf16.mxu1 %v2942_v61  ;;  %v337_v61 = vsub.s32 2, %v4058_v22 }
 0x108   :  { %3009 = vmatpush1.bf16.msra.mxu0 %v3008_v2  ;;  %v2944_v2 = vpack.c.bf16 %v237_v63, %v231_v62 }
 0x109   :  { %3011 = vmatprep.subr.bf16.mxu0 %v3010_v3  ;;  %v2946_v3 = vpack.c.bf16 %v250_v1, %v244_v0  ;;  %v338_v62 = vrot.slane %v4063_v24, %v337_v61 }
 0x10a   :  { %2945 = vmatpush1.bf16.msra.mxu1 %v2944_v2 }
 0x10b   :  { %2947 = vmatprep.subr.bf16.mxu1 %v2946_v3  ;;  %v345_v3 = vsub.s32 4, %v4058_v22 }
 0x10c   :  { %3013 = vmatpush1.bf16.msra.mxu0 %v3012_v8  ;;  %v2948_v8 = vpack.c.bf16 %v249_v5, %v243_v4  ;;  %v341_v4 = vsub.s32 3, %v4058_v22 }
 0x10d   :  { %3015 = vmatprep.subr.bf16.mxu0 %v3014_v9  ;;  %v2950_v9 = vpack.c.bf16 %v262_v7, %v256_v6  ;;  %v346_v5 = vrot.slane %v4063_v24, %v345_v3  ;;  %v349_v6 = vsub.s32 5, %v4058_v22 }
 0x10e   :  { %2949 = vmatpush1.bf16.msra.mxu1 %v2948_v8 }
 0x10f   :  { %2951 = vmatprep.subr.bf16.mxu1 %v2950_v9  ;;  %v342_v9 = vrot.slane %v4063_v24, %v341_v4 }
 0x110   :  { %3017 = vmatpush1.bf16.msra.mxu0 %v3016_v14  ;;  %v2952_v14 = vpack.c.bf16 %v261_v11, %v255_v10  ;;  %v350_v11 = vrot.slane %v4063_v24, %v349_v6 }
 0x111   :  { %3019 = vmatprep.subr.bf16.mxu0 %v3018_v15  ;;  %v2954_v15 = vpack.c.bf16 %v274_v13, %v268_v12 }
 0x112   :  { %2953 = vmatpush1.bf16.msra.mxu1 %v2952_v14 }
 0x113   :  { %2955 = vmatprep.subr.bf16.mxu1 %v2954_v15 }
 0x114   :  { %3021 = vmatpush1.bf16.msra.mxu0 %v3020_v19  ;;  %v280_v19 = vld [vmem:[#allocation5 + $0x318] sm:$0xff] }
 0x115   :  { %2838 = vmatprep.subr.mxu0 %v3801_v20 }
 0x117   :  { %568 = vmatmul.mubr.f32.vlgmr.msra.gmra.mrb[2].mxu0 %v4049_v16 }
 0x118   :  { %2840 = vmatprep.mubr.msk.f32.mxu0 %vm3802_vm1, %v3801_v20 }
 0x1ba   :  { %v427_v27 = vpop.f32.mrb[0].mxu0 }
 0x1bb   :  { %v429_v29 = vpop.f32.mrb[1].mxu0  ;;  %v428_v31 = vadd.f32 %v427_v27, %v330_v28  ;;  %v2958_v27 = vpack.c.bf16 %v286_v21, %v280_v19  ;;  %v279_v28 = vld [vmem:[#allocation5 + $0x310] sm:$0xff] }
 0x1bc   :  { %v430_v30 = vadd.f32 %v429_v29, %v334_v26  ;;  %v2956_v26 = vpack.c.bf16 %v273_v18, %v267_v17  ;;  %v285_v29 = vld [vmem:[#allocation5 + $0x340] sm:$0xff] }
 0x1bd   :  { %v2960_v35 = vpack.c.bf16 %v285_v29, %v279_v28  ;;  %v886_v28 = vld [vmem:[%s5229_s3 + $0x8] sm:$0xff]  ;;  %v888_v29 = vld [vmem:[%s5229_s3 + $0x18] sm:$0xff] }
 0x1be   :  { %2839 = vmatpush3.xpose.msra.mxu0 %v430_v30  ;;  %v292_v30 = vld [vmem:[#allocation5 + $0x378] sm:$0xff]  ;;  %2957 = vmatpush1.bf16.msra.mxu1 %v2956_v26 }
 0x1bf   :  { %2843 = vmatprep.subr.mxu0 %v3801_v20  ;;  %2959 = vmatprep.subr.bf16.mxu1 %v2958_v27 }
 0x1c1   :  { %2841 = vmatmul.mubr.f32.vlgmr.msra.gmra.mrb[4].mxu0 %v428_v31  ;;  %v298_v31 = vld [vmem:[#allocation5 + $0x3a8] sm:$0xff] }
 0x1c2   :  { %2845 = vmatprep.mubr.msk.f32.mxu0 %vm3802_vm1, %v3801_v20  ;;  %v2962_v36 = vpack.c.bf16 %v298_v31, %v292_v30  ;;  %2961 = vmatpush1.bf16.msra.mxu1 %v2960_v35  ;;  %v885_v30 = vld [vmem:[%s5229_s3] sm:$0xff]  ;;  %v3022_v31 = vpack.c.bf16 %v888_v29, %v886_v28  ;;  %v887_v35 = vld [vmem:[%s5229_s3 + $0x10] sm:$0xff]  ;;  %v922_v29 = vld [vmem:[%s5229_s3 + $0x128] sm:$0xff] }
 0x1c3   :  { %v3024_v38 = vpack.c.bf16 %v887_v35, %v885_v30  ;;  %v919_v28 = vld [vmem:[%s5229_s3 + $0x110] sm:$0xff]  ;;  %v924_v30 = vld [vmem:[%s5229_s3 + $0x138] sm:$0xff] }
 0x1c4   :  { %2963 = vmatprep.subr.bf16.mxu1 %v2962_v36  ;;  %v890_v36 = vld [vmem:[%s5229_s3 + $0x28] sm:$0xff]  ;;  %v3058_v35 = vpack.c.bf16 %v924_v30, %v922_v29 }
 0x1c5   :  { %v3026_v39 = vpack.c.bf16 %v892_v37, %v890_v36  ;;  %v921_v36 = vld [vmem:[%s5229_s3 + $0x120] sm:$0xff]  ;;  %v923_v37 = vld [vmem:[%s5229_s3 + $0x130] sm:$0xff] }
 0x1c6   :  { %2965 = vmatpush1.bf16.msra.mxu1 %v2964_v41  ;;  %v891_v41 = vld [vmem:[%s5229_s3 + $0x30] sm:$0xff] }
 0x1c7   :  { %2967 = vmatprep.subr.bf16.mxu1 %v2966_v42  ;;  %v894_v42 = vld [vmem:[%s5229_s3 + $0x48] sm:$0xff]  ;;  %v3028_v44 = vpack.c.bf16 %v891_v41, %v889_v40  ;;  %v3060_v40 = vpack.c.bf16 %v923_v37, %v921_v36 }
 0x1c8   :  { %v3030_v45 = vpack.c.bf16 %v896_v43, %v894_v42  ;;  %v925_v42 = vld [vmem:[%s5229_s3 + $0x140] sm:$0xff]  ;;  %v927_v43 = vld [vmem:[%s5229_s3 + $0x150] sm:$0xff] }
 0x1ca   :  { %2969 = vmatpush1.bf16.msra.mxu1 %v2968_v47  ;;  %v895_v47 = vld [vmem:[%s5229_s3 + $0x50] sm:$0xff] }
 0x1cb   :  { %2971 = vmatprep.subr.bf16.mxu1 %v2970_v48  ;;  %v898_v48 = vld [vmem:[%s5229_s3 + $0x68] sm:$0xff]  ;;  %v3032_v50 = vpack.c.bf16 %v895_v47, %v893_v46  ;;  %v3064_v46 = vpack.c.bf16 %v927_v43, %v925_v42 }
 0x1ce   :  { %2973 = vmatpush1.bf16.msra.mxu1 %v2972_v51  ;;  %v3034_v51 = vpack.c.bf16 %v900_v49, %v898_v48  ;;  %v929_v48 = vld [vmem:[%s5229_s3 + $0x160] sm:$0xff]  ;;  %v931_v49 = vld [vmem:[%s5229_s3 + $0x170] sm:$0xff] }
 0x1cf   :  { %3023 = vmatprep.subr.bf16.mxu1 %v3022_v31 }
 0x1d1   :  { %497 = vmatmul.mubr.f32.vlgmr.msra.gmra.mrb[0].mxu1 %v4049_v16 }
 0x1d2   :  { %3025 = vmatpush1.bf16.msra.mxu1 %v3024_v38  ;;  %v926_v38 = vld [vmem:[%s5229_s3 + $0x148] sm:$0xff] }
 0x1d3   :  { %3027 = vmatprep.subr.bf16.mxu1 %v3026_v39  ;;  %v928_v39 = vld [vmem:[%s5229_s3 + $0x158] sm:$0xff] }
 0x1d4   :  { %v3062_v41 = vpack.c.bf16 %v928_v39, %v926_v38  ;;  %v1084_v38 = vld [vmem:[%s5233_s7 + $0x18] sm:$0xff] }
 0x1d6   :  { %3029 = vmatpush1.bf16.msra.mxu1 %v3028_v44  ;;  %v930_v44 = vld [vmem:[%s5229_s3 + $0x168] sm:$0xff] }
 0x1d7   :  { %3031 = vmatprep.subr.bf16.mxu1 %v3030_v45  ;;  %v932_v45 = vld [vmem:[%s5229_s3 + $0x178] sm:$0xff] }
 0x1d8   :  { %v3066_v47 = vpack.c.bf16 %v932_v45, %v930_v44  ;;  %v1085_v44 = vld [vmem:[%s5233_s7 + $0x20] sm:$0xff]  ;;  %v1087_v45 = vld [vmem:[%s5233_s7 + $0x30] sm:$0xff] }
 0x1da   :  { %3033 = vmatpush1.bf16.msra.mxu1 %v3032_v50  ;;  %v934_v50 = vld [vmem:[%s5229_s3 + $0x188] sm:$0xff] }
 0x1db   :  { %3035 = vmatprep.subr.bf16.mxu1 %v3034_v51  ;;  %v936_v51 = vld [vmem:[%s5229_s3 + $0x198] sm:$0xff] }
 0x1ea   :  { %v4075_v33 = vpop.f32.mrb[2].mxu0 }
 0x1eb   :  { %v4077_v34 = vpop.f32.mrb[3].mxu0  ;;  %v570_v10 = vadd.f32 %v4075_v33, %v346_v5  ;;  %v910_v5 = vld [vmem:[%s5229_s3 + $0xc8] sm:$0xff] }
 0x1ec   :  { %v572_v13 = vadd.f32 %v4077_v34, %v350_v11  ;;  %v911_v11 = vld [vmem:[%s5229_s3 + $0xd0] sm:$0xff] }
 0x294   :  { %v640_v52 = vpop.f32.mrb[4].mxu0 }
 0x295   :  { %v644_v53 = vmul.f32 0.10206208, %v640_v52  ;;  %v2842_v54 = vpop.f32.mrb[5].mxu0  ;;  %v897_v52 = vld [vmem:[%s5229_s3 + $0x60] sm:$0xff] }
 0x296   :  { %v902_v54 = vld [vmem:[%s5229_s3 + $0x88] sm:$0xff] }
 0x297   :  { %v646_v55 = vsel %vm645_vm2, %v644_v53, -inf }
 0x298   :  { %647 = vmax.xlane.f32.xlu0 %v646_v55  ;;  %v904_v55 = vld [vmem:[%s5229_s3 + $0x98] sm:$0xff] }
 0x2a4   :  { %v498_v63 = vpop.f32.mrb[0].mxu1 }
 0x2a5   :  { %v499_v0 = vadd.f32 %v498_v63, %v338_v62  ;;  %v500_v1 = vpop.f32.mrb[1].mxu1  ;;  %v908_v62 = vld [vmem:[%s5229_s3 + $0xb8] sm:$0xff] }
 0x2a6   :  { %v501_v12 = vadd.f32 %v500_v1, %v342_v9  ;;  %v905_v1 = vld [vmem:[%s5229_s3 + $0xa0] sm:$0xff] }
 0x2a7   :  { %2844 = vmatpush3.msra.mxu0 %v499_v0 }
 0x2a8   :  { %2848 = vmatprep.subr.mxu0 %v3801_v20 }
 0x325   :  { %v648_v56 = vpop.xlane.xlu0 %647 }
 0x326   :  { %v649_v57 = vsub.f32 %v644_v53, %v648_v56  ;;  %v899_v53 = vld [vmem:[%s5229_s3 + $0x70] sm:$0xff] }
 0x327   :  { %v3036_v56 = vpack.c.bf16 %v899_v53, %v897_v52  ;;  %v3068_v52 = vpack.c.bf16 %v931_v49, %v929_v48  ;;  %v3070_v53 = vpack.c.bf16 %v936_v51, %v934_v50  ;;  %v3092_v48 = vpack.c.bf16 %v1087_v45, %v1085_v44  ;;  %v1089_v50 = vld [vmem:[%s5233_s7 + $0x40] sm:$0xff]  ;;  %v1091_v51 = vld [vmem:[%s5233_s7 + $0x50] sm:$0xff] }
 0x328   :  { %v650_v58 = vmul.f32 1.442695, %v649_v57  ;;  %v3038_v57 = vpack.c.bf16 %v904_v55, %v902_v54  ;;  %v933_v54 = vld [vmem:[%s5229_s3 + $0x180] sm:$0xff]  ;;  %v935_v55 = vld [vmem:[%s5229_s3 + $0x190] sm:$0xff] }
 0x329   :  { %3037 = vmatpush1.bf16.msra.mxu1 %v3036_v56  ;;  %v938_v56 = vld [vmem:[%s5229_s3 + $0x1a8] sm:$0xff]  ;;  %v1117_v44 = vld [vmem:[%s5233_s7 + $0x120] sm:$0xff]  ;;  %v1119_v45 = vld [vmem:[%s5233_s7 + $0x130] sm:$0xff] }
 0x32a   :  { %3505 = vpow2.f32 %v650_v58  ;;  %v901_v58 = vld [vmem:[%s5229_s3 + $0x80] sm:$0xff]  ;;  %3039 = vmatprep.subr.bf16.mxu1 %v3038_v57  ;;  %v940_v57 = vld [vmem:[%s5229_s3 + $0x1b8] sm:$0xff] }
 0x334   :  { %v3506_v59 = vpop.eup %3505 }
 0x335   :  { %v652_v60 = vsel %vm645_vm2, %v3506_v59, 0.0 }
 0x336   :  { %653 = vadd.xlane.f32.xlu0 %v652_v60  ;;  %v906_v60 = vld [vmem:[%s5229_s3 + $0xa8] sm:$0xff] }
 0x337   :  { %v3042_v0 = vpack.c.bf16 %v908_v62, %v906_v60  ;;  %v937_v60 = vld [vmem:[%s5229_s3 + $0x1a0] sm:$0xff]  ;;  %v939_v62 = vld [vmem:[%s5229_s3 + $0x1b0] sm:$0xff] }
 0x3c3   :  { %v654_v2 = vpop.xlane.xlu0 %653 }
 0x3c4   :  { %3507 = vrcp.f32 %v654_v2  ;;  %v907_v2 = vld [vmem:[%s5229_s3 + $0xb0] sm:$0xff] }
 0x3ce   :  { %v3508_v7 = vpop.eup %3507 }
 0x3cf   :  { %v656_v8 = vmul.f32 %v3508_v7, %v3506_v59  ;;  %v903_v59 = vld [vmem:[%s5229_s3 + $0x90] sm:$0xff]  ;;  %v912_v7 = vld [vmem:[%s5229_s3 + $0xd8] sm:$0xff] }
 0x3d0   :  { %v3040_v63 = vpack.c.bf16 %v903_v59, %v901_v58  ;;  %v3046_v9 = vpack.c.bf16 %v912_v7, %v910_v5  ;;  %v3072_v58 = vpack.c.bf16 %v935_v55, %v933_v54  ;;  %v3074_v59 = vpack.c.bf16 %v940_v57, %v938_v56  ;;  %v941_v5 = vld [vmem:[%s5229_s3 + $0x1c0] sm:$0xff]  ;;  %v943_v7 = vld [vmem:[%s5229_s3 + $0x1d0] sm:$0xff] }
 0x3d1   :  { %2846 = vmatmul.mubr.msk.f32.vlgmr.msra.gmra.mrb[6].mxu0 %vm645_vm2, %v656_v8  ;;  %v3044_v8 = vpack.c.bf16 %v907_v2, %v905_v1  ;;  %v3076_v1 = vpack.c.bf16 %v939_v62, %v937_v60  ;;  %v3096_v54 = vpack.c.bf16 %v1091_v51, %v1089_v50  ;;  %v1093_v56 = vld [vmem:[%s5233_s7 + $0x60] sm:$0xff]  ;;  %v1095_v57 = vld [vmem:[%s5233_s7 + $0x70] sm:$0xff] }
 0x3d2   :  { %2849 = vmatpush3.xpose.msra.mxu0 %v570_v10  ;;  %2850 = vmatprep.mubr.msk.f32.mxu0 %vm3802_vm1, %v3801_v20  ;;  %v909_v10 = vld [vmem:[%s5229_s3 + $0xc0] sm:$0xff]  ;;  %v3100_v60 = vpack.c.bf16 %v1095_v57, %v1093_v56  ;;  %v1123_v51 = vld [vmem:[%s5233_s7 + $0x150] sm:$0xff] }
 0x3d3   :  { %2853 = vmatprep.subr.mxu0 %v3801_v20  ;;  %3041 = vmatpush1.bf16.msra.mxu1 %v3040_v63  ;;  %v942_v63 = vld [vmem:[%s5229_s3 + $0x1c8] sm:$0xff]  ;;  %v1121_v50 = vld [vmem:[%s5233_s7 + $0x140] sm:$0xff]  ;;  %v1127_v57 = vld [vmem:[%s5233_s7 + $0x170] sm:$0xff] }
 0x3d4   :  { %3043 = vmatprep.subr.bf16.mxu1 %v3042_v0  ;;  %v944_v0 = vld [vmem:[%s5229_s3 + $0x1d8] sm:$0xff]  ;;  %v1125_v56 = vld [vmem:[%s5233_s7 + $0x160] sm:$0xff] }
 0x3d5   :  { %2851 = vmatmul.mubr.f32.vlgmr.msra.gmra.mrb[8].mxu0 %v501_v12  ;;  %v914_v12 = vld [vmem:[%s5229_s3 + $0xe8] sm:$0xff]  ;;  %v3078_v2 = vpack.c.bf16 %v944_v0, %v942_v63  ;;  %v1097_v63 = vld [vmem:[%s5233_s7 + $0x80] sm:$0xff]  ;;  %v1099_v0 = vld [vmem:[%s5233_s7 + $0x90] sm:$0xff] }
 0x3d6   :  { %2854 = vmatpush3.msra.mxu0 %v572_v13  ;;  %2855 = vmatprep.mubr.msk.f32.mxu0 %vm3802_vm1, %v3801_v20  ;;  %v916_v13 = vld [vmem:[%s5229_s3 + $0xf8] sm:$0xff] }
 0x3d7   :  { %3045 = vmatpush1.bf16.msra.mxu1 %v3044_v8  ;;  %v946_v8 = vld [vmem:[%s5229_s3 + $0x1e8] sm:$0xff] }
 0x3d8   :  { %3047 = vmatprep.subr.bf16.mxu1 %v3046_v9  ;;  %v948_v9 = vld [vmem:[%s5229_s3 + $0x1f8] sm:$0xff] }
 0x4a4   :  { %v4107_v33 = vpop.f32.mrb[6].mxu0 }
 0x4a5   :  { %v2847_v14 = vpop.f32.mrb[7].mxu0 }
 0x4a6   :  { %v3048_v14 = vpack.c.bf16 %v911_v11, %v909_v10  ;;  %v3080_v10 = vpack.c.bf16 %v943_v7, %v941_v5  ;;  %v3082_v11 = vpack.c.bf16 %v948_v9, %v946_v8  ;;  %v3104_v5 = vpack.c.bf16 %v1099_v0, %v1097_v63  ;;  %v1101_v8 = vld [vmem:[%s5233_s7 + $0xa0] sm:$0xff]  ;;  %v1103_v9 = vld [vmem:[%s5233_s7 + $0xb0] sm:$0xff] }
 0x4a7   :  { %v1219_v0 = vld [vmem:[%s5235_s9 + $0x10] sm:$0xff] }
 0x4a8   :  { %v796_v24 = vpop.f32.mrb[8].mxu0  ;;  %3049 = vmatpush1.bf16.msra.mxu1 %v3048_v14 }
 0x4a9   :  { %v800_v15 = vmul.f32 0.10206208, %v796_v24  ;;  %v2852_v17 = vpop.f32.mrb[9].mxu0  ;;  %v3050_v24 = vpack.c.bf16 %v916_v13, %v914_v12  ;;  %v945_v12 = vld [vmem:[%s5229_s3 + $0x1e0] sm:$0xff]  ;;  %v947_v13 = vld [vmem:[%s5229_s3 + $0x1f0] sm:$0xff] }
 0x4aa   :  { %v915_v17 = vld [vmem:[%s5229_s3 + $0xf0] sm:$0xff]  ;;  %v3084_v14 = vpack.c.bf16 %v947_v13, %v945_v12  ;;  %v3108_v12 = vpack.c.bf16 %v1103_v9, %v1101_v8  ;;  %v1221_v8 = vld [vmem:[%s5235_s9 + $0x20] sm:$0xff] }
 0x4ab   :  { %v801_v18 = vsel %vm645_vm2, %v800_v15, -inf  ;;  %3051 = vmatprep.subr.bf16.mxu1 %v3050_v24  ;;  %v1223_v9 = vld [vmem:[%s5235_s9 + $0x30] sm:$0xff] }
 0x4ac   :  { %802 = vmax.xlane.f32.xlu1 %v801_v18  ;;  %v918_v18 = vld [vmem:[%s5229_s3 + $0x108] sm:$0xff] }
 0x539   :  { %v803_v19 = vpop.xlane.xlu1 %802 }
 0x53a   :  { %v804_v21 = vsub.f32 %v800_v15, %v803_v19  ;;  %v913_v15 = vld [vmem:[%s5229_s3 + $0xe0] sm:$0xff]  ;;  %v920_v19 = vld [vmem:[%s5229_s3 + $0x118] sm:$0xff] }
 0x53c   :  { %v805_v26 = vmul.f32 1.442695, %v804_v21  ;;  %v3052_v21 = vpack.c.bf16 %v915_v17, %v913_v15 }
 0x53e   :  { %3509 = vpow2.f32 %v805_v26  ;;  %v3054_v26 = vpack.c.bf16 %v920_v19, %v918_v18  ;;  %3053 = vmatpush1.bf16.msra.mxu1 %v3052_v21  ;;  %v949_v21 = vld [vmem:[#allocation8] sm:$0x3] }
 0x540   :  { %3055 = vmatprep.subr.bf16.mxu1 %v3054_v26  ;;  %v954_v26 = vrot.slane %v949_v21, %v4066_v25 }
 0x548   :  { %v4110_v27 = vpop.eup %3509 }
 0x549   :  { %v807_v34 = vsel %vm645_vm2, %v4110_v27, 0.0 }
 0x54a   :  { %808 = vadd.xlane.f32.xlu1 %v807_v34  ;;  %v917_v34 = vld [vmem:[%s5229_s3 + $0x100] sm:$0xff] }
 0x54b   :  { %v3056_v31 = vpack.c.bf16 %v919_v28, %v917_v34  ;;  %v958_v34 = vrot.slane %v949_v21, %v4061_v23 }
 0x54d   :  { %3057 = vmatpush1.bf16.msra.mxu1 %v3056_v31 }
 0x54e   :  { %3059 = vmatprep.subr.bf16.mxu1 %v3058_v35 }
 0x551   :  { %3061 = vmatpush1.bf16.msra.mxu1 %v3060_v40  ;;  %v1086_v40 = vld [vmem:[%s5233_s7 + $0x28] sm:$0xff] }
 0x552   :  { %3063 = vmatprep.subr.bf16.mxu1 %v3062_v41  ;;  %v1088_v41 = vld [vmem:[%s5233_s7 + $0x38] sm:$0xff] }
 0x553   :  { %v3090_v43 = vpack.c.bf16 %v1088_v41, %v1086_v40  ;;  %v1118_v40 = vld [vmem:[%s5233_s7 + $0x128] sm:$0xff]  ;;  %v1120_v41 = vld [vmem:[%s5233_s7 + $0x138] sm:$0xff] }
 0x555   :  { %3065 = vmatpush1.bf16.msra.mxu1 %v3064_v46  ;;  %v1090_v46 = vld [vmem:[%s5233_s7 + $0x48] sm:$0xff] }
 0x556   :  { %3067 = vmatprep.subr.bf16.mxu1 %v3066_v47  ;;  %v1092_v47 = vld [vmem:[%s5233_s7 + $0x58] sm:$0xff] }
 0x557   :  { %v3094_v49 = vpack.c.bf16 %v1092_v47, %v1090_v46  ;;  %v1122_v46 = vld [vmem:[%s5233_s7 + $0x148] sm:$0xff]  ;;  %v1124_v47 = vld [vmem:[%s5233_s7 + $0x158] sm:$0xff] }
 0x559   :  { %3069 = vmatpush1.bf16.msra.mxu1 %v3068_v52  ;;  %v1094_v52 = vld [vmem:[%s5233_s7 + $0x68] sm:$0xff] }
 0x55a   :  { %3071 = vmatprep.subr.bf16.mxu1 %v3070_v53  ;;  %v1096_v53 = vld [vmem:[%s5233_s7 + $0x78] sm:$0xff] }
 0x55b   :  { %v3098_v55 = vpack.c.bf16 %v1096_v53, %v1094_v52  ;;  %v1126_v52 = vld [vmem:[%s5233_s7 + $0x168] sm:$0xff]  ;;  %v1128_v53 = vld [vmem:[%s5233_s7 + $0x178] sm:$0xff] }
 0x55d   :  { %3073 = vmatpush1.bf16.msra.mxu1 %v3072_v58  ;;  %v1098_v58 = vld [vmem:[%s5233_s7 + $0x88] sm:$0xff] }
 0x55e   :  { %3075 = vmatprep.subr.bf16.mxu1 %v3074_v59  ;;  %v1100_v59 = vld [vmem:[%s5233_s7 + $0x98] sm:$0xff] }
 0x55f   :  { %v3102_v62 = vpack.c.bf16 %v1100_v59, %v1098_v58  ;;  %v3132_v58 = vpack.c.bf16 %v1127_v57, %v1125_v56  ;;  %v1218_v59 = vld [vmem:[%s5235_s9 + $0x8] sm:$0xff]  ;;  %v1249_v56 = vld [vmem:[%s5235_s9 + $0x100] sm:$0xff]  ;;  %v1251_v57 = vld [vmem:[%s5235_s9 + $0x110] sm:$0xff] }
 0x561   :  { %3077 = vmatpush1.bf16.msra.mxu1 %v3076_v1  ;;  %v1102_v1 = vld [vmem:[%s5233_s7 + $0xa8] sm:$0xff] }
 0x562   :  { %3079 = vmatprep.subr.bf16.mxu1 %v3078_v2  ;;  %v1104_v2 = vld [vmem:[%s5233_s7 + $0xb8] sm:$0xff] }
 0x563   :  { %v3106_v7 = vpack.c.bf16 %v1104_v2, %v1102_v1  ;;  %v1222_v1 = vld [vmem:[%s5235_s9 + $0x28] sm:$0xff]  ;;  %v1224_v2 = vld [vmem:[%s5235_s9 + $0x38] sm:$0xff] }
 0x565   :  { %3081 = vmatpush1.bf16.msra.mxu1 %v3080_v10  ;;  %v1106_v10 = vld [vmem:[%s5233_s7 + $0xc8] sm:$0xff] }
 0x566   :  { %3083 = vmatprep.subr.bf16.mxu1 %v3082_v11  ;;  %v1108_v11 = vld [vmem:[%s5233_s7 + $0xd8] sm:$0xff] }
 0x567   :  { %v3110_v13 = vpack.c.bf16 %v1108_v11, %v1106_v10  ;;  %v1226_v10 = vld [vmem:[%s5235_s9 + $0x48] sm:$0xff]  ;;  %v1228_v11 = vld [vmem:[%s5235_s9 + $0x58] sm:$0xff] }
 0x569   :  { %3085 = vmatpush1.bf16.msra.mxu1 %v3084_v14  ;;  %v1105_v14 = vld [vmem:[%s5233_s7 + $0xc0] sm:$0xff] }
 0x5d7   :  { %v809_v24 = vpop.xlane.xlu1 %808 }
 0x5d8   :  { %3511 = vrcp.f32 %v809_v24  ;;  %v1107_v24 = vld [vmem:[%s5233_s7 + $0xd0] sm:$0xff] }
 0x5e2   :  { %v3512_v15 = vpop.eup %3511 }
 0x5e3   :  { %v811_v17 = vmul.f32 %v3512_v15, %v4110_v27  ;;  %v3112_v15 = vpack.c.bf16 %v1107_v24, %v1105_v14  ;;  %v1225_v14 = vld [vmem:[%s5235_s9 + $0x40] sm:$0xff]  ;;  %v1227_v24 = vld [vmem:[%s5235_s9 + $0x50] sm:$0xff] }
 0x5e5   :  { %2856 = vmatmul.mubr.msk.f32.vlgmr.msra.gmra.mrb[10].mxu0 %vm645_vm2, %v811_v17 }
 0x6b8   :  { %v881_v18 = vpop.f32.mrb[10].mxu0 }
 0x6b9   :  { %v2857_v19 = vpop.f32.mrb[11].mxu0  ;;  %1025 = vmatprep.mubr.f32.mxu1 %v881_v18 }
 0x6ba   :  { %1026 = vmatmul.mubr.f32.vlgmr.msra.gmra.mrb[2].mxu1 %v4107_v33  ;;  %v1082_v33 = vld [vmem:[%s5233_s7 + $0x8] sm:$0xff] }
 0x6bb   :  { %v3086_v39 = vpack.c.bf16 %v1084_v38, %v1082_v33  ;;  %v1114_v33 = vld [vmem:[%s5233_s7 + $0x108] sm:$0xff]  ;;  %v1116_v38 = vld [vmem:[%s5233_s7 + $0x118] sm:$0xff] }
 0x6bd   :  { %3087 = vmatprep.subr.bf16.mxu0 %v3086_v39  ;;  %v3118_v39 = vpack.c.bf16 %v1116_v38, %v1114_v33  ;;  %v1240_v33 = vld [vmem:[%s5235_s9 + $0xb8] sm:$0xff] }
 0x78d   :  { %v1027_v28 = vpop.f32.mrb[2].mxu1 }
 0x78e   :  { %v1028_v29 = vadd.f32 %v1027_v28, %v954_v26  ;;  %v1029_v30 = vpop.f32.mrb[3].mxu1 }
 0x78f   :  { %v1030_v31 = vadd.f32 %v1029_v30, %v958_v34  ;;  %v1110_v30 = vld [vmem:[%s5233_s7 + $0xe8] sm:$0xff] }
 0x790   :  { %v1032_v27 = vadd.f32 %v1028_v29, %v4049_v16  ;;  %v1083_v16 = vld [vmem:[%s5233_s7 + $0x10] sm:$0xff] }
 0x791   :  { %v4312_v35 = vadd.f32 %v1030_v31, %v4043_v32  ;;  %v1081_v32 = vld [vmem:[%s5233_s7] sm:$0xff]  ;;  %v1112_v31 = vld [vmem:[%s5233_s7 + $0xf8] sm:$0xff] }
 0x792   :  { %v3088_v42 = vpack.c.bf16 %v1083_v16, %v1081_v32  ;;  %v1113_v32 = vld [vmem:[%s5233_s7 + $0x100] sm:$0xff]  ;;  %v1115_v16 = vld [vmem:[%s5233_s7 + $0x110] sm:$0xff] }
 0x793   :  { %v1036_v36 = vsel %vm357_vm0, %v4312_v35, 0.0 }
 0x794   :  { %v1037_v37 = vadd.f32 %v1036_v36, %v1032_v27  ;;  %3089 = vmatpush1.bf16.msra.mxu0 %v3088_v42  ;;  %v1111_v36 = vld [vmem:[%s5233_s7 + $0xf0] sm:$0xff]  ;;  %v3120_v42 = vpack.c.bf16 %v1115_v16, %v1113_v32 }
 0x795   :  { %3091 = vmatprep.subr.bf16.mxu0 %v3090_v43  ;;  %v3122_v43 = vpack.c.bf16 %v1120_v41, %v1118_v40  ;;  %v1239_v16 = vld [vmem:[%s5235_s9 + $0xb0] sm:$0xff]  ;;  %v1242_v40 = vld [vmem:[%s5235_s9 + $0xc8] sm:$0xff]  ;;  %v1244_v41 = vld [vmem:[%s5235_s9 + $0xd8] sm:$0xff] }
 0x796   :  { %1038 = vadd.xlane.f32.xlu0 %v1037_v37 }
 0x798   :  { %3093 = vmatpush1.bf16.msra.mxu0 %v3092_v48  ;;  %v3124_v48 = vpack.c.bf16 %v1119_v45, %v1117_v44  ;;  %v1241_v44 = vld [vmem:[%s5235_s9 + $0xc0] sm:$0xff]  ;;  %v1243_v45 = vld [vmem:[%s5235_s9 + $0xd0] sm:$0xff] }
 0x799   :  { %3095 = vmatprep.subr.bf16.mxu0 %v3094_v49  ;;  %v3126_v49 = vpack.c.bf16 %v1124_v47, %v1122_v46  ;;  %v1246_v46 = vld [vmem:[%s5235_s9 + $0xe8] sm:$0xff]  ;;  %v1248_v47 = vld [vmem:[%s5235_s9 + $0xf8] sm:$0xff] }
 0x79c   :  { %3097 = vmatpush1.bf16.msra.mxu0 %v3096_v54  ;;  %v3128_v54 = vpack.c.bf16 %v1123_v51, %v1121_v50  ;;  %v1245_v50 = vld [vmem:[%s5235_s9 + $0xe0] sm:$0xff]  ;;  %v1247_v51 = vld [vmem:[%s5235_s9 + $0xf0] sm:$0xff] }
 0x79d   :  { %3099 = vmatprep.subr.bf16.mxu0 %v3098_v55  ;;  %v3130_v55 = vpack.c.bf16 %v1128_v53, %v1126_v52  ;;  %v1250_v52 = vld [vmem:[%s5235_s9 + $0x108] sm:$0xff]  ;;  %v1252_v53 = vld [vmem:[%s5235_s9 + $0x118] sm:$0xff] }
 0x7a0   :  { %3101 = vmatpush1.bf16.msra.mxu0 %v3100_v60  ;;  %v1220_v60 = vld [vmem:[%s5235_s9 + $0x18] sm:$0xff] }
 0x7a1   :  { %3103 = vmatprep.subr.bf16.mxu0 %v3102_v62  ;;  %v1217_v62 = vld [vmem:[%s5235_s9] sm:$0xff]  ;;  %v3134_v63 = vpack.c.bf16 %v1220_v60, %v1218_v59  ;;  %v1256_v59 = vld [vmem:[%s5235_s9 + $0x138] sm:$0xff]  ;;  %v3168_v60 = vpack.c.bf16 %v1251_v57, %v1249_v56 }
 0x7a2   :  { %v1401_v57 = vld [vmem:[#allocation5 + $0x488] sm:$0xff] }
 0x7a3   :  { %3135 = vmatprep.subr.bf16.mxu1 %v3134_v63  ;;  %v1253_v63 = vld [vmem:[%s5235_s9 + $0x120] sm:$0xff] }
 0x7a4   :  { %3105 = vmatpush1.bf16.msra.mxu0 %v3104_v5  ;;  %v3136_v5 = vpack.c.bf16 %v1219_v0, %v1217_v62  ;;  %v1255_v0 = vld [vmem:[%s5235_s9 + $0x130] sm:$0xff] }
 0x7a5   :  { %3107 = vmatprep.subr.bf16.mxu0 %v3106_v7  ;;  %v3138_v7 = vpack.c.bf16 %v1224_v2, %v1222_v1  ;;  %v1258_v1 = vld [vmem:[%s5235_s9 + $0x148] sm:$0xff]  ;;  %v1260_v2 = vld [vmem:[%s5235_s9 + $0x158] sm:$0xff] }
 0x7a6   :  { %3137 = vmatpush1.bf16.msra.mxu1 %v3136_v5  ;;  %v3172_v5 = vpack.c.bf16 %v1255_v0, %v1253_v63  ;;  %v1403_v63 = vld [vmem:[#allocation5 + $0x498] sm:$0xff]  ;;  %v1409_v0 = vld [vmem:[#allocation5 + $0x4c8] sm:$0xff] }
 0x7a7   :  { %3139 = vmatprep.subr.bf16.mxu1 %v3138_v7  ;;  %v3174_v7 = vpack.c.bf16 %v1260_v2, %v1258_v1  ;;  %v3230_v2 = vpack.c.bf16 %v1409_v0, %v1403_v63  ;;  %v1467_v63 = vld [vmem:[#allocation5 + $0x698] sm:$0xff] }
 0x7a8   :  { %3109 = vmatpush1.bf16.msra.mxu0 %v3108_v12  ;;  %v3140_v12 = vpack.c.bf16 %v1223_v9, %v1221_v8  ;;  %v1463_v0 = vld [vmem:[#allocation5 + $0x678] sm:$0xff] }
 0x7a9   :  { %3111 = vmatprep.subr.bf16.mxu0 %v3110_v13  ;;  %v3142_v13 = vpack.c.bf16 %v1228_v11, %v1226_v10  ;;  %v1034_v11 = vld [vmem:[#allocation10] sm:$0x3] }
 0x7aa   :  { %3141 = vmatpush1.bf16.msra.mxu1 %v3140_v12  ;;  %v1035_v12 = vld [vmem:[#allocation11] sm:$0x3] }
 0x7ab   :  { %3143 = vmatprep.subr.bf16.mxu1 %v3142_v13  ;;  %v1063_v13 = vrot.slane %v1034_v11, %v4061_v23 }
 0x7ac   :  { %3113 = vmatpush1.bf16.msra.mxu0 %v3112_v15  ;;  %v1230_v15 = vld [vmem:[%s5235_s9 + $0x68] sm:$0xff] }
 0x823   :  { %v1039_v17 = vpop.xlane.xlu0 %1038 }
 0x824   :  { %v1041_v18 = vmul.f32 0.0052083335, %v1039_v17  ;;  %v1232_v17 = vld [vmem:[%s5235_s9 + $0x78] sm:$0xff] }
 0x826   :  { %v4401_v19 = vsub.f32 %v1032_v27, %v1041_v18  ;;  %v4404_v21 = vsub.f32 %v4312_v35, %v1041_v18  ;;  %v3114_v35 = vpack.c.bf16 %v1112_v31, %v1110_v30  ;;  %v1109_v27 = vld [vmem:[%s5233_s7 + $0xe0] sm:$0xff]  ;;  %v3144_v18 = vpack.c.bf16 %v1227_v24, %v1225_v14  ;;  %v1236_v30 = vld [vmem:[%s5235_s9 + $0x98] sm:$0xff] }
 0x827   :  { %v3116_v37 = vpack.c.bf16 %v1111_v36, %v1109_v27  ;;  %v1233_v27 = vld [vmem:[%s5235_s9 + $0x80] sm:$0xff]  ;;  %v1235_v36 = vld [vmem:[%s5235_s9 + $0x90] sm:$0xff]  ;;  %v1059_v14 = vrot.slane %v1034_v11, %v4066_v25 }
 0x828   :  { %v1044_v26 = vmul.f32 %v4401_v19, %v4401_v19  ;;  %v1045_v34 = vmul.f32 %v4404_v21, %v4404_v21  ;;  %3115 = vmatprep.subr.bf16.mxu0 %v3114_v35  ;;  %3145 = vmatpush1.bf16.msra.mxu1 %v3144_v18  ;;  %v3152_v38 = vpack.c.bf16 %v1235_v36, %v1233_v27  ;;  %v1264_v27 = vld [vmem:[%s5235_s9 + $0x178] sm:$0xff]  ;;  %v1412_v11 = vld [vmem:[#allocation5 + $0x4e0] sm:$0xff] }
 0x829   :  { %3117 = vmatpush1.bf16.msra.mxu0 %v3116_v37  ;;  %v1238_v37 = vld [vmem:[%s5235_s9 + $0xa8] sm:$0xff] }
 0x82a   :  { %v1046_v28 = vsel %vm357_vm0, %v1045_v34, 0.0  ;;  %3119 = vmatprep.subr.bf16.mxu0 %v3118_v39  ;;  %v1229_v34 = vld [vmem:[%s5235_s9 + $0x60] sm:$0xff]  ;;  %v3154_v32 = vpack.c.bf16 %v1240_v33, %v1238_v37  ;;  %v1263_v33 = vld [vmem:[%s5235_s9 + $0x170] sm:$0xff] }
 0x82b   :  { %v1047_v29 = vadd.f32 %v1046_v28, %v1044_v26  ;;  %v3146_v26 = vpack.c.bf16 %v1232_v17, %v1230_v15  ;;  %v1231_v28 = vld [vmem:[%s5235_s9 + $0x70] sm:$0xff]  ;;  %v1237_v39 = vld [vmem:[%s5235_s9 + $0xa0] sm:$0xff]  ;;  %v1076_v17 = vrot.slane %v1035_v12, %v4061_v23 }
 0x82c   :  { %v3148_v31 = vpack.c.bf16 %v1231_v28, %v1229_v34  ;;  %v1261_v37 = vld [vmem:[%s5235_s9 + $0x160] sm:$0xff] }
 0x82d   :  { %1048 = vadd.xlane.f32.xlu1 %v1047_v29  ;;  %3121 = vmatpush1.bf16.msra.mxu0 %v3120_v42  ;;  %v1234_v29 = vld [vmem:[%s5235_s9 + $0x88] sm:$0xff]  ;;  %v3156_v42 = vpack.c.bf16 %v1239_v16, %v1237_v39 }
 0x82e   :  { %3123 = vmatprep.subr.bf16.mxu0 %v3122_v43  ;;  %3147 = vmatprep.subr.bf16.mxu1 %v3146_v26  ;;  %v3150_v35 = vpack.c.bf16 %v1236_v30, %v1234_v29  ;;  %v3158_v43 = vpack.c.bf16 %v1244_v41, %v1242_v40  ;;  %v1072_v26 = vrot.slane %v1035_v12, %v4066_v25  ;;  %v1418_v12 = vld [vmem:[#allocation5 + $0x510] sm:$0xff] }
 0x82f   :  { %3149 = vmatpush1.bf16.msra.mxu1 %v3148_v31  ;;  %v1257_v31 = vld [vmem:[%s5235_s9 + $0x140] sm:$0xff] }
 0x830   :  { %3151 = vmatprep.subr.bf16.mxu1 %v3150_v35 }
 0x831   :  { %3125 = vmatpush1.bf16.msra.mxu0 %v3124_v48  ;;  %v3160_v48 = vpack.c.bf16 %v1243_v45, %v1241_v44 }
 0x832   :  { %3127 = vmatprep.subr.bf16.mxu0 %v3126_v49  ;;  %v3162_v49 = vpack.c.bf16 %v1248_v47, %v1246_v46  ;;  %v1265_v46 = vld [vmem:[#allocation14] sm:$0x3] }
 0x833   :  { %3153 = vmatpush1.bf16.msra.mxu1 %v3152_v38  ;;  %v3180_v38 = vpack.c.bf16 %v1263_v33, %v1261_v37  ;;  %v1270_v47 = vrot.slane %v1265_v46, %v4066_v25 }
 0x834   :  { %3155 = vmatprep.subr.bf16.mxu1 %v3154_v32  ;;  %v1129_v32 = vld [vmem:[#allocation13] sm:$0x3] }
 0x835   :  { %3129 = vmatpush1.bf16.msra.mxu0 %v3128_v54  ;;  %v3164_v54 = vpack.c.bf16 %v1247_v51, %v1245_v50  ;;  %v1134_v39 = vrot.slane %v1129_v32, %v4066_v25  ;;  %v1138_v16 = vrot.slane %v1129_v32, %v4061_v23  ;;  %v1443_v32 = vld [vmem:[#allocation5 + $0x5d8] sm:$0xff] }
 0x836   :  { %3131 = vmatprep.subr.bf16.mxu0 %v3130_v55  ;;  %v3166_v55 = vpack.c.bf16 %v1252_v53, %v1250_v52 }
 0x837   :  { %3157 = vmatpush1.bf16.msra.mxu1 %v3156_v42 }
 0x838   :  { %3159 = vmatprep.subr.bf16.mxu1 %v3158_v43 }
 0x839   :  { %3133 = vmatpush1.bf16.msra.mxu0 %v3132_v58  ;;  %v1254_v58 = vld [vmem:[%s5235_s9 + $0x128] sm:$0xff] }
 0x83a   :  { %v3170_v62 = vpack.c.bf16 %v1256_v59, %v1254_v58  ;;  %v1407_v58 = vld [vmem:[#allocation5 + $0x4b8] sm:$0xff]  ;;  %v1400_v59 = vld [vmem:[#allocation5 + $0x480] sm:$0xff] }
 0x83b   :  { %3161 = vmatpush1.bf16.msra.mxu1 %v3160_v48  ;;  %v1274_v48 = vrot.slane %v1265_v46, %v4061_v23  ;;  %v1444_v46 = vld [vmem:[#allocation5 + $0x5e0] sm:$0xff] }
 0x83c   :  { %3163 = vmatprep.subr.bf16.mxu1 %v3162_v49 }
 0x83f   :  { %3165 = vmatpush1.bf16.msra.mxu1 %v3164_v54 }
 0x840   :  { %3167 = vmatprep.subr.bf16.mxu1 %v3166_v55 }
 0x843   :  { %3169 = vmatpush1.bf16.msra.mxu1 %v3168_v60  ;;  %v3182_v60 = vpack.c.bf16 %v1407_v58, %v1401_v57  ;;  %v1454_v57 = vld [vmem:[#allocation5 + $0x630] sm:$0xff] }
 0x844   :  { %3171 = vmatprep.subr.bf16.mxu1 %v3170_v62  ;;  %v1406_v62 = vld [vmem:[#allocation5 + $0x4b0] sm:$0xff] }
 0x845   :  { %v3184_v1 = vpack.c.bf16 %v1406_v62, %v1400_v59  ;;  %3183 = vmatprep.subr.bf16.mxu0 %v3182_v60  ;;  %v1450_v58 = vld [vmem:[#allocation5 + $0x610] sm:$0xff]  ;;  %v1456_v60 = vld [vmem:[#allocation5 + $0x640] sm:$0xff]  ;;  %v1461_v62 = vld [vmem:[#allocation5 + $0x668] sm:$0xff] }
 0x847   :  { %3173 = vmatpush1.bf16.msra.mxu1 %v3172_v5  ;;  %v1402_v5 = vld [vmem:[#allocation5 + $0x490] sm:$0xff] }
 0x848   :  { %3175 = vmatprep.subr.bf16.mxu1 %v3174_v7  ;;  %v1408_v7 = vld [vmem:[#allocation5 + $0x4c0] sm:$0xff] }
 0x8ba   :  { %v1049_v8 = vpop.xlane.xlu1 %1048 }
 0x8bb   :  { %v1050_v9 = vmul.f32 0.0052083335, %v1049_v8  ;;  %v1413_v8 = vld [vmem:[#allocation5 + $0x4e8] sm:$0xff] }
 0x8bd   :  { %v1051_v10 = vadd.f32 1e-05, %v1050_v9  ;;  %v3232_v9 = vpack.c.bf16 %v1408_v7, %v1402_v5  ;;  %v3248_v5 = vpack.c.bf16 %v1456_v60, %v1450_v58  ;;  %v3202_v7 = vpack.c.bf16 %v1467_v63, %v1461_v62  ;;  %v1505_v58 = vld [vmem:[#allocation5 + $0x7c8] sm:$0xff]  ;;  %v1504_v60 = vld [vmem:[#allocation5 + $0x7c0] sm:$0xff] }
 0x8bf   :  { %3513 = vrsqrt.f32 %v1051_v10  ;;  %v1419_v10 = vld [vmem:[#allocation5 + $0x518] sm:$0xff] }
 0x8c9   :  { %v3514_v24 = vpop.eup %3513 }
 0x8ca   :  { %v1054_v15 = vmul.f32 %v3514_v24, %v4404_v21  ;;  %v1053_v18 = vmul.f32 %v3514_v24, %v4401_v19  ;;  %v1259_v21 = vld [vmem:[%s5235_s9 + $0x150] sm:$0xff]  ;;  %v1262_v19 = vld [vmem:[%s5235_s9 + $0x168] sm:$0xff] }
 0x8cb   :  { %v3176_v35 = vpack.c.bf16 %v1259_v21, %v1257_v31  ;;  %v3178_v36 = vpack.c.bf16 %v1264_v27, %v1262_v19  ;;  %v1415_v24 = vld [vmem:[#allocation5 + $0x4f8] sm:$0xff]  ;;  %v1424_v31 = vld [vmem:[#allocation5 + $0x540] sm:$0xff]  ;;  %v1430_v21 = vld [vmem:[#allocation5 + $0x570] sm:$0xff] }
 0x8cc   :  { %v1067_v34 = vmul.f32 %v1063_v13, %v1054_v15  ;;  %v1066_v28 = vmul.f32 %v1059_v14, %v1053_v18  ;;  %v3186_v13 = vpack.c.bf16 %v1419_v10, %v1413_v8  ;;  %v3188_v14 = vpack.c.bf16 %v1418_v12, %v1412_v11  ;;  %v1421_v15 = vld [vmem:[#allocation5 + $0x528] sm:$0xff]  ;;  %v1426_v27 = vld [vmem:[#allocation5 + $0x550] sm:$0xff]  ;;  %v1460_v8 = vld [vmem:[#allocation5 + $0x660] sm:$0xff] }
 0x8cd   :  { %3177 = vmatpush1.bf16.msra.mxu1 %v3176_v35  ;;  %v3234_v18 = vpack.c.bf16 %v1421_v15, %v1415_v24  ;;  %v1427_v35 = vld [vmem:[#allocation5 + $0x558] sm:$0xff]  ;;  %v1433_v19 = vld [vmem:[#allocation5 + $0x588] sm:$0xff]  ;;  %v3192_v37 = vpack.c.bf16 %v1430_v21, %v1424_v31  ;;  %v1462_v10 = vld [vmem:[#allocation5 + $0x670] sm:$0xff] }
 0x8ce   :  { %v1080_v29 = vadd.f32 %v1076_v17, %v1067_v34  ;;  %v1079_v30 = vadd.f32 %v1072_v26, %v1066_v28  ;;  %3179 = vmatprep.subr.bf16.mxu1 %v3178_v36  ;;  %v1414_v17 = vld [vmem:[#allocation5 + $0x4f0] sm:$0xff]  ;;  %v1420_v26 = vld [vmem:[#allocation5 + $0x520] sm:$0xff]  ;;  %v1425_v34 = vld [vmem:[#allocation5 + $0x548] sm:$0xff]  ;;  %v3238_v33 = vpack.c.bf16 %v1433_v19, %v1427_v35 }
 0x8cf   :  { %v1431_v28 = vld [vmem:[#allocation5 + $0x578] sm:$0xff]  ;;  %v1432_v36 = vld [vmem:[#allocation5 + $0x580] sm:$0xff]  ;;  %v1481_v15 = vld [vmem:[#allocation5 + $0x708] sm:$0xff] }
 0x8d0   :  { %2653 = vmatprep.mubr.msk.f32.mxu0 %vm357_vm0, %v1080_v29  ;;  %v1468_v12 = vld [vmem:[#allocation5 + $0x6a0] sm:$0xff]  ;;  %v1475_v24 = vld [vmem:[#allocation5 + $0x6d8] sm:$0xff] }
 0x8d1   :  { %1209 = vmatmul.mubr.f32.vlgmr.msra.gmra.mrb[12].mxu0 %v1079_v30  ;;  %3181 = vmatpush1.bf16.msra.mxu1 %v3180_v38  ;;  %v1437_v38 = vld [vmem:[#allocation5 + $0x5a8] sm:$0xff]  ;;  %v1480_v31 = vld [vmem:[#allocation5 + $0x700] sm:$0xff] }
 0x8d2   :  { %3185 = vmatpush1.bf16.msra.mxu0 %v3184_v1  ;;  %3231 = vmatprep.subr.bf16.mxu1 %v3230_v2  ;;  %v1469_v1 = vld [vmem:[#allocation5 + $0x6a8] sm:$0xff] }
 0x8d3   :  { %3187 = vmatprep.subr.bf16.mxu0 %v3186_v13  ;;  %v3250_v11 = vpack.c.bf16 %v1469_v1, %v1463_v0  ;;  %v1473_v13 = vld [vmem:[#allocation5 + $0x6c8] sm:$0xff]  ;;  %v1515_v1 = vld [vmem:[#allocation5 + $0x818] sm:$0xff] }
 0x8d4   :  { %v1509_v0 = vld [vmem:[#allocation5 + $0x7e8] sm:$0xff] }
 0x8d6   :  { %3189 = vmatpush1.bf16.msra.mxu0 %v3188_v14  ;;  %v1479_v14 = vld [vmem:[#allocation5 + $0x6f8] sm:$0xff] }
 0x9a4   :  { %v1210_v40 = vpop.f32.mrb[12].mxu0 }
 0x9a5   :  { %v1211_v41 = vadd.f32 %v1210_v40, %v1134_v39  ;;  %v1212_v42 = vpop.f32.mrb[13].mxu0  ;;  %v1436_v39 = vld [vmem:[#allocation5 + $0x5a0] sm:$0xff]  ;;  %v3194_v40 = vpack.c.bf16 %v1443_v32, %v1437_v38 }
 0x9a6   :  { %v1213_v43 = vadd.f32 %v1212_v42, %v1138_v16  ;;  %v3240_v16 = vpack.c.bf16 %v1432_v36, %v1426_v27  ;;  %v1439_v42 = vld [vmem:[#allocation5 + $0x5b8] sm:$0xff] }
 0x9a7   :  { %v1215_v45 = vmax.f32 %v1211_v41, 0.0  ;;  %v1442_v41 = vld [vmem:[#allocation5 + $0x5d0] sm:$0xff] }
 0x9a8   :  { %v1216_v44 = vmax.f32 %v1213_v43, 0.0  ;;  %v1445_v43 = vld [vmem:[#allocation5 + $0x5e8] sm:$0xff] }
 0x9aa   :  { %2654 = vmatprep.mubr.msk.f32.mxu1 %vm357_vm0, %v1216_v44  ;;  %v3242_v44 = vpack.c.bf16 %v1445_v43, %v1439_v42  ;;  %v1484_v42 = vld [vmem:[#allocation5 + $0x720] sm:$0xff]  ;;  %v1490_v43 = vld [vmem:[#allocation5 + $0x750] sm:$0xff] }
 0x9ab   :  { %1345 = vmatmul.mubr.f32.vlgmr.msra.gmra.mrb[4].mxu1 %v1215_v45  ;;  %v1438_v45 = vld [vmem:[#allocation5 + $0x5b0] sm:$0xff] }
 0x9ac   :  { %3233 = vmatpush1.bf16.msra.mxu1 %v3232_v9  ;;  %v1466_v9 = vld [vmem:[#allocation5 + $0x690] sm:$0xff] }
 0x9ad   :  { %3235 = vmatprep.subr.bf16.mxu1 %v3234_v18  ;;  %v3252_v18 = vpack.c.bf16 %v1468_v12, %v1462_v10  ;;  %v1510_v12 = vld [vmem:[#allocation5 + $0x7f0] sm:$0xff] }
 0xa7e   :  { %v1346_v49 = vpop.f32.mrb[4].mxu1 }
 0xa7f   :  { %v1347_v50 = vadd.f32 %v1346_v49, %v1270_v47  ;;  %v1348_v51 = vpop.f32.mrb[5].mxu1  ;;  %v1449_v47 = vld [vmem:[#allocation5 + $0x608] sm:$0xff]  ;;  %v3196_v49 = vpack.c.bf16 %v1442_v41, %v1436_v39 }
 0xa80   :  { %v1349_v52 = vadd.f32 %v1348_v51, %v1274_v48  ;;  %v1455_v48 = vld [vmem:[#allocation5 + $0x638] sm:$0xff]  ;;  %v1457_v51 = vld [vmem:[#allocation5 + $0x648] sm:$0xff] }
 0xa81   :  { %v4629_v54 = vadd.f32 %v1347_v50, %v1079_v30  ;;  %v3190_v30 = vpack.c.bf16 %v1431_v28, %v1425_v34  ;;  %v1451_v50 = vld [vmem:[#allocation5 + $0x618] sm:$0xff]  ;;  %v1472_v34 = vld [vmem:[#allocation5 + $0x6c0] sm:$0xff]  ;;  %v1478_v28 = vld [vmem:[#allocation5 + $0x6f0] sm:$0xff] }
 0xa82   :  { %v4627_v53 = vadd.f32 %v1349_v52, %v1080_v29  ;;  %v3236_v29 = vpack.c.bf16 %v1420_v26, %v1414_v17  ;;  %v3244_v52 = vpack.c.bf16 %v1444_v46, %v1438_v45  ;;  %v3246_v59 = vpack.c.bf16 %v1457_v51, %v1451_v50  ;;  %v1493_v45 = vld [vmem:[#allocation5 + $0x768] sm:$0xff]  ;;  %v1492_v46 = vld [vmem:[#allocation5 + $0x760] sm:$0xff]  ;;  %v1503_v50 = vld [vmem:[#allocation5 + $0x7b8] sm:$0xff] }
 0xa83   :  { %3191 = vmatprep.subr.bf16.mxu0 %v3190_v30  ;;  %v3204_v17 = vpack.c.bf16 %v1466_v9, %v1460_v8  ;;  %v3206_v26 = vpack.c.bf16 %v1479_v14, %v1473_v13  ;;  %v1474_v30 = vld [vmem:[#allocation5 + $0x6d0] sm:$0xff]  ;;  %v3208_v21 = vpack.c.bf16 %v1478_v28, %v1472_v34  ;;  %v1511_v8 = vld [vmem:[#allocation5 + $0x7f8] sm:$0xff]  ;;  %v1517_v9 = vld [vmem:[#allocation5 + $0x828] sm:$0xff] }
 0xa84   :  { %v1355_v55 = vsel %vm357_vm0, %v4627_v53, 0.0  ;;  %3237 = vmatpush1.bf16.msra.mxu1 %v3236_v29  ;;  %3193 = vmatpush1.bf16.msra.mxu0 %v3192_v37  ;;  %v3254_v29 = vpack.c.bf16 %v1481_v15, %v1475_v24  ;;  %v3256_v35 = vpack.c.bf16 %v1480_v31, %v1474_v30  ;;  %v1516_v13 = vld [vmem:[#allocation5 + $0x820] sm:$0xff]  ;;  %v1521_v14 = vld [vmem:[#allocation5 + $0x848] sm:$0xff]  ;;  %v1527_v15 = vld [vmem:[#allocation5 + $0x878] sm:$0xff] }
 0xa85   :  { %v1356_v56 = vadd.f32 %v1355_v55, %v4629_v54  ;;  %3239 = vmatprep.subr.bf16.mxu1 %v3238_v33  ;;  %3195 = vmatprep.subr.bf16.mxu0 %v3194_v40  ;;  %v3198_v55 = vpack.c.bf16 %v1455_v48, %v1449_v47  ;;  %v1491_v40 = vld [vmem:[#allocation5 + $0x758] sm:$0xff]  ;;  %v3268_v24 = vpack.c.bf16 %v1516_v13, %v1510_v12  ;;  %v1529_v28 = vld [vmem:[#allocation5 + $0x888] sm:$0xff] }
 0xa86   :  { %v1523_v34 = vld [vmem:[#allocation5 + $0x858] sm:$0xff] }
 0xa87   :  { %1357 = vadd.xlane.f32.xlu0 %v1356_v56  ;;  %v1448_v56 = vld [vmem:[#allocation5 + $0x600] sm:$0xff]  ;;  %v3270_v31 = vpack.c.bf16 %v1529_v28, %v1523_v34  ;;  %v1446_v28 = vld [vmem:[#allocation5 + $0x5f0] sm:$0xff] }
 0xa88   :  { %3241 = vmatpush1.bf16.msra.mxu1 %v3240_v16  ;;  %3197 = vmatpush1.bf16.msra.mxu0 %v3196_v49  ;;  %v3200_v2 = vpack.c.bf16 %v1454_v57, %v1448_v56  ;;  %v1485_v16 = vld [vmem:[#allocation5 + $0x728] sm:$0xff]  ;;  %v1499_v56 = vld [vmem:[#allocation5 + $0x798] sm:$0xff]  ;;  %v1440_v34 = vld [vmem:[#allocation5 + $0x5c0] sm:$0xff] }
 0xa89   :  { %3243 = vmatprep.subr.bf16.mxu1 %v3242_v44  ;;  %3199 = vmatprep.subr.bf16.mxu0 %v3198_v55  ;;  %v3210_v41 = vpack.c.bf16 %v1491_v40, %v1485_v16  ;;  %v3212_v44 = vpack.c.bf16 %v1490_v43, %v1484_v42  ;;  %v1497_v49 = vld [vmem:[#allocation5 + $0x788] sm:$0xff]  ;;  %v1502_v55 = vld [vmem:[#allocation5 + $0x7b0] sm:$0xff]  ;;  %v3262_v62 = vpack.c.bf16 %v1505_v58, %v1499_v56  ;;  %v1540_v42 = vld [vmem:[#allocation5 + $0x8e0] sm:$0xff] }
 0xa8a   :  { %v3214_v51 = vpack.c.bf16 %v1503_v50, %v1497_v49  ;;  %v1541_v16 = vld [vmem:[#allocation5 + $0x8e8] sm:$0xff]  ;;  %v1353_v49 = vld [vmem:[#allocation16] sm:$0x3]  ;;  %v1354_v50 = vld [vmem:[#allocation17] sm:$0x3] }
 0xa8c   :  { %3245 = vmatpush1.bf16.msra.mxu1 %v3244_v52  ;;  %3201 = vmatpush1.bf16.msra.mxu0 %v3200_v2  ;;  %v1496_v52 = vld [vmem:[#allocation5 + $0x780] sm:$0xff] }
 0xa8d   :  { %3247 = vmatprep.subr.bf16.mxu1 %v3246_v59  ;;  %3203 = vmatprep.subr.bf16.mxu0 %v3202_v7  ;;  %v3216_v57 = vpack.c.bf16 %v1502_v55, %v1496_v52  ;;  %v1498_v59 = vld [vmem:[#allocation5 + $0x790] sm:$0xff]  ;;  %v1508_v2 = vld [vmem:[#allocation5 + $0x7e0] sm:$0xff]  ;;  %v1377_v52 = vrot.slane %v1353_v49, %v4066_v25 }
 0xa8e   :  { %v3264_v63 = vpack.c.bf16 %v1504_v60, %v1498_v59  ;;  %v1514_v7 = vld [vmem:[#allocation5 + $0x810] sm:$0xff]  ;;  %v1390_v59 = vrot.slane %v1354_v50, %v4066_v25  ;;  %v1404_v60 = vld [vmem:[#allocation5 + $0x4a0] sm:$0xff] }
 0xa8f   :  { %v3220_v10 = vpack.c.bf16 %v1514_v7, %v1508_v2  ;;  %v1423_v2 = vld [vmem:[#allocation5 + $0x538] sm:$0xff] }
 0xa90   :  { %3249 = vmatpush1.bf16.msra.mxu1 %v3248_v5  ;;  %3205 = vmatpush1.bf16.msra.mxu0 %v3204_v17  ;;  %v3218_v5 = vpack.c.bf16 %v1515_v1, %v1509_v0  ;;  %v1520_v17 = vld [vmem:[#allocation5 + $0x840] sm:$0xff]  ;;  %v1417_v1 = vld [vmem:[#allocation5 + $0x508] sm:$0xff] }
 0xa91   :  { %3251 = vmatprep.subr.bf16.mxu1 %v3250_v11  ;;  %3207 = vmatprep.subr.bf16.mxu0 %v3206_v26  ;;  %v3266_v11 = vpack.c.bf16 %v1517_v9, %v1511_v8  ;;  %v3222_v26 = vpack.c.bf16 %v1527_v15, %v1521_v14  ;;  %v3282_v9 = vpack.c.bf16 %v1423_v2, %v1417_v1  ;;  %v1428_v14 = vld [vmem:[#allocation5 + $0x560] sm:$0xff]  ;;  %v1441_v15 = vld [vmem:[#allocation5 + $0x5c8] sm:$0xff]  ;;  %v1531_v2 = vld [vmem:[#allocation5 + $0x898] sm:$0xff] }
 0xa92   :  { %v1525_v1 = vld [vmem:[#allocation5 + $0x868] sm:$0xff] }
 0xa94   :  { %3253 = vmatpush1.bf16.msra.mxu1 %v3252_v18  ;;  %3209 = vmatpush1.bf16.msra.mxu0 %v3208_v21  ;;  %v1526_v18 = vld [vmem:[#allocation5 + $0x870] sm:$0xff]  ;;  %v1528_v21 = vld [vmem:[#allocation5 + $0x880] sm:$0xff] }
 0xa95   :  { %3255 = vmatprep.subr.bf16.mxu1 %v3254_v29  ;;  %3211 = vmatprep.subr.bf16.mxu0 %v3210_v41  ;;  %v1522_v29 = vld [vmem:[#allocation5 + $0x850] sm:$0xff]  ;;  %v3224_v30 = vpack.c.bf16 %v1526_v18, %v1520_v17  ;;  %v1447_v17 = vld [vmem:[#allocation5 + $0x5f8] sm:$0xff] }
 0xa96   :  { %v1534_v41 = vld [vmem:[#allocation5 + $0x8b0] sm:$0xff] }
 0xa98   :  { %3257 = vmatpush1.bf16.msra.mxu1 %v3256_v35  ;;  %3213 = vmatpush1.bf16.msra.mxu0 %v3212_v44  ;;  %v1533_v35 = vld [vmem:[#allocation5 + $0x8a8] sm:$0xff] }
 0xa99   :  { %3215 = vmatprep.subr.bf16.mxu0 %v3214_v51  ;;  %v1405_v44 = vld [vmem:[#allocation5 + $0x4a8] sm:$0xff]  ;;  %v1381_v51 = vrot.slane %v1353_v49, %v4061_v23  ;;  %v1494_v49 = vld [vmem:[#allocation5 + $0x770] sm:$0xff] }
 0xa9c   :  { %3217 = vmatpush1.bf16.msra.mxu0 %v3216_v57  ;;  %v1394_v57 = vrot.slane %v1354_v50, %v4061_v23  ;;  %v1501_v50 = vld [vmem:[#allocation5 + $0x7a8] sm:$0xff] }
 0xa9d   :  { %3219 = vmatprep.subr.bf16.mxu0 %v3218_v5 }
 0xaa0   :  { %3221 = vmatpush1.bf16.msra.mxu0 %v3220_v10  ;;  %v1416_v10 = vld [vmem:[#allocation5 + $0x500] sm:$0xff] }
 0xaa1   :  { %3223 = vmatprep.subr.bf16.mxu0 %v3222_v26  ;;  %v3290_v26 = vpack.c.bf16 %v1447_v17, %v1441_v15  ;;  %v1545_v17 = vld [vmem:[#allocation7 + $0x6] sm:$0x3f] }
 0xaa4   :  { %3225 = vmatpush1.bf16.msra.mxu0 %v3224_v30  ;;  %v1459_v30 = vld [vmem:[#allocation5 + $0x658] sm:$0xff] }
 0xb14   :  { %v1358_v19 = vpop.xlane.xlu0 %1357 }
 0xb15   :  { %v1359_v27 = vmul.f32 0.0052083335, %v1358_v19  ;;  %v1539_v19 = vld [vmem:[#allocation5 + $0x8d8] sm:$0xff] }
 0xb17   :  { %v4635_v36 = vsub.f32 %v4629_v54, %v1359_v27  ;;  %v4638_v37 = vsub.f32 %v4627_v53, %v1359_v27  ;;  %v1487_v54 = vld [vmem:[#allocation5 + $0x738] sm:$0xff]  ;;  %v1486_v53 = vld [vmem:[#allocation5 + $0x730] sm:$0xff]  ;;  %v3226_v27 = vpack.c.bf16 %v1539_v19, %v1533_v35  ;;  %v1452_v35 = vld [vmem:[#allocation5 + $0x620] sm:$0xff] }
 0xb18   :  { %v3258_v47 = vpack.c.bf16 %v1493_v45, %v1487_v54  ;;  %v3260_v48 = vpack.c.bf16 %v1492_v46, %v1486_v53  ;;  %v3276_v54 = vpack.c.bf16 %v1540_v42, %v1534_v41  ;;  %v1411_v45 = vld [vmem:[#allocation5 + $0x4d8] sm:$0xff]  ;;  %v1458_v19 = vld [vmem:[#allocation5 + $0x650] sm:$0xff] }
 0xb19   :  { %v1362_v33 = vmul.f32 %v4635_v36, %v4635_v36  ;;  %v1363_v38 = vmul.f32 %v4638_v37, %v4638_v37  ;;  %3227 = vmatprep.subr.bf16.mxu0 %v3226_v27  ;;  %v3278_v53 = vpack.c.bf16 %v1411_v45, %v1405_v44  ;;  %v1465_v27 = vld [vmem:[#allocation5 + $0x688] sm:$0xff]  ;;  %v1483_v41 = vld [vmem:[#allocation5 + $0x718] sm:$0xff]  ;;  %v1482_v44 = vld [vmem:[#allocation5 + $0x710] sm:$0xff] }
 0xb1a   :  { %3259 = vmatprep.subr.bf16.mxu1 %v3258_v47  ;;  %v1489_v45 = vld [vmem:[#allocation5 + $0x748] sm:$0xff] }
 0xb1b   :  { %v1364_v32 = vsel %vm357_vm0, %v1363_v38, 0.0  ;;  %3261 = vmatpush1.bf16.msra.mxu1 %v3260_v48  ;;  %v1538_v38 = vld [vmem:[#allocation5 + $0x8d0] sm:$0xff] }
 0xb1c   :  { %v1365_v39 = vadd.f32 %v1364_v32, %v1362_v33  ;;  %3263 = vmatprep.subr.bf16.mxu1 %v3262_v62  ;;  %v1532_v33 = vld [vmem:[#allocation5 + $0x8a0] sm:$0xff]  ;;  %v1535_v32 = vld [vmem:[#allocation5 + $0x8b8] sm:$0xff]  ;;  %v1410_v62 = vld [vmem:[#allocation5 + $0x4d0] sm:$0xff] }
 0xb1d   :  { %v3274_v40 = vpack.c.bf16 %v1541_v16, %v1535_v32  ;;  %v3228_v43 = vpack.c.bf16 %v1538_v38, %v1532_v33  ;;  %v3280_v8 = vpack.c.bf16 %v1410_v62, %v1404_v60  ;;  %v1471_v33 = vld [vmem:[#allocation5 + $0x6b8] sm:$0xff]  ;;  %v3296_v38 = vpack.c.bf16 %v1458_v19, %v1452_v35  ;;  %v1470_v16 = vld [vmem:[#allocation5 + $0x6b0] sm:$0xff] }
 0xb1e   :  { %1366 = vadd.xlane.f32.xlu1 %v1365_v39  ;;  %v3272_v39 = vpack.c.bf16 %v1528_v21, %v1522_v29  ;;  %v1453_v29 = vld [vmem:[#allocation5 + $0x628] sm:$0xff]  ;;  %v3298_v32 = vpack.c.bf16 %v1471_v33, %v1465_v27 }
 0xb1f   :  { %3265 = vmatpush1.bf16.msra.mxu1 %v3264_v63  ;;  %3229 = vmatpush1.bf16.msra.mxu0 %v3228_v43  ;;  %v3294_v21 = vpack.c.bf16 %v1459_v30, %v1453_v29 }
 0xb20   :  { %3267 = vmatprep.subr.bf16.mxu1 %v3266_v11  ;;  %3279 = vmatprep.subr.bf16.mxu0 %v3278_v53  ;;  %v1435_v11 = vld [vmem:[#allocation5 + $0x598] sm:$0xff] }
 0xb21   :  { %v1495_v53 = vld [vmem:[#allocation5 + $0x778] sm:$0xff] }
 0xb23   :  { %3269 = vmatpush1.bf16.msra.mxu1 %v3268_v24  ;;  %v1434_v24 = vld [vmem:[#allocation5 + $0x590] sm:$0xff] }
 0xb24   :  { %3271 = vmatprep.subr.bf16.mxu1 %v3270_v31  ;;  %v3288_v18 = vpack.c.bf16 %v1434_v24, %v1428_v14  ;;  %v3292_v31 = vpack.c.bf16 %v1446_v28, %v1440_v34  ;;  %v1536_v14 = vld [vmem:[#allocation5 + $0x8c0] sm:$0xff]  ;;  %v1542_v24 = vld [vmem:[#allocation5 + $0x8f0] sm:$0xff]  ;;  %v1550_v28 = vrot.slane %v1545_v17, %v4066_v25 }
 0xb25   :  { %v3324_v15 = vpack.c.bf16 %v1542_v24, %v1536_v14  ;;  %v2668_v14 = vld [vmem:[%s5229_s3 + $0x240] sm:$0xff]  ;;  %v2670_v24 = vld [vmem:[%s5229_s3 + $0x250] sm:$0xff] }
 0xb27   :  { %3273 = vmatpush1.bf16.msra.mxu1 %v3272_v39  ;;  %v1464_v39 = vld [vmem:[#allocation5 + $0x680] sm:$0xff] }
 0xb28   :  { %3275 = vmatprep.subr.bf16.mxu1 %v3274_v40  ;;  %v1477_v40 = vld [vmem:[#allocation5 + $0x6e8] sm:$0xff]  ;;  %v3300_v42 = vpack.c.bf16 %v1470_v16, %v1464_v39 }
 0xb29   :  { %v3302_v43 = vpack.c.bf16 %v1483_v41, %v1477_v40 }
 0xb2b   :  { %3277 = vmatpush1.bf16.msra.mxu1 %v3276_v54  ;;  %v1476_v54 = vld [vmem:[#allocation5 + $0x6e0] sm:$0xff] }
 0xb2c   :  { %2858 = vmatprep.subr.mxu1 %v3801_v20 }
 0xbab   :  { %v1367_v46 = vpop.xlane.xlu1 %1366 }
 0xbac   :  { %v1368_v47 = vmul.f32 0.0052083335, %v1367_v46  ;;  %v3304_v46 = vpack.c.bf16 %v1482_v44, %v1476_v54  ;;  %v1566_v44 = vrot.slane %v1545_v17, %v345_v3 }
 0xbae   :  { %v1369_v48 = vadd.f32 1e-05, %v1368_v47  ;;  %v3306_v47 = vpack.c.bf16 %v1495_v53, %v1489_v45  ;;  %v1562_v53 = vrot.slane %v1545_v17, %v341_v4 }
 0xbb0   :  { %3515 = vrsqrt.f32 %v1369_v48  ;;  %v1488_v48 = vld [vmem:[#allocation5 + $0x740] sm:$0xff] }
 0xbba   :  { %v3516_v55 = vpop.eup %3515 }
 0xbbb   :  { %v1372_v56 = vmul.f32 %v3516_v55, %v4638_v37  ;;  %v1371_v58 = vmul.f32 %v3516_v55, %v4635_v36  ;;  %v1422_v37 = vld [vmem:[#allocation5 + $0x530] sm:$0xff]  ;;  %v1429_v36 = vld [vmem:[#allocation5 + $0x568] sm:$0xff] }
 0xbbc   :  { %v3284_v12 = vpack.c.bf16 %v1422_v37, %v1416_v10  ;;  %v3286_v13 = vpack.c.bf16 %v1435_v11, %v1429_v36  ;;  %v1524_v10 = vld [vmem:[#allocation5 + $0x860] sm:$0xff]  ;;  %v1530_v37 = vld [vmem:[#allocation5 + $0x890] sm:$0xff]  ;;  %v1537_v36 = vld [vmem:[#allocation5 + $0x8c8] sm:$0xff] }
 0xbbd   :  { %v1385_v63 = vmul.f32 %v1381_v51, %v1372_v56  ;;  %v1384_v0 = vmul.f32 %v1377_v52, %v1371_v58  ;;  %v1507_v51 = vld [vmem:[#allocation5 + $0x7d8] sm:$0xff]  ;;  %v3308_v52 = vpack.c.bf16 %v1494_v49, %v1488_v48  ;;  %v1500_v56 = vld [vmem:[#allocation5 + $0x7a0] sm:$0xff]  ;;  %v1513_v58 = vld [vmem:[#allocation5 + $0x808] sm:$0xff]  ;;  %v1570_v48 = vrot.slane %v1545_v17, %v349_v6 }
 0xbbe   :  { %v3310_v55 = vpack.c.bf16 %v1507_v51, %v1501_v50  ;;  %v1543_v11 = vld [vmem:[#allocation5 + $0x8f8] sm:$0xff] }
 0xbbf   :  { %v4652_v5 = vadd.f32 %v1394_v57, %v1385_v63  ;;  %v4654_v7 = vadd.f32 %v1390_v59, %v1384_v0  ;;  %v1506_v57 = vld [vmem:[#allocation5 + $0x7d0] sm:$0xff]  ;;  %v1519_v59 = vld [vmem:[#allocation5 + $0x838] sm:$0xff]  ;;  %v1512_v63 = vld [vmem:[#allocation5 + $0x800] sm:$0xff] }
 0xbc0   :  { %v3312_v60 = vpack.c.bf16 %v1506_v57, %v1500_v56  ;;  %v3314_v62 = vpack.c.bf16 %v1519_v59, %v1513_v58  ;;  %v1518_v0 = vld [vmem:[#allocation5 + $0x830] sm:$0xff] }
 0xbc1   :  { %2655 = vmatprep.mubr.msk.f32.mxu0 %vm357_vm0, %v4652_v5  ;;  %2656 = vmatprep.mubr.msk.f32.mxu1 %vm357_vm0, %v4652_v5 }
 0xbc2   :  { %1645 = vmatmul.mubr.f32.vlgmr.msra.gmra.mrb[14].mxu0 %v4654_v7  ;;  %1716 = vmatmul.mubr.f32.vlgmr.msra.gmra.mrb[6].mxu1 %v4654_v7 }
 0xbc3   :  { %3281 = vmatpush1.bf16.msra.mxu0 %v3280_v8  ;;  %2657 = vmatprep.mubr.msk.f32.mxu0 %vm357_vm0, %v4652_v5  ;;  %v3316_v8 = vpack.c.bf16 %v1518_v0, %v1512_v63  ;;  %v2662_v0 = vld [vmem:[%s5229_s3 + $0x210] sm:$0xff] }
 0xbc4   :  { %3283 = vmatprep.subr.bf16.mxu0 %v3282_v9  ;;  %2860 = vmatprep.mubr.msk.f32.mxu1 %vm3802_vm1, %v3801_v20  ;;  %v3318_v9 = vpack.c.bf16 %v1531_v2, %v1525_v1  ;;  %v2665_v1 = vld [vmem:[%s5229_s3 + $0x228] sm:$0xff]  ;;  %v2667_v2 = vld [vmem:[%s5229_s3 + $0x238] sm:$0xff] }
 0xbc7   :  { %3285 = vmatpush1.bf16.msra.mxu0 %v3284_v12  ;;  %v3320_v12 = vpack.c.bf16 %v1530_v37, %v1524_v10  ;;  %v2664_v10 = vld [vmem:[%s5229_s3 + $0x220] sm:$0xff]  ;;  %v2666_v37 = vld [vmem:[%s5229_s3 + $0x230] sm:$0xff] }
 0xbc8   :  { %3287 = vmatprep.subr.bf16.mxu0 %v3286_v13  ;;  %v3322_v13 = vpack.c.bf16 %v1543_v11, %v1537_v36  ;;  %v2669_v36 = vld [vmem:[%s5229_s3 + $0x248] sm:$0xff]  ;;  %v2671_v11 = vld [vmem:[%s5229_s3 + $0x258] sm:$0xff] }
 0xbcb   :  { %3289 = vmatpush1.bf16.msra.mxu0 %v3288_v18  ;;  %v1554_v18 = vrot.slane %v1545_v17, %v4061_v23 }
 0xbcc   :  { %3291 = vmatprep.subr.bf16.mxu0 %v3290_v26 }
 0xbcf   :  { %3293 = vmatpush1.bf16.msra.mxu0 %v3292_v31  ;;  %v1558_v31 = vrot.slane %v1545_v17, %v337_v61  ;;  %v2675_v17 = vld [vmem:[%s5229_s3 + $0x278] sm:$0xff] }
 0xbd0   :  { %3295 = vmatprep.subr.bf16.mxu0 %v3294_v21 }
 0xbd3   :  { %3297 = vmatpush1.bf16.msra.mxu0 %v3296_v38 }
 0xbd4   :  { %3299 = vmatprep.subr.bf16.mxu0 %v3298_v32 }
 0xbd7   :  { %3301 = vmatpush1.bf16.msra.mxu0 %v3300_v42 }
 0xbd8   :  { %3303 = vmatprep.subr.bf16.mxu0 %v3302_v43 }
 0xbdb   :  { %3305 = vmatpush1.bf16.msra.mxu0 %v3304_v46 }
 0xbdc   :  { %3307 = vmatprep.subr.bf16.mxu0 %v3306_v47 }
 0xbdf   :  { %3309 = vmatpush1.bf16.msra.mxu0 %v3308_v52 }
 0xbe0   :  { %3311 = vmatprep.subr.bf16.mxu0 %v3310_v55 }
 0xbe3   :  { %3313 = vmatpush1.bf16.msra.mxu0 %v3312_v60  ;;  %v2663_v60 = vld [vmem:[%s5229_s3 + $0x218] sm:$0xff] }
 0xbe4   :  { %3315 = vmatprep.subr.bf16.mxu0 %v3314_v62  ;;  %v2660_v62 = vld [vmem:[%s5229_s3 + $0x200] sm:$0xff] }
 0xbe7   :  { %3317 = vmatpush1.bf16.msra.mxu0 %v3316_v8  ;;  %v3328_v8 = vpack.c.bf16 %v2662_v0, %v2660_v62  ;;  %v2703_v62 = vld [vmem:[%s5229_s3 + $0x358] sm:$0xff] }
 0xbe8   :  { %3319 = vmatprep.subr.bf16.mxu0 %v3318_v9  ;;  %v3330_v9 = vpack.c.bf16 %v2667_v2, %v2665_v1  ;;  %v2700_v1 = vld [vmem:[%s5229_s3 + $0x340] sm:$0xff]  ;;  %v2702_v2 = vld [vmem:[%s5229_s3 + $0x350] sm:$0xff] }
 0xbeb   :  { %3321 = vmatpush1.bf16.msra.mxu0 %v3320_v12  ;;  %v3332_v12 = vpack.c.bf16 %v2666_v37, %v2664_v10  ;;  %v3368_v10 = vpack.c.bf16 %v2702_v2, %v2700_v1 }
 0xbec   :  { %3323 = vmatprep.subr.bf16.mxu0 %v3322_v13  ;;  %v3334_v13 = vpack.c.bf16 %v2671_v11, %v2669_v36  ;;  %v2704_v36 = vld [vmem:[%s5229_s3 + $0x360] sm:$0xff]  ;;  %v2706_v11 = vld [vmem:[%s5229_s3 + $0x370] sm:$0xff] }
 0xbef   :  { %3325 = vmatpush1.bf16.msra.mxu0 %v3324_v15  ;;  %v2673_v15 = vld [vmem:[%s5229_s3 + $0x268] sm:$0xff] }
 0xbf2   :  { %1787 = vmatmul.mubr.f32.vlgmr.msra.gmra.mrb[16].mxu0 %v4654_v7 }
 0xc95   :  { %v1646_v26 = vpop.f32.mrb[14].mxu0  ;;  %v1717_v34 = vpop.f32.mrb[6].mxu1 }
 0xc96   :  { %v1648_v29 = vpop.f32.mrb[15].mxu0  ;;  %v1719_v30 = vpop.f32.mrb[7].mxu1  ;;  %v1647_v35 = vadd.f32 %v1646_v26, %v1550_v28  ;;  %v1718_v19 = vadd.f32 %v1717_v34, %v1558_v31  ;;  %v3338_v26 = vpack.c.bf16 %v2675_v17, %v2673_v15  ;;  %v2672_v34 = vld [vmem:[%s5229_s3 + $0x260] sm:$0xff]  ;;  %v2674_v28 = vld [vmem:[%s5229_s3 + $0x270] sm:$0xff] }
 0xc97   :  { %v1649_v21 = vadd.f32 %v1648_v29, %v1554_v18  ;;  %v1720_v49 = vadd.f32 %v1719_v30, %v1562_v53  ;;  %v3336_v18 = vpack.c.bf16 %v2670_v24, %v2668_v14  ;;  %v2677_v29 = vld [vmem:[%s5229_s3 + $0x288] sm:$0xff]  ;;  %v2679_v30 = vld [vmem:[%s5229_s3 + $0x298] sm:$0xff]  ;;  %v3340_v31 = vpack.c.bf16 %v2674_v28, %v2672_v34  ;;  %v2708_v15 = vld [vmem:[%s5229_s3 + $0x380] sm:$0xff] }
 0xc98   :  { %v3372_v14 = vpack.c.bf16 %v2706_v11, %v2704_v36  ;;  %v2710_v17 = vld [vmem:[%s5229_s3 + $0x390] sm:$0xff] }
 0xc99   :  { %2859 = vmatpush3.xpose.msra.mxu1 %v1649_v21  ;;  %v3342_v21 = vpack.c.bf16 %v2679_v30, %v2677_v29  ;;  %v3376_v34 = vpack.c.bf16 %v2710_v17, %v2708_v15  ;;  %v2712_v29 = vld [vmem:[%s5229_s3 + $0x3a0] sm:$0xff]  ;;  %v2714_v30 = vld [vmem:[%s5229_s3 + $0x3b0] sm:$0xff] }
 0xc9a   :  { %2863 = vmatprep.subr.mxu1 %v3801_v20 }
 0xc9c   :  { %2861 = vmatmul.mubr.f32.vlgmr.msra.gmra.mrb[8].mxu1 %v1647_v35  ;;  %v2676_v35 = vld [vmem:[%s5229_s3 + $0x280] sm:$0xff] }
 0xc9d   :  { %2864 = vmatpush3.msra.mxu1 %v1718_v19  ;;  %2865 = vmatprep.mubr.msk.f32.mxu1 %vm3802_vm1, %v3801_v20  ;;  %v2678_v19 = vld [vmem:[%s5229_s3 + $0x290] sm:$0xff] }
 0xc9e   :  { %2868 = vmatprep.subr.mxu1 %v3801_v20 }
 0xcc5   :  { %v1788_v27 = vpop.f32.mrb[16].mxu0 }
 0xcc6   :  { %v1790_v33 = vpop.f32.mrb[17].mxu0  ;;  %v1789_v47 = vadd.f32 %v1788_v27, %v1566_v44  ;;  %v2681_v27 = vld [vmem:[%s5229_s3 + $0x2a8] sm:$0xff] }
 0xcc7   :  { %v1791_v50 = vadd.f32 %v1790_v33, %v1570_v48  ;;  %v2683_v33 = vld [vmem:[%s5229_s3 + $0x2b8] sm:$0xff]  ;;  %v2689_v44 = vld [vmem:[%s5229_s3 + $0x2e8] sm:$0xff]  ;;  %v2690_v48 = vld [vmem:[%s5229_s3 + $0x2f0] sm:$0xff] }
 0xd6f   :  { %v1859_v38 = vpop.f32.mrb[8].mxu1 }
 0xd70   :  { %v1863_v32 = vmul.f32 0.10206208, %v1859_v38  ;;  %v2862_v39 = vpop.f32.mrb[9].mxu1  ;;  %v3344_v38 = vpack.c.bf16 %v2678_v19, %v2676_v35  ;;  %v3380_v35 = vpack.c.bf16 %v2714_v30, %v2712_v29 }
 0xd71   :  { %v2680_v39 = vld [vmem:[%s5229_s3 + $0x2a0] sm:$0xff] }
 0xd72   :  { %v1864_v61 = vsel %vm645_vm2, %v1863_v32, -inf }
 0xd73   :  { %1865 = vmax.xlane.f32.xlu0 %v1864_v61  ;;  %v2682_v61 = vld [vmem:[%s5229_s3 + $0x2b0] sm:$0xff] }
 0xe00   :  { %v1866_v16 = vpop.xlane.xlu0 %1865 }
 0xe01   :  { %v1867_v40 = vsub.f32 %v1863_v32, %v1866_v16  ;;  %v3346_v32 = vpack.c.bf16 %v2683_v33, %v2681_v27  ;;  %v2685_v16 = vld [vmem:[%s5229_s3 + $0x2c8] sm:$0xff]  ;;  %v2716_v27 = vld [vmem:[%s5229_s3 + $0x3c0] sm:$0xff]  ;;  %v2718_v33 = vld [vmem:[%s5229_s3 + $0x3d0] sm:$0xff] }
 0xe03   :  { %v1868_v41 = vmul.f32 1.442695, %v1867_v40  ;;  %v2687_v40 = vld [vmem:[%s5229_s3 + $0x2d8] sm:$0xff] }
 0xe05   :  { %3517 = vpow2.f32 %v1868_v41  ;;  %v3348_v41 = vpack.c.bf16 %v2682_v61, %v2680_v39  ;;  %v3384_v39 = vpack.c.bf16 %v2718_v33, %v2716_v27 }
 0xe0f   :  { %v3518_v42 = vpop.eup %3517 }
 0xe10   :  { %v1870_v43 = vsel %vm645_vm2, %v3518_v42, 0.0 }
 0xe11   :  { %1871 = vadd.xlane.f32.xlu1 %v1870_v43  ;;  %v2684_v43 = vld [vmem:[%s5229_s3 + $0x2c0] sm:$0xff] }
 0xe9e   :  { %v1872_v54 = vpop.xlane.xlu1 %1871 }
 0xe9f   :  { %3519 = vrcp.f32 %v1872_v54  ;;  %v2686_v54 = vld [vmem:[%s5229_s3 + $0x2d0] sm:$0xff] }
 0xea0   :  { %v3352_v53 = vpack.c.bf16 %v2686_v54, %v2684_v43 }
 0xea9   :  { %v3520_v45 = vpop.eup %3519 }
 0xeaa   :  { %v1874_v46 = vmul.f32 %v3520_v45, %v3518_v42  ;;  %v3350_v42 = vpack.c.bf16 %v2687_v40, %v2685_v16  ;;  %v2691_v45 = vld [vmem:[%s5229_s3 + $0x2f8] sm:$0xff]  ;;  %v2720_v16 = vld [vmem:[%s5229_s3 + $0x3e0] sm:$0xff]  ;;  %v2722_v40 = vld [vmem:[%s5229_s3 + $0x3f0] sm:$0xff] }
 0xeac   :  { %2866 = vmatmul.mubr.msk.f32.vlgmr.msra.gmra.mrb[10].mxu1 %vm645_vm2, %v1874_v46  ;;  %v3354_v46 = vpack.c.bf16 %v2691_v45, %v2689_v44 }
 0xead   :  { %2869 = vmatpush3.xpose.msra.mxu1 %v1789_v47  ;;  %2870 = vmatprep.mubr.msk.f32.mxu1 %vm3802_vm1, %v3801_v20  ;;  %v2688_v47 = vld [vmem:[%s5229_s3 + $0x2e0] sm:$0xff] }
 0xeae   :  { %2873 = vmatprep.subr.mxu1 %v3801_v20 }
 0xeb0   :  { %2871 = vmatmul.mubr.f32.vlgmr.msra.gmra.mrb[12].mxu1 %v1720_v49  ;;  %v2693_v49 = vld [vmem:[%s5229_s3 + $0x308] sm:$0xff] }
 0xeb1   :  { %2874 = vmatpush3.msra.mxu1 %v1791_v50  ;;  %2875 = vmatprep.mubr.msk.f32.mxu1 %vm3802_vm1, %v3801_v20  ;;  %v2661_v20 = vld [vmem:[%s5229_s3 + $0x208] sm:$0xff]  ;;  %v2695_v50 = vld [vmem:[%s5229_s3 + $0x318] sm:$0xff] }
 0xeb2   :  { %v3326_v63 = vpack.c.bf16 %v2663_v60, %v2661_v20  ;;  %v2698_v20 = vld [vmem:[%s5229_s3 + $0x330] sm:$0xff]  ;;  %v2701_v60 = vld [vmem:[%s5229_s3 + $0x348] sm:$0xff] }
 0xeb3   :  { %v3366_v0 = vpack.c.bf16 %v2703_v62, %v2701_v60  ;;  %v2728_v60 = vld [vmem:[%s5233_s7 + $0x1a0] sm:$0xff]  ;;  %v2730_v62 = vld [vmem:[%s5233_s7 + $0x1b0] sm:$0xff] }
 0xeb4   :  { %3327 = vmatprep.subr.bf16.mxu0 %v3326_v63  ;;  %v3396_v1 = vpack.c.bf16 %v2730_v62, %v2728_v60  ;;  %v2764_v60 = vld [vmem:[%s5233_s7 + $0x2c0] sm:$0xff]  ;;  %v2766_v62 = vld [vmem:[%s5233_s7 + $0x2d0] sm:$0xff] }
 0xeb5   :  { %3329 = vmatpush1.bf16.msra.mxu0 %v3328_v8  ;;  %v2705_v8 = vld [vmem:[%s5229_s3 + $0x368] sm:$0xff] }
 0xeb6   :  { %3331 = vmatprep.subr.bf16.mxu0 %v3330_v9  ;;  %v2707_v9 = vld [vmem:[%s5229_s3 + $0x378] sm:$0xff] }
 0xeb7   :  { %v3370_v37 = vpack.c.bf16 %v2707_v9, %v2705_v8  ;;  %v2732_v8 = vld [vmem:[%s5233_s7 + $0x1c0] sm:$0xff]  ;;  %v2734_v9 = vld [vmem:[%s5233_s7 + $0x1d0] sm:$0xff] }
 0xeb8   :  { %v3400_v36 = vpack.c.bf16 %v2734_v9, %v2732_v8  ;;  %v2768_v8 = vld [vmem:[%s5233_s7 + $0x2e0] sm:$0xff]  ;;  %v2770_v9 = vld [vmem:[%s5233_s7 + $0x2f0] sm:$0xff] }
 0xeb9   :  { %3333 = vmatpush1.bf16.msra.mxu0 %v3332_v12  ;;  %v2709_v12 = vld [vmem:[%s5229_s3 + $0x388] sm:$0xff] }
 0xeba   :  { %3335 = vmatprep.subr.bf16.mxu0 %v3334_v13  ;;  %v2711_v13 = vld [vmem:[%s5229_s3 + $0x398] sm:$0xff] }
 0xebb   :  { %v3374_v24 = vpack.c.bf16 %v2711_v13, %v2709_v12  ;;  %v2736_v12 = vld [vmem:[%s5233_s7 + $0x1e0] sm:$0xff]  ;;  %v2738_v13 = vld [vmem:[%s5233_s7 + $0x1f0] sm:$0xff] }
 0xebc   :  { %v3404_v15 = vpack.c.bf16 %v2738_v13, %v2736_v12 }
 0xebd   :  { %3337 = vmatpush1.bf16.msra.mxu0 %v3336_v18  ;;  %v2713_v18 = vld [vmem:[%s5229_s3 + $0x3a8] sm:$0xff] }
 0xebe   :  { %3339 = vmatprep.subr.bf16.mxu0 %v3338_v26  ;;  %v2715_v26 = vld [vmem:[%s5229_s3 + $0x3b8] sm:$0xff] }
 0xebf   :  { %v3378_v28 = vpack.c.bf16 %v2715_v26, %v2713_v18  ;;  %v2740_v18 = vld [vmem:[%s5233_s7 + $0x200] sm:$0xff]  ;;  %v2742_v26 = vld [vmem:[%s5233_s7 + $0x210] sm:$0xff] }
 0xec0   :  { %v3408_v29 = vpack.c.bf16 %v2742_v26, %v2740_v18 }
 0xec1   :  { %3341 = vmatpush1.bf16.msra.mxu0 %v3340_v31  ;;  %v2717_v31 = vld [vmem:[%s5229_s3 + $0x3c8] sm:$0xff] }
 0xec2   :  { %3343 = vmatprep.subr.bf16.mxu0 %v3342_v21  ;;  %v2719_v21 = vld [vmem:[%s5229_s3 + $0x3d8] sm:$0xff] }
 0xec3   :  { %v3382_v19 = vpack.c.bf16 %v2719_v21, %v2717_v31  ;;  %v2744_v31 = vld [vmem:[%s5233_s7 + $0x220] sm:$0xff]  ;;  %v2746_v21 = vld [vmem:[%s5233_s7 + $0x230] sm:$0xff] }
 0xec4   :  { %v3412_v27 = vpack.c.bf16 %v2746_v21, %v2744_v31  ;;  %v2773_v31 = vld [vmem:[%s5235_s9 + $0x180] sm:$0xff]  ;;  %v2775_v21 = vld [vmem:[%s5235_s9 + $0x190] sm:$0xff] }
 0xec5   :  { %3345 = vmatpush1.bf16.msra.mxu0 %v3344_v38  ;;  %v2721_v38 = vld [vmem:[%s5229_s3 + $0x3e8] sm:$0xff] }
 0xec6   :  { %3347 = vmatprep.subr.bf16.mxu0 %v3346_v32  ;;  %v2723_v32 = vld [vmem:[%s5229_s3 + $0x3f8] sm:$0xff] }
 0xec7   :  { %v3386_v61 = vpack.c.bf16 %v2723_v32, %v2721_v38  ;;  %v2748_v38 = vld [vmem:[%s5233_s7 + $0x240] sm:$0xff]  ;;  %v2750_v32 = vld [vmem:[%s5233_s7 + $0x250] sm:$0xff] }
 0xec9   :  { %3349 = vmatpush1.bf16.msra.mxu0 %v3348_v41  ;;  %v3388_v41 = vpack.c.bf16 %v2722_v40, %v2720_v16 }
 0xeca   :  { %3351 = vmatprep.subr.bf16.mxu0 %v3350_v42 }
 0xecd   :  { %3353 = vmatpush1.bf16.msra.mxu0 %v3352_v53  ;;  %v2169_v53 = vld [vmem:[#allocation8 + $0x2] sm:$0x3] }
 0xece   :  { %3355 = vmatprep.subr.bf16.mxu0 %v3354_v46  ;;  %v2174_v46 = vrot.slane %v2169_v53, %v4066_v25 }
 0xf7f   :  { %v4689_v3 = vpop.f32.mrb[10].mxu1 }
 0xf80   :  { %v2867_v4 = vpop.f32.mrb[11].mxu1 }
 0xf81   :  { %v3356_v4 = vpack.c.bf16 %v2690_v48, %v2688_v47  ;;  %v2178_v47 = vrot.slane %v2169_v53, %v4061_v23  ;;  %v2755_v53 = vld [vmem:[%s5233_s7 + $0x278] sm:$0xff] }
 0xf83   :  { %v2014_v22 = vpop.f32.mrb[12].mxu1  ;;  %3357 = vmatpush1.bf16.msra.mxu0 %v3356_v4 }
 0xf84   :  { %v2018_v6 = vmul.f32 0.10206208, %v2014_v22  ;;  %v2872_v51 = vpop.f32.mrb[13].mxu1  ;;  %v3358_v22 = vpack.c.bf16 %v2695_v50, %v2693_v49 }
 0xf85   :  { %v2694_v51 = vld [vmem:[%s5229_s3 + $0x310] sm:$0xff] }
 0xf86   :  { %v2019_v52 = vsel %vm645_vm2, %v2018_v6, -inf  ;;  %3359 = vmatprep.subr.bf16.mxu0 %v3358_v22 }
 0xf87   :  { %2020 = vmax.xlane.f32.xlu0 %v2019_v52  ;;  %v2697_v52 = vld [vmem:[%s5229_s3 + $0x328] sm:$0xff] }
0x1014   :  { %v2021_v55 = vpop.xlane.xlu0 %2020 }
0x1015   :  { %v2022_v56 = vsub.f32 %v2018_v6, %v2021_v55  ;;  %v2692_v6 = vld [vmem:[%s5229_s3 + $0x300] sm:$0xff]  ;;  %v2699_v55 = vld [vmem:[%s5229_s3 + $0x338] sm:$0xff] }
0x1017   :  { %v2023_v57 = vmul.f32 1.442695, %v2022_v56  ;;  %v3360_v56 = vpack.c.bf16 %v2694_v51, %v2692_v6 }
0x1019   :  { %3521 = vpow2.f32 %v2023_v57  ;;  %v3362_v57 = vpack.c.bf16 %v2699_v55, %v2697_v52  ;;  %3361 = vmatpush1.bf16.msra.mxu0 %v3360_v56  ;;  %v2727_v52 = vld [vmem:[%s5233_s7 + $0x198] sm:$0xff]  ;;  %v2729_v56 = vld [vmem:[%s5233_s7 + $0x1a8] sm:$0xff] }
0x101b   :  { %3363 = vmatprep.subr.bf16.mxu0 %v3362_v57  ;;  %v2731_v57 = vld [vmem:[%s5233_s7 + $0x1b8] sm:$0xff] }
0x1023   :  { %v4692_v58 = vpop.eup %3521 }
0x1024   :  { %v2025_v59 = vsel %vm645_vm2, %v4692_v58, 0.0 }
0x1025   :  { %2026 = vadd.xlane.f32.xlu1 %v2025_v59  ;;  %v2696_v59 = vld [vmem:[%s5229_s3 + $0x320] sm:$0xff] }
0x1026   :  { %v3364_v63 = vpack.c.bf16 %v2698_v20, %v2696_v59  ;;  %v3394_v20 = vpack.c.bf16 %v2731_v57, %v2729_v56  ;;  %v2765_v56 = vld [vmem:[%s5233_s7 + $0x2c8] sm:$0xff]  ;;  %v2767_v57 = vld [vmem:[%s5233_s7 + $0x2d8] sm:$0xff] }
0x1028   :  { %3365 = vmatpush1.bf16.msra.mxu0 %v3364_v63  ;;  %v2733_v63 = vld [vmem:[%s5233_s7 + $0x1c8] sm:$0xff] }
0x1029   :  { %3367 = vmatprep.subr.bf16.mxu0 %v3366_v0  ;;  %v2735_v0 = vld [vmem:[%s5233_s7 + $0x1d8] sm:$0xff] }
0x102a   :  { %v3398_v2 = vpack.c.bf16 %v2735_v0, %v2733_v63  ;;  %v2769_v63 = vld [vmem:[%s5233_s7 + $0x2e8] sm:$0xff]  ;;  %v2771_v0 = vld [vmem:[%s5233_s7 + $0x2f8] sm:$0xff] }
0x102c   :  { %3369 = vmatpush1.bf16.msra.mxu0 %v3368_v10  ;;  %v2737_v10 = vld [vmem:[%s5233_s7 + $0x1e8] sm:$0xff] }
0x102d   :  { %3371 = vmatprep.subr.bf16.mxu0 %v3370_v37  ;;  %v2739_v37 = vld [vmem:[%s5233_s7 + $0x1f8] sm:$0xff] }
0x102e   :  { %v3402_v11 = vpack.c.bf16 %v2739_v37, %v2737_v10  ;;  %v3436_v10 = vpack.c.bf16 %v2770_v9, %v2768_v8  ;;  %v2774_v37 = vld [vmem:[%s5235_s9 + $0x188] sm:$0xff] }
0x1030   :  { %3373 = vmatpush1.bf16.msra.mxu0 %v3372_v14  ;;  %v2741_v14 = vld [vmem:[%s5233_s7 + $0x208] sm:$0xff] }
0x1031   :  { %3375 = vmatprep.subr.bf16.mxu0 %v3374_v24  ;;  %v2743_v24 = vld [vmem:[%s5233_s7 + $0x218] sm:$0xff] }
0x1032   :  { %v3406_v17 = vpack.c.bf16 %v2743_v24, %v2741_v14  ;;  %v2255_v24 = vld [vmem:[#allocation10 + $0x2] sm:$0x3] }
0x1033   :  { %v2280_v18 = vrot.slane %v2255_v24, %v4066_v25 }
0x1034   :  { %3377 = vmatpush1.bf16.msra.mxu0 %v3376_v34  ;;  %v2745_v34 = vld [vmem:[%s5233_s7 + $0x228] sm:$0xff] }
0x1035   :  { %3379 = vmatprep.subr.bf16.mxu0 %v3378_v28  ;;  %v2747_v28 = vld [vmem:[%s5233_s7 + $0x238] sm:$0xff] }
0x1036   :  { %v3410_v30 = vpack.c.bf16 %v2747_v28, %v2745_v34 }
0x1038   :  { %3381 = vmatpush1.bf16.msra.mxu0 %v3380_v35  ;;  %v2749_v35 = vld [vmem:[%s5233_s7 + $0x248] sm:$0xff] }
0x1039   :  { %3383 = vmatprep.subr.bf16.mxu0 %v3382_v19  ;;  %v2751_v19 = vld [vmem:[%s5233_s7 + $0x258] sm:$0xff] }
0x103a   :  { %v3414_v33 = vpack.c.bf16 %v2751_v19, %v2749_v35 }
0x103c   :  { %3385 = vmatpush1.bf16.msra.mxu0 %v3384_v39  ;;  %v3416_v39 = vpack.c.bf16 %v2750_v32, %v2748_v38 }
0x103d   :  { %3387 = vmatprep.subr.bf16.mxu0 %v3386_v61 }
0x1040   :  { %3389 = vmatpush1.bf16.msra.mxu0 %v3388_v41 }
0x10b2   :  { %v2027_v42 = vpop.xlane.xlu1 %2026 }
0x10b3   :  { %3523 = vrcp.f32 %v2027_v42 }
0x10bd   :  { %v3524_v43 = vpop.eup %3523 }
0x10be   :  { %v2029_v54 = vmul.f32 %v3524_v43, %v4692_v58 }
0x10c0   :  { %2876 = vmatmul.mubr.msk.f32.vlgmr.msra.gmra.mrb[14].mxu1 %vm645_vm2, %v2029_v54 }
0x1193   :  { %v2099_v44 = vpop.f32.mrb[14].mxu1 }
0x1194   :  { %v2877_v45 = vpop.f32.mrb[15].mxu1  ;;  %2245 = vmatprep.mubr.f32.mxu0 %v2099_v44 }
0x1195   :  { %2246 = vmatmul.mubr.f32.vlgmr.msra.gmra.mrb[18].mxu0 %v4689_v3  ;;  %v2725_v3 = vld [vmem:[%s5233_s7 + $0x188] sm:$0xff] }
0x1196   :  { %v3390_v55 = vpack.c.bf16 %v2727_v52, %v2725_v3  ;;  %v2753_v45 = vld [vmem:[%s5233_s7 + $0x268] sm:$0xff]  ;;  %v2763_v3 = vld [vmem:[%s5233_s7 + $0x2b8] sm:$0xff] }
0x1198   :  { %3391 = vmatprep.subr.bf16.mxu1 %v3390_v55  ;;  %v2760_v55 = vld [vmem:[%s5233_s7 + $0x2a0] sm:$0xff] }
0x1268   :  { %v2247_v48 = vpop.f32.mrb[18].mxu0 }
0x1269   :  { %v2248_v49 = vadd.f32 %v2247_v48, %v2174_v46  ;;  %v2249_v50 = vpop.f32.mrb[19].mxu0  ;;  %v3418_v46 = vpack.c.bf16 %v2755_v53, %v2753_v45  ;;  %v2754_v48 = vld [vmem:[%s5233_s7 + $0x270] sm:$0xff]  ;;  %v2786_v53 = vld [vmem:[%s5235_s9 + $0x1e8] sm:$0xff] }
0x126a   :  { %v2250_v4 = vadd.f32 %v2249_v50, %v2178_v47  ;;  %v2752_v47 = vld [vmem:[%s5233_s7 + $0x260] sm:$0xff]  ;;  %v2757_v50 = vld [vmem:[%s5233_s7 + $0x288] sm:$0xff]  ;;  %v2783_v45 = vld [vmem:[%s5235_s9 + $0x1d0] sm:$0xff] }
0x126b   :  { %v2252_v58 = vadd.f32 %v2248_v49, %v4654_v7  ;;  %v2726_v7 = vld [vmem:[%s5233_s7 + $0x190] sm:$0xff]  ;;  %v3420_v49 = vpack.c.bf16 %v2754_v48, %v2752_v47 }
0x126c   :  { %v4894_v22 = vadd.f32 %v2250_v4, %v4652_v5  ;;  %v2724_v5 = vld [vmem:[%s5233_s7 + $0x180] sm:$0xff]  ;;  %v2759_v4 = vld [vmem:[%s5233_s7 + $0x298] sm:$0xff] }
0x126d   :  { %v3392_v59 = vpack.c.bf16 %v2726_v7, %v2724_v5  ;;  %v2762_v7 = vld [vmem:[%s5233_s7 + $0x2b0] sm:$0xff] }
0x126e   :  { %v2258_v6 = vsel %vm357_vm0, %v4894_v22, 0.0 }
0x126f   :  { %v2259_v51 = vadd.f32 %v2258_v6, %v2252_v58  ;;  %3393 = vmatpush1.bf16.msra.mxu1 %v3392_v59  ;;  %v2758_v6 = vld [vmem:[%s5233_s7 + $0x290] sm:$0xff]  ;;  %v3428_v59 = vpack.c.bf16 %v2762_v7, %v2760_v55 }
0x1270   :  { %3395 = vmatprep.subr.bf16.mxu1 %v3394_v20  ;;  %v3430_v20 = vpack.c.bf16 %v2767_v57, %v2765_v56  ;;  %v2793_v56 = vld [vmem:[%s5235_s9 + $0x220] sm:$0xff]  ;;  %v2795_v57 = vld [vmem:[%s5235_s9 + $0x230] sm:$0xff] }
0x1271   :  { %2260 = vadd.xlane.f32.xlu0 %v2259_v51  ;;  %v2761_v51 = vld [vmem:[%s5233_s7 + $0x2a8] sm:$0xff] }
0x1272   :  { %v3426_v5 = vpack.c.bf16 %v2763_v3, %v2761_v51  ;;  %v2789_v51 = vld [vmem:[%s5235_s9 + $0x200] sm:$0xff]  ;;  %v2791_v3 = vld [vmem:[%s5235_s9 + $0x210] sm:$0xff] }
0x1273   :  { %3397 = vmatpush1.bf16.msra.mxu1 %v3396_v1  ;;  %v3432_v1 = vpack.c.bf16 %v2766_v62, %v2764_v60  ;;  %v3456_v55 = vpack.c.bf16 %v2791_v3, %v2789_v51  ;;  %v3460_v60 = vpack.c.bf16 %v2795_v57, %v2793_v56 }
0x1274   :  { %3399 = vmatprep.subr.bf16.mxu1 %v3398_v2  ;;  %v3434_v2 = vpack.c.bf16 %v2771_v0, %v2769_v63  ;;  %v2797_v63 = vld [vmem:[%s5235_s9 + $0x240] sm:$0xff]  ;;  %v2799_v0 = vld [vmem:[%s5235_s9 + $0x250] sm:$0xff] }
0x1275   :  { %v3464_v8 = vpack.c.bf16 %v2799_v0, %v2797_v63 }
0x1277   :  { %3401 = vmatpush1.bf16.msra.mxu1 %v3400_v36  ;;  %v2776_v36 = vld [vmem:[%s5235_s9 + $0x198] sm:$0xff] }
0x1278   :  { %3403 = vmatprep.subr.bf16.mxu1 %v3402_v11  ;;  %v3438_v11 = vpack.c.bf16 %v2776_v36, %v2774_v37  ;;  %v2803_v37 = vld [vmem:[%s5235_s9 + $0x270] sm:$0xff]  ;;  %v2806_v36 = vld [vmem:[%s5235_s9 + $0x288] sm:$0xff] }
0x127b   :  { %3405 = vmatpush1.bf16.msra.mxu1 %v3404_v15  ;;  %v2257_v15 = vld [vmem:[#allocation11 + $0x2] sm:$0x3] }
0x127c   :  { %3407 = vmatprep.subr.bf16.mxu1 %v3406_v17  ;;  %v2284_v17 = vrot.slane %v2255_v24, %v4061_v23  ;;  %v2297_v28 = vrot.slane %v2257_v15, %v4061_v23  ;;  %v2807_v24 = vld [vmem:[%s5235_s9 + $0x290] sm:$0xff] }
0x127f   :  { %3409 = vmatpush1.bf16.msra.mxu1 %v3408_v29 }
0x1280   :  { %3411 = vmatprep.subr.bf16.mxu1 %v3410_v30  ;;  %v2293_v30 = vrot.slane %v2257_v15, %v4066_v25  ;;  %v2810_v15 = vld [vmem:[%s5235_s9 + $0x2a8] sm:$0xff] }
0x1283   :  { %3413 = vmatpush1.bf16.msra.mxu1 %v3412_v27  ;;  %v2778_v27 = vld [vmem:[%s5235_s9 + $0x1a8] sm:$0xff] }
0x1284   :  { %3415 = vmatprep.subr.bf16.mxu1 %v3414_v33  ;;  %v2780_v33 = vld [vmem:[%s5235_s9 + $0x1b8] sm:$0xff] }
0x1287   :  { %3417 = vmatpush1.bf16.msra.mxu1 %v3416_v39  ;;  %v3440_v39 = vpack.c.bf16 %v2775_v21, %v2773_v31 }
0x1288   :  { %3419 = vmatprep.subr.bf16.mxu1 %v3418_v46  ;;  %v2788_v46 = vld [vmem:[%s5235_s9 + $0x1f8] sm:$0xff] }
0x1289   :  { %v3450_v48 = vpack.c.bf16 %v2788_v46, %v2786_v53 }
0x128b   :  { %3421 = vmatpush1.bf16.msra.mxu1 %v3420_v49  ;;  %v2785_v49 = vld [vmem:[%s5235_s9 + $0x1e0] sm:$0xff] }
0x12fe   :  { %v2261_v61 = vpop.xlane.xlu0 %2260 }
0x12ff   :  { %v2262_v16 = vmul.f32 0.0052083335, %v2261_v61  ;;  %v3442_v61 = vpack.c.bf16 %v2780_v33, %v2778_v27  ;;  %v2818_v33 = vld [vmem:[%s5235_s9 + $0x2e8] sm:$0xff] }
0x1301   :  { %v2263_v40 = vsub.f32 %v2252_v58, %v2262_v16  ;;  %v2264_v41 = vsub.f32 %v4894_v22, %v2262_v16  ;;  %v2756_v22 = vld [vmem:[%s5233_s7 + $0x280] sm:$0xff]  ;;  %v3422_v58 = vpack.c.bf16 %v2759_v4, %v2757_v50  ;;  %v2787_v50 = vld [vmem:[%s5235_s9 + $0x1f0] sm:$0xff]  ;;  %v2790_v4 = vld [vmem:[%s5235_s9 + $0x208] sm:$0xff] }
0x1302   :  { %v3424_v52 = vpack.c.bf16 %v2758_v6, %v2756_v22  ;;  %v2777_v16 = vld [vmem:[%s5235_s9 + $0x1a0] sm:$0xff]  ;;  %v2792_v22 = vld [vmem:[%s5235_s9 + $0x218] sm:$0xff] }
0x1303   :  { %v2265_v42 = vmul.f32 %v2263_v40, %v2263_v40  ;;  %v2266_v43 = vmul.f32 %v2264_v41, %v2264_v41  ;;  %3423 = vmatprep.subr.bf16.mxu1 %v3422_v58  ;;  %v3452_v58 = vpack.c.bf16 %v2787_v50, %v2785_v49  ;;  %v3454_v6 = vpack.c.bf16 %v2792_v22, %v2790_v4  ;;  %v2490_v49 = vld [vmem:[#allocation14 + $0x2] sm:$0x3] }
0x1304   :  { %3425 = vmatpush1.bf16.msra.mxu1 %v3424_v52  ;;  %v2794_v52 = vld [vmem:[%s5235_s9 + $0x228] sm:$0xff]  ;;  %v2495_v50 = vrot.slane %v2490_v49, %v4066_v25  ;;  %v2499_v4 = vrot.slane %v2490_v49, %v4061_v23 }
0x1305   :  { %v2267_v54 = vsel %vm357_vm0, %v2266_v43, 0.0  ;;  %3427 = vmatprep.subr.bf16.mxu1 %v3426_v5  ;;  %v2796_v5 = vld [vmem:[%s5235_s9 + $0x238] sm:$0xff] }
0x1306   :  { %v2268_v44 = vadd.f32 %v2267_v54, %v2265_v42  ;;  %v2784_v42 = vld [vmem:[%s5235_s9 + $0x1d8] sm:$0xff]  ;;  %v3458_v7 = vpack.c.bf16 %v2796_v5, %v2794_v52 }
0x1308   :  { %2269 = vadd.xlane.f32.xlu1 %v2268_v44  ;;  %3429 = vmatpush1.bf16.msra.mxu1 %v3428_v59  ;;  %v2781_v44 = vld [vmem:[%s5235_s9 + $0x1c0] sm:$0xff]  ;;  %v2798_v59 = vld [vmem:[%s5235_s9 + $0x248] sm:$0xff] }
0x1309   :  { %3431 = vmatprep.subr.bf16.mxu1 %v3430_v20  ;;  %v3448_v47 = vpack.c.bf16 %v2783_v45, %v2781_v44  ;;  %v2800_v20 = vld [vmem:[%s5235_s9 + $0x258] sm:$0xff] }
0x130a   :  { %v3462_v62 = vpack.c.bf16 %v2800_v20, %v2798_v59 }
0x130c   :  { %3433 = vmatpush1.bf16.msra.mxu1 %v3432_v1  ;;  %v2802_v1 = vld [vmem:[%s5235_s9 + $0x268] sm:$0xff] }
0x130d   :  { %3435 = vmatprep.subr.bf16.mxu1 %v3434_v2  ;;  %v2804_v2 = vld [vmem:[%s5235_s9 + $0x278] sm:$0xff] }
0x130e   :  { %v3466_v9 = vpack.c.bf16 %v2804_v2, %v2802_v1 }
0x1310   :  { %3437 = vmatpush1.bf16.msra.mxu1 %v3436_v10  ;;  %v2801_v10 = vld [vmem:[%s5235_s9 + $0x260] sm:$0xff] }
0x1311   :  { %3439 = vmatprep.subr.bf16.mxu1 %v3438_v11  ;;  %v2808_v11 = vld [vmem:[%s5235_s9 + $0x298] sm:$0xff] }
0x1395   :  { %v2270_v12 = vpop.xlane.xlu1 %2269 }
0x1396   :  { %v2271_v13 = vmul.f32 0.0052083335, %v2270_v12  ;;  %v3468_v12 = vpack.c.bf16 %v2803_v37, %v2801_v10 }
0x1398   :  { %v2272_v14 = vadd.f32 1e-05, %v2271_v13  ;;  %v3470_v13 = vpack.c.bf16 %v2808_v11, %v2806_v36 }
0x139a   :  { %3525 = vrsqrt.f32 %v2272_v14  ;;  %v2805_v14 = vld [vmem:[%s5235_s9 + $0x280] sm:$0xff] }
0x13a4   :  { %v3526_v26 = vpop.eup %3525 }
0x13a5   :  { %v2275_v34 = vmul.f32 %v3526_v26, %v2264_v41  ;;  %v2274_v29 = vmul.f32 %v3526_v26, %v2263_v40  ;;  %v2779_v40 = vld [vmem:[%s5235_s9 + $0x1b0] sm:$0xff]  ;;  %v2782_v41 = vld [vmem:[%s5235_s9 + $0x1c8] sm:$0xff] }
0x13a6   :  { %v3444_v43 = vpack.c.bf16 %v2779_v40, %v2777_v16  ;;  %v3446_v54 = vpack.c.bf16 %v2784_v42, %v2782_v41  ;;  %v2817_v16 = vld [vmem:[%s5235_s9 + $0x2e0] sm:$0xff]  ;;  %v2819_v40 = vld [vmem:[%s5235_s9 + $0x2f0] sm:$0xff]  ;;  %v2352_v42 = vld [vmem:[#allocation13 + $0x2] sm:$0x3] }
0x13a7   :  { %v2288_v35 = vmul.f32 %v2284_v17, %v2275_v34  ;;  %v2287_v19 = vmul.f32 %v2280_v18, %v2274_v29  ;;  %v2812_v17 = vld [vmem:[%s5235_s9 + $0x2b8] sm:$0xff]  ;;  %v3472_v18 = vpack.c.bf16 %v2807_v24, %v2805_v14  ;;  %v2809_v34 = vld [vmem:[%s5235_s9 + $0x2a0] sm:$0xff]  ;;  %v2814_v29 = vld [vmem:[%s5235_s9 + $0x2c8] sm:$0xff]  ;;  %v3484_v41 = vpack.c.bf16 %v2819_v40, %v2817_v16 }
0x13a8   :  { %v3474_v26 = vpack.c.bf16 %v2812_v17, %v2810_v15 }
0x13a9   :  { %v5067_v38 = vadd.f32 %v2297_v28, %v2288_v35  ;;  %v5069_v32 = vadd.f32 %v2293_v30, %v2287_v19  ;;  %v2811_v28 = vld [vmem:[%s5235_s9 + $0x2b0] sm:$0xff]  ;;  %v2816_v30 = vld [vmem:[%s5235_s9 + $0x2d8] sm:$0xff]  ;;  %v2813_v35 = vld [vmem:[%s5235_s9 + $0x2c0] sm:$0xff] }
0x13aa   :  { %v3476_v31 = vpack.c.bf16 %v2811_v28, %v2809_v34  ;;  %v3478_v21 = vpack.c.bf16 %v2816_v30, %v2814_v29  ;;  %v2815_v19 = vld [vmem:[%s5235_s9 + $0x2d0] sm:$0xff] }
0x13ab   :  { %2772 = vmatprep.mubr.msk.f32.mxu1 %vm357_vm0, %v5067_v38  ;;  %v3480_v27 = vpack.c.bf16 %v2815_v19, %v2813_v35 }
0x13ac   :  { %2432 = vmatmul.mubr.f32.vlgmr.msra.gmra.mrb[16].mxu1 %v5069_v32 }
0x13ad   :  { %3441 = vmatpush1.bf16.msra.mxu1 %v3440_v39  ;;  %v2820_v39 = vld [vmem:[%s5235_s9 + $0x2f8] sm:$0xff]  ;;  %s3803_s9 = smov [#allocation19]  }
0x13ae   :  { %3443 = vmatprep.subr.bf16.mxu1 %v3442_v61  ;;  %v3482_v61 = vpack.c.bf16 %v2820_v39, %v2818_v33  ;;  %s2634_s24 = sshll.u32 %s3803_s9, 4  ;;  %s2635_s24 = int_to_ptr.vmem [resolvable:$true] %s2634_s24 }
0x13af   :  { %s3749_s25 = scalar_lea.vmem %s2635_s24, 256  ;;  %p3754_p11 = scmp.lt.s32.totalorder %s2635_s24, %s2635_s24 }
0x13b0   :  { %p3750_p10 = scmp.ne.s32.totalorder %s2635_s24, %s3749_s25  ;;  %p3755_p12 = scmp.lt.s32.totalorder %s3749_s25, %s3749_s25 }
0x13b1   :  { %3445 = vmatpush1.bf16.msra.mxu1 %v3444_v43  ;;  %v2357_v43 = vrot.slane %v2352_v42, %v4066_v25 }
0x13b2   :  { %3447 = vmatprep.subr.bf16.mxu1 %v3446_v54  ;;  %v2361_v54 = vrot.slane %v2352_v42, %v4061_v23  ;;  %p3756_p13 = por %p3755_p12, %p3754_p11 }
0x13b4   :  { %p3757_p0 = pnand %p3756_p13, %p3750_p10 }
0x13b5   :  { %3449 = vmatpush1.bf16.msra.mxu1 %v3448_v47 }
0x13b6   :  { %3451 = vmatprep.subr.bf16.mxu1 %v3450_v48 }
0x13b9   :  { %3453 = vmatpush1.bf16.msra.mxu1 %v3452_v58 }
0x13ba   :  { %3455 = vmatprep.subr.bf16.mxu1 %v3454_v6 }
0x13bd   :  { %3457 = vmatpush1.bf16.msra.mxu1 %v3456_v55 }
0x13be   :  { %3459 = vmatprep.subr.bf16.mxu1 %v3458_v7 }
0x13c1   :  { %3461 = vmatpush1.bf16.msra.mxu1 %v3460_v60 }
0x13c2   :  { %3463 = vmatprep.subr.bf16.mxu1 %v3462_v62 }
0x13c5   :  { %3465 = vmatpush1.bf16.msra.mxu1 %v3464_v8 }
0x13c6   :  { %3467 = vmatprep.subr.bf16.mxu1 %v3466_v9 }
0x13c9   :  { %3469 = vmatpush1.bf16.msra.mxu1 %v3468_v12 }
0x13ca   :  { %3471 = vmatprep.subr.bf16.mxu1 %v3470_v13 }
0x13cd   :  { %3473 = vmatpush1.bf16.msra.mxu1 %v3472_v18 }
0x13ce   :  { %3475 = vmatprep.subr.bf16.mxu1 %v3474_v26 }
0x13d1   :  { %3477 = vmatpush1.bf16.msra.mxu1 %v3476_v31 }
0x13d2   :  { %3479 = vmatprep.subr.bf16.mxu1 %v3478_v21 }
0x13d5   :  { %3481 = vmatpush1.bf16.msra.mxu1 %v3480_v27 }
0x13d6   :  { %3483 = vmatprep.subr.bf16.mxu1 %v3482_v61 }
0x13d9   :  { %3485 = vmatpush1.bf16.msra.mxu1 %v3484_v41 }
0x147f   :  { %v2433_v44 = vpop.f32.mrb[16].mxu1 }
0x1480   :  { %v2434_v45 = vadd.f32 %v2433_v44, %v2357_v43  ;;  %v2435_v53 = vpop.f32.mrb[17].mxu1 }
0x1481   :  { %v2436_v46 = vadd.f32 %v2435_v53, %v2361_v54 }
0x1482   :  { %v2438_v48 = vmax.f32 %v2434_v45, 0.0 }
0x1483   :  { %v2439_v47 = vmax.f32 %v2436_v46, 0.0 }
0x1485   :  { %2821 = vmatprep.mubr.msk.f32.mxu1 %vm357_vm0, %v2439_v47 }
0x1486   :  { %2570 = vmatmul.mubr.f32.vlgmr.msra.gmra.mrb[18].mxu1 %v2438_v48 }
0x1559   :  { %v2571_v22 = vpop.f32.mrb[18].mxu1 }
0x155a   :  { %v2572_v58 = vadd.f32 %v2571_v22, %v2495_v50  ;;  %v2573_v6 = vpop.f32.mrb[19].mxu1 }
0x155b   :  { %v2574_v51 = vadd.f32 %v2573_v6, %v2499_v4 }
0x155c   :  { %v2576_v52 = vadd.f32 %v2572_v58, %v5069_v32  ;;  %v2581_v32 = vld [vmem:[#allocation17 + $0x2] sm:$0x3] }
0x155d   :  { %v2577_v3 = vadd.f32 %v2574_v51, %v5067_v38  ;;  %v2579_v38 = vld [vmem:[#allocation16 + $0x2] sm:$0x3]  ;;  %v2617_v11 = vrot.slane %v2581_v32, %v4066_v25  ;;  %v2621_v12 = vrot.slane %v2581_v32, %v4061_v23 }
0x155e   :  { %v2604_v8 = vrot.slane %v2579_v38, %v4066_v25  ;;  %v2608_v9 = vrot.slane %v2579_v38, %v4061_v23 }
0x155f   :  { %v2582_v5 = vsel %vm357_vm0, %v2577_v3, 0.0 }
0x1560   :  { %v2583_v55 = vadd.f32 %v2582_v5, %v2576_v52 }
0x1562   :  { %2584 = vadd.xlane.f32.xlu0 %v2583_v55 }
0x15ef   :  { %v2585_v7 = vpop.xlane.xlu0 %2584 }
0x15f0   :  { %v2586_v56 = vmul.f32 0.0052083335, %v2585_v7 }
0x15f2   :  { %v2587_v57 = vsub.f32 %v2576_v52, %v2586_v56  ;;  %v2588_v59 = vsub.f32 %v2577_v3, %v2586_v56 }
0x15f4   :  { %v2590_v20 = vmul.f32 %v2588_v59, %v2588_v59  ;;  %v2589_v60 = vmul.f32 %v2587_v57, %v2587_v57 }
0x15f6   :  { %v2591_v62 = vsel %vm357_vm0, %v2590_v20, 0.0 }
0x15f7   :  { %v2592_v63 = vadd.f32 %v2591_v62, %v2589_v60 }
0x15f9   :  { %2593 = vadd.xlane.f32.xlu1 %v2592_v63 }
0x1686   :  { %v2594_v0 = vpop.xlane.xlu1 %2593 }
0x1687   :  { %v2595_v1 = vmul.f32 0.0052083335, %v2594_v0 }
0x1689   :  { %v2596_v2 = vadd.f32 1e-05, %v2595_v1 }
0x168b   :  { %3527 = vrsqrt.f32 %v2596_v2 }
0x1695   :  { %v3528_v10 = vpop.eup %3527 }
0x1696   :  { %v2599_v37 = vmul.f32 %v3528_v10, %v2588_v59  ;;  %v2598_v36 = vmul.f32 %v3528_v10, %v2587_v57 }
0x1698   :  { %v2611_v13 = vmul.f32 %v2604_v8, %v2598_v36  ;;  %v2612_v14 = vmul.f32 %v2608_v9, %v2599_v37 }
0x169a   :  { %v2624_v24 = vadd.f32 %v2617_v11, %v2611_v13  ;;  %v2625_v15 = vadd.f32 %v2621_v12, %v2612_v14 }
0x169c   :  { %2626 = vst [vmem:[#allocation19] sm:$0xff] %v2624_v24  ;;  %2627 = vst.msk [vmem:[#allocation19 + $0x8] sm:$0xff] %vm357_vm0, %v2625_v15 }
0x169d   :  { %3760 = shalt.err (!%p3757_p0)
}
0x169e   :  { %s3761_s30 = scalar_lea.hbm %s5239_s13, 256 }
0x169f   :  { %p3762_p1 = scmp.ne.s32.totalorder %s5239_s13, %s3761_s30  ;;  %p3765_p2 = scmp.lt.u32.totalorder %s3761_s30, %s5239_s13 }
0x16a1   :  { %p3767_p3 = pnand %p3765_p2, %p3762_p1 }
0x16a3   :  { %3770 = shalt.err (!%p3767_p3)
}
0x16a4   :  { %2637 = dma.vmem_to_hbm [thread:$0]  %s2635_s24, 256, %s5239_s13, [#allocation4]  }
0x16a5   :  { %3783 = dma.done.wait [#allocation4], 256  }
0x16a6   :  { %3784 = vsyncadd [#allocation4], 4294967040 }
0x16a7   :  { %2641 = vsyncpa [#allocation3], 1 }
0x16a8   :  { %2642 = vsyncpa [#allocation6], 1 }
0x16a9   :  { %2643 = vsyncpa [#allocation9], 1 }
0x16aa   :  { %2644 = vsyncpa [#allocation12], 1 }
0x16ab   :  { %2645 = vsyncpa [#allocation15], 1 }
0x16ac   :  { %2646 = vsyncpa [#allocation18], 1 }
0x16ad   :  { %2647 = vsyncpa [#allocation4], 1 }

</bundles_post_ra>
